<compile_context>
chip_gen: v7x
topology: tpu7x:2x2x1
jax: 0.10.0
libtpu: 0.0.40
codegen_flags: <defaults>
</compile_context>

<pallas_src>
import math
import functools

import jax
import jax.numpy as jnp
from jax.experimental import pallas as pl
from jax.experimental.pallas import tpu as pltpu


# ----------------------------------------------------------------------------
# Fused Pallas kernel: all transformer layers + mean-pool + classifier head
# ----------------------------------------------------------------------------

def fused_transformer_kernel(
        x_ref, bias_ref,
        wqkv_ref, bqkv_ref, wo_ref, bo_ref,
        ln1_g_ref, ln1_b_ref, w1_ref, b1_ref, w2_ref, b2_ref,
        ln2_g_ref, ln2_b_ref,
        cw1_ref, cb1_ref, cw2_ref, cb2_ref,
        out_ref,
        x_vmem, qkv_vmem, ctx_vmem,
        *, num_heads, seq_len, seq_pad, block_b):
    layer = pl.program_id(1)
    n_layers = pl.num_programs(1)

    H = num_heads
    S = seq_pad                              # padded (lane-dense) seq length
    D = x_vmem.shape[-1]
    d_k = D // H
    scale = 1.0 / math.sqrt(d_k)
    bf16, f32 = jnp.bfloat16, jnp.float32

    # Load the (block_b*S, D) activation tile into VMEM scratch at layer 0;
    # it stays resident there across all layers of this batch tile.
    @pl.when(layer == 0)
    def _():
        x_vmem[...] = x_ref[...].astype(f32)

    # This layer's weights (leading size-1 layer-block dim dropped).
    wqkv, bqkv = wqkv_ref[0], bqkv_ref[0]    # (D, 3D) bf16, (1, 3D) f32
    wo, bo = wo_ref[0], bo_ref[0]            # (D, D)  bf16, (1, D)  f32

    x2d = x_vmem[...]                        # (block_b*S, D) f32

    # ---- fused QKV projection: one big full-tile MXU matmul ----
    qkv = jnp.dot(x2d.astype(bf16), wqkv, preferred_element_type=f32) + bqkv
    qkv_vmem[...] = qkv.astype(bf16)         # (block_b*S, 3D) bf16

    # ---- attention core: only scores / softmax / attn@V inside the loop ----
    def attn_body(b, carry):
        base = pl.multiple_of(b * S, S)
        bias_b = bias_ref[b]                 # (1, S) additive key-column bias
        ctx_heads = []
        for h in range(H):                   # tiny static unroll over heads
            qh = qkv_vmem[pl.ds(base, S), h * d_k:(h + 1) * d_k]
            kh = qkv_vmem[pl.ds(base, S), D + h * d_k:D + (h + 1) * d_k]
            vh = qkv_vmem[pl.ds(base, S), 2 * D + h * d_k:2 * D + (h + 1) * d_k]
            s = jax.lax.dot_general(qh, kh, (((1,), (1,)), ((), ())),
                                    preferred_element_type=f32) * scale
            s = s + bias_b
            s = s - jnp.max(s, axis=-1, keepdims=True)
            e = jnp.exp(s)
            # approx reciprocal (EUP): rows sum to ~1, documented trade-off
            attn = e * pl.reciprocal(jnp.sum(e, axis=-1, keepdims=True),
                                     approx=True)
            ctx_heads.append(jnp.dot(attn.astype(bf16), vh,
                                     preferred_element_type=f32))
        ctx_vmem[pl.ds(base, S), :] = jnp.concatenate(
            ctx_heads, axis=1).astype(bf16)  # (S, D) head-major columns
        return carry

    jax.lax.fori_loop(0, block_b, attn_body, 0)

    # ---- output projection: single (N, D)@(D, D), full-K contraction ----
    attn_out = jnp.dot(ctx_vmem[...], wo, preferred_element_type=f32) + bo
    h1 = x2d + attn_out                      # residual (dropout == identity)

    # ---- LayerNorm 1 -> FFN -> residual -> LayerNorm 2 (whole tile) ----
    mu1 = jnp.mean(h1, axis=-1, keepdims=True)
    var1 = jnp.mean(jnp.square(h1 - mu1), axis=-1, keepdims=True)
    h1n = (h1 - mu1) * jax.lax.rsqrt(var1 + 1e-5) * ln1_g_ref[0] + ln1_b_ref[0]

    ff = jnp.dot(h1n.astype(bf16), w1_ref[0], preferred_element_type=f32) + b1_ref[0]
    ff = jnp.maximum(ff, 0.0)
    ff = jnp.dot(ff.astype(bf16), w2_ref[0], preferred_element_type=f32) + b2_ref[0]

    h2 = h1n + ff
    mu2 = jnp.mean(h2, axis=-1, keepdims=True)
    var2 = jnp.mean(jnp.square(h2 - mu2), axis=-1, keepdims=True)
    out = (h2 - mu2) * jax.lax.rsqrt(var2 + 1e-5) * ln2_g_ref[0] + ln2_b_ref[0]
    x_vmem[...] = out

    # ---- last layer: fused mean-pool (real positions only) + classifier ----
    @pl.when(layer == n_layers - 1)
    def _():
        pool_w = (jax.lax.broadcasted_iota(jnp.int32, (S, 1), 0)
                  < seq_len).astype(f32) * (1.0 / seq_len)
        pooled = jnp.sum(out.reshape(block_b, S, D) * pool_w, axis=1)
        hcls = jnp.dot(pooled.astype(bf16), cw1_ref[...],
                       preferred_element_type=f32) + cb1_ref[...]
        hcls = jnp.maximum(hcls, 0.0)
        logits = jnp.dot(hcls.astype(bf16), cw2_ref[...],
                         preferred_element_type=f32) + cb2_ref[...]
        out_ref[...] = logits[None].astype(out_ref.dtype)


# ----------------------------------------------------------------------------
# Wrapper around pallas_call
# ----------------------------------------------------------------------------

_STACKED_KEYS = ("wqkv", "bqkv", "wo", "bo",
                 "ln1_g", "ln1_b", "w1", "b1", "w2", "b2", "ln2_g", "ln2_b")


def transformer_llm_forward(tokens, kparams, num_heads, *, block_b=None):
    B, S = tokens.shape
    D = kparams["embedding"].shape[1]
    L = kparams["wqkv"].shape[0]
    C = kparams["cls_w2"].shape[1]

    # Lane-dense scores/softmax: pad the sequence axis to a multiple of 128.
    S_pad = ((S + 127) // 128) * 128

    # v7x has two TensorCores: keep >= 2 batch tiles so the "parallel" grid
    # axis actually shards (harmless on single-TC v5e/v6e). On v5e, pass a
    # larger block_b explicitly to amortize weight re-streaming if VMEM allows.
    if block_b is None:
        block_b = B // 2 if (B % 2 == 0 and B >= 2) else B
    assert B % block_b == 0
    n_bt = B // block_b

    # Embedding gather + positional encoding in plain JAX (data-dependent
    # gather; negligible cost at these sizes). Sequence padded with token 0.
    tok_p = jnp.pad(tokens, ((0, 0), (0, S_pad - S)))
    pe = jnp.pad(kparams["pe"][:S], ((0, S_pad - S), (0, 0)))
    x = kparams["embedding"][tok_p] * math.sqrt(D) + pe[None]
    x2d = x.reshape(B * S_pad, D).astype(jnp.float32)
    # Additive attention-mask bias hoisted out of the kernel:
    # 0 where valid token, -1e9 where pad (token id 0, incl. wrapper padding).
    bias = jnp.where(tok_p != 0, 0.0, -1e9).astype(jnp.float32)[:, None, :]

    def layer_spec(arr):
        nd = arr.ndim
        return pl.BlockSpec((1,) + arr.shape[1:],
                            lambda bt, l, nd=nd: (l,) + (0,) * (nd - 1))

    def full_spec(arr):
        nd = arr.ndim
        return pl.BlockSpec(arr.shape, lambda bt, l, nd=nd: (0,) * nd)

    in_specs = (
        [pl.BlockSpec((block_b * S_pad, D), lambda bt, l: (bt, 0)),
         pl.BlockSpec((block_b, 1, S_pad), lambda bt, l: (bt, 0, 0))]
        + [layer_spec(kparams[k]) for k in _STACKED_KEYS]
        + [full_spec(kparams[k]) for k in ("cls_w1", "cls_b1", "cls_w2", "cls_b2")]
    )

    kernel = functools.partial(fused_transformer_kernel, num_heads=num_heads,
                               seq_len=S, seq_pad=S_pad, block_b=block_b)

    # VMEM budget: double-buffered bf16 layer weights + f32/bf16 activation
    # scratches.  Set the scoped limit explicitly (default is only 16 MiB on
    # v5e) while staying under v7x's 64 MiB physical VMEM.
    vmem_limit = 48 * 1024 * 1024

    fn = pl.pallas_call(
        kernel,
        out_shape=jax.ShapeDtypeStruct((n_bt, block_b, C), jnp.float32),
        grid=(n_bt, L),
        in_specs=in_specs,
        out_specs=pl.BlockSpec((1, block_b, C), lambda bt, l: (bt, 0, 0)),
        scratch_shapes=[
            pltpu.VMEM((block_b * S_pad, D), jnp.float32),       # resident x
            pltpu.VMEM((block_b * S_pad, 3 * D), jnp.bfloat16),  # fused QKV
            pltpu.VMEM((block_b * S_pad, D), jnp.bfloat16),      # attn context
        ],
        compiler_params=pltpu.CompilerParams(
            dimension_semantics=("parallel", "arbitrary"),
            vmem_limit_bytes=vmem_limit),
    )
    args = ([x2d, bias] + [kparams[k] for k in _STACKED_KEYS]
            + [kparams[k] for k in ("cls_w1", "cls_b1", "cls_w2", "cls_b2")])
    return fn(*args).reshape(B, C)


# ----------------------------------------------------------------------------
# Parameter construction
# ----------------------------------------------------------------------------

def positional_encoding(max_len, d_model):
    position = jnp.arange(max_len, dtype=jnp.float32)[:, None]
    div_term = jnp.exp(jnp.arange(0, d_model, 2, dtype=jnp.float32)
                       * (-math.log(10000.0) / d_model))
    pe = jnp.zeros((max_len, d_model), dtype=jnp.float32)
    pe = pe.at[:, 0::2].set(jnp.sin(position * div_term))
    pe = pe.at[:, 1::2].set(jnp.cos(position * div_term))
    return pe


def init_params(key, vocab_size, d_model, num_heads, num_layers, d_ff,
                num_classes, max_len):
    """Canonical f32 params (Linear weights stored [in, out] so y = x@W + b)."""
    def linear(key, fan_in, fan_out):
        kw, kb = jax.random.split(key)
        bound = 1.0 / math.sqrt(fan_in)
        w = jax.random.uniform(kw, (fan_in, fan_out), jnp.float32, -bound, bound)
        b = jax.random.uniform(kb, (1, fan_out), jnp.float32, -bound, bound)
        return w, b

    keys = jax.random.split(key, num_layers + 4)
    params = {
        "embedding": jax.random.normal(keys[0], (vocab_size, d_model), jnp.float32),
        "pe": positional_encoding(max_len, d_model),
        "blocks": [],
    }
    for layer in range(num_layers):
        lk = jax.random.split(keys[1 + layer], 6)
        wq, bq = linear(lk[0], d_model, d_model)
        wk, bk = linear(lk[1], d_model, d_model)
        wv, bv = linear(lk[2], d_model, d_model)
        wo, bo = linear(lk[3], d_model, d_model)
        w1, b1 = linear(lk[4], d_model, d_ff)
        w2, b2 = linear(lk[5], d_ff, d_model)
        params["blocks"].append({
            "wq": wq, "bq": bq, "wk": wk, "bk": bk, "wv": wv, "bv": bv,
            "wo": wo, "bo": bo,
            "ln1_g": jnp.ones((1, d_model), jnp.float32),
            "ln1_b": jnp.zeros((1, d_model), jnp.float32),
            "w1": w1, "b1": b1, "w2": w2, "b2": b2,
            "ln2_g": jnp.ones((1, d_model), jnp.float32),
            "ln2_b": jnp.zeros((1, d_model), jnp.float32),
        })
    params["cls_w1"], params["cls_b1"] = linear(keys[-2], d_model, d_model // 2)
    params["cls_w2"], params["cls_b2"] = linear(keys[-1], d_model // 2, num_classes)
    return params


def prepare_kernel_params(ref_params, num_heads):
    """Stack per-layer weights on a leading layer axis, pack Q/K/V into one
    (D, 3D) weight / (1, 3D) bias, and store matmul weights in bf16 (biases /
    LayerNorm params stay f32)."""
    blocks = ref_params["blocks"]
    bf16, f32 = jnp.bfloat16, jnp.float32

    def stack(fn, dtype):
        return jnp.stack([fn(p) for p in blocks]).astype(dtype)

    return {
        "embedding": ref_params["embedding"],
        "pe": ref_params["pe"],
        "wqkv": stack(lambda p: jnp.concatenate([p["wq"], p["wk"], p["wv"]], axis=1), bf16),
        "bqkv": stack(lambda p: jnp.concatenate([p["bq"], p["bk"], p["bv"]], axis=1), f32),
        "wo": stack(lambda p: p["wo"], bf16),
        "bo": stack(lambda p: p["bo"], f32),
        "ln1_g": stack(lambda p: p["ln1_g"], f32),
        "ln1_b": stack(lambda p: p["ln1_b"], f32),
        "w1": stack(lambda p: p["w1"], bf16),
        "b1": stack(lambda p: p["b1"], f32),
        "w2": stack(lambda p: p["w2"], bf16),
        "b2": stack(lambda p: p["b2"], f32),
        "ln2_g": stack(lambda p: p["ln2_g"], f32),
        "ln2_b": stack(lambda p: p["ln2_b"], f32),
        "cls_w1": ref_params["cls_w1"].astype(bf16),
        "cls_b1": ref_params["cls_b1"],
        "cls_w2": ref_params["cls_w2"].astype(bf16),
        "cls_b2": ref_params["cls_b2"],
    }


# ----------------------------------------------------------------------------
# Pure-JAX reference (same math + same bf16 matmul-operand casts, no Pallas)
# ----------------------------------------------------------------------------

def _mm(a, w):
    return jnp.dot(a.astype(jnp.bfloat16), w.astype(jnp.bfloat16),
                   preferred_element_type=jnp.float32)


def _reference_forward(tokens, params, num_heads):
    B, S = tokens.shape
    D = params["embedding"].shape[1]
    d_k = D // num_heads
    bf16 = jnp.bfloat16
    mask = (tokens != 0)[:, None, None, :]                      # (B,1,1,S)
    x = params["embedding"][tokens] * math.sqrt(D) + params["pe"][:S][None]
    for p in params["blocks"]:
        q = (_mm(x, p["wq"]) + p["bq"]).reshape(B, S, num_heads, d_k).transpose(0, 2, 1, 3)
        k = (_mm(x, p["wk"]) + p["bk"]).reshape(B, S, num_heads, d_k).transpose(0, 2, 1, 3)
        v = (_mm(x, p["wv"]) + p["bv"]).reshape(B, S, num_heads, d_k).transpose(0, 2, 1, 3)
        sc = jnp.einsum("bhqd,bhkd->bhqk", q.astype(bf16), k.astype(bf16),
                        preferred_element_type=jnp.float32) / math.sqrt(d_k)
        sc = jnp.where(mask, sc, -1e9)
        attn = jax.nn.softmax(sc, axis=-1)
        o = jnp.einsum("bhqk,bhkd->bhqd", attn.astype(bf16), v.astype(bf16),
                       preferred_element_type=jnp.float32)
        o = o.transpose(0, 2, 1, 3).reshape(B, S, D)
        o = _mm(o, p["wo"]) + p["bo"]
        h1 = x + o
        mu = h1.mean(-1, keepdims=True)
        var = ((h1 - mu) ** 2).mean(-1, keepdims=True)
        h1 = (h1 - mu) / jnp.sqrt(var + 1e-5) * p["ln1_g"] + p["ln1_b"]
        ff = _mm(jnp.maximum(_mm(h1, p["w1"]) + p["b1"], 0.0), p["w2"]) + p["b2"]
        h2 = h1 + ff
        mu = h2.mean(-1, keepdims=True)
        var = ((h2 - mu) ** 2).mean(-1, keepdims=True)
        x = (h2 - mu) / jnp.sqrt(var + 1e-5) * p["ln2_g"] + p["ln2_b"]
    pooled = x.mean(axis=1)
    h = jnp.maximum(_mm(pooled, params["cls_w1"]) + params["cls_b1"], 0.0)
    return _mm(h, params["cls_w2"]) + params["cls_b2"]


# ----------------------------------------------------------------------------

if __name__ == "__main__":
    vocab_size = 50
    d_model = 32
    num_heads = 4
    num_layers = 2
    d_ff = 64
    num_classes = 2
    max_len = 64
    batch, seq = 2, 8

    key = jax.random.PRNGKey(0)
    kp, kt = jax.random.split(key)
    ref_params = init_params(kp, vocab_size, d_model, num_heads, num_layers,
                             d_ff, num_classes, max_len)
    kparams = prepare_kernel_params(ref_params, num_heads)

    tokens = jax.random.randint(kt, (batch, seq), 1, vocab_size, dtype=jnp.int32)
    tokens = tokens.at[1, 6:].set(0)   # pad tail of second sequence

    logits = transformer_llm_forward(tokens, kparams, num_heads)
    logits = jax.block_until_ready(logits)

    ref = _reference_forward(tokens, ref_params, num_heads)
    assert logits.shape == (batch, num_classes)
    assert jnp.allclose(logits, ref, atol=3e-2, rtol=3e-2), (logits, ref)

    print("KERNEL_OK")
</pallas_src>

<mosaic_0001>
module attributes {stable_mosaic.version = 11 : i64} {
  func.func @fused_transformer_kernel(%arg0: i32, %arg1: i32, %arg2: memref<128x32xf32, #tpu.memory_space<vmem>>, %arg3: memref<1x1x128xf32, #tpu.memory_space<vmem>>, %arg4: memref<1x32x96xbf16, #tpu.memory_space<vmem>>, %arg5: memref<1x1x96xf32, #tpu.memory_space<vmem>>, %arg6: memref<1x32x32xbf16, #tpu.memory_space<vmem>>, %arg7: memref<1x1x32xf32, #tpu.memory_space<vmem>>, %arg8: memref<1x1x32xf32, #tpu.memory_space<vmem>>, %arg9: memref<1x1x32xf32, #tpu.memory_space<vmem>>, %arg10: memref<1x32x64xbf16, #tpu.memory_space<vmem>>, %arg11: memref<1x1x64xf32, #tpu.memory_space<vmem>>, %arg12: memref<1x64x32xbf16, #tpu.memory_space<vmem>>, %arg13: memref<1x1x32xf32, #tpu.memory_space<vmem>>, %arg14: memref<1x1x32xf32, #tpu.memory_space<vmem>>, %arg15: memref<1x1x32xf32, #tpu.memory_space<vmem>>, %arg16: memref<32x16xbf16, #tpu.memory_space<vmem>>, %arg17: memref<1x16xf32, #tpu.memory_space<vmem>>, %arg18: memref<16x2xbf16, #tpu.memory_space<vmem>>, %arg19: memref<1x2xf32, #tpu.memory_space<vmem>>, %arg20: memref<1x1x2xf32, #tpu.memory_space<vmem>>, %arg21: memref<128x32xf32, #tpu.memory_space<vmem>>, %arg22: memref<128x96xbf16, #tpu.memory_space<vmem>>, %arg23: memref<128x32xbf16, #tpu.memory_space<vmem>>) attributes {dimension_semantics = [#tpu.dimension_semantics<parallel>, #tpu.dimension_semantics<arbitrary>], iteration_bounds = array<i64: 2, 2>, scalar_prefetch = 0 : i64, scratch_operands = 3 : i64, tpu.core_type = #tpu.core_type<tc>, window_params = [{transform_indices = @transform_0, window_bounds = array<i64: 128, 32>}, {transform_indices = @transform_1, window_bounds = array<i64: 1, 1, 128>}, {transform_indices = @transform_2, window_bounds = array<i64: 1, 32, 96>}, {transform_indices = @transform_3, window_bounds = array<i64: 1, 1, 96>}, {transform_indices = @transform_4, window_bounds = array<i64: 1, 32, 32>}, {transform_indices = @transform_5, window_bounds = array<i64: 1, 1, 32>}, {transform_indices = @transform_6, window_bounds = array<i64: 1, 1, 32>}, {transform_indices = @transform_7, window_bounds = array<i64: 1, 1, 32>}, {transform_indices = @transform_8, window_bounds = array<i64: 1, 32, 64>}, {transform_indices = @transform_9, window_bounds = array<i64: 1, 1, 64>}, {transform_indices = @transform_10, window_bounds = array<i64: 1, 64, 32>}, {transform_indices = @transform_11, window_bounds = array<i64: 1, 1, 32>}, {transform_indices = @transform_12, window_bounds = array<i64: 1, 1, 32>}, {transform_indices = @transform_13, window_bounds = array<i64: 1, 1, 32>}, {pipeline_mode = #tpu.pipeline_mode<synchronous>, transform_indices = @transform_14, window_bounds = array<i64: 32, 16>}, {pipeline_mode = #tpu.pipeline_mode<synchronous>, transform_indices = @transform_15, window_bounds = array<i64: 1, 16>}, {pipeline_mode = #tpu.pipeline_mode<synchronous>, transform_indices = @transform_16, window_bounds = array<i64: 16, 2>}, {pipeline_mode = #tpu.pipeline_mode<synchronous>, transform_indices = @transform_17, window_bounds = array<i64: 1, 2>}, {transform_indices = @transform_18, window_bounds = array<i64: 1, 1, 2>}]} {
    %c0_i32 = arith.constant 0 : i32
    %0 = arith.cmpi eq, %arg1, %c0_i32 : i32
    %1 = arith.extui %0 : i1 to i32
    %c0_i32_0 = arith.constant 0 : i32
    %2 = arith.cmpi ne, %1, %c0_i32_0 : i32
    scf.if %2 {
      %c0_85 = arith.constant 0 : index
      %c0_86 = arith.constant 0 : index
      %199 = vector.load %arg2[%c0_85, %c0_86] : memref<128x32xf32, #tpu.memory_space<vmem>>, vector<128x32xf32>
      %c0_87 = arith.constant 0 : index
      %c0_88 = arith.constant 0 : index
      %200 = vector.load %arg21[%c0_87, %c0_88] : memref<128x32xf32, #tpu.memory_space<vmem>>, vector<128x32xf32>
      tpu.vector_store %arg21[%c0_87, %c0_88], %199 {strides = array<i32>} : memref<128x32xf32, #tpu.memory_space<vmem>>, vector<128x32xf32>,
    } else {
    }
    %c0 = arith.constant 0 : index
    %c0_1 = arith.constant 0 : index
    %c0_2 = arith.constant 0 : index
    %3 = vector.load %arg4[%c0, %c0_1, %c0_2] : memref<1x32x96xbf16, #tpu.memory_space<vmem>>, vector<1x32x96xbf16>
    %4 = vector.shape_cast %3 : vector<1x32x96xbf16> to vector<32x96xbf16>
    %c0_3 = arith.constant 0 : index
    %c0_4 = arith.constant 0 : index
    %c0_5 = arith.constant 0 : index
    %5 = vector.load %arg5[%c0_3, %c0_4, %c0_5] : memref<1x1x96xf32, #tpu.memory_space<vmem>>, vector<1x1x96xf32>
    %6 = vector.shape_cast %5 : vector<1x1x96xf32> to vector<1x96xf32>
    %c0_6 = arith.constant 0 : index
    %c0_7 = arith.constant 0 : index
    %c0_8 = arith.constant 0 : index
    %7 = vector.load %arg6[%c0_6, %c0_7, %c0_8] : memref<1x32x32xbf16, #tpu.memory_space<vmem>>, vector<1x32x32xbf16>
    %8 = vector.shape_cast %7 : vector<1x32x32xbf16> to vector<32x32xbf16>
    %c0_9 = arith.constant 0 : index
    %c0_10 = arith.constant 0 : index
    %c0_11 = arith.constant 0 : index
    %9 = vector.load %arg7[%c0_9, %c0_10, %c0_11] : memref<1x1x32xf32, #tpu.memory_space<vmem>>, vector<1x1x32xf32>
    %10 = vector.shape_cast %9 : vector<1x1x32xf32> to vector<1x32xf32>
    %c0_12 = arith.constant 0 : index
    %c0_13 = arith.constant 0 : index
    %11 = vector.load %arg21[%c0_12, %c0_13] : memref<128x32xf32, #tpu.memory_space<vmem>>, vector<128x32xf32>
    %12 = arith.truncf %11 : vector<128x32xf32> to vector<128x32xbf16>
    %cst = arith.constant dense<0.000000e+00> : vector<128x96xf32>
    %13 = tpu.matmul %12, %4, %cst {dimension_numbers = #tpu.dot_dimension_numbers<[1], [0], [0], [1], [0, 0, 1, 1], [], []>} : vector<128x32xbf16>, vector<32x96xbf16>, vector<128x96xf32> -> vector<128x96xf32>
    %14 = vector.broadcast %6 : vector<1x96xf32> to vector<128x96xf32>
    %15 = arith.addf %13, %14 : vector<128x96xf32>
    %16 = arith.truncf %15 : vector<128x96xf32> to vector<128x96xbf16>
    %c0_14 = arith.constant 0 : index
    %c0_15 = arith.constant 0 : index
    %17 = vector.load %arg22[%c0_14, %c0_15] : memref<128x96xbf16, #tpu.memory_space<vmem>>, vector<128x96xbf16>
    tpu.vector_store %arg22[%c0_14, %c0_15], %16 {strides = array<i32>} : memref<128x96xbf16, #tpu.memory_space<vmem>>, vector<128x96xbf16>,
    %c0_i32_16 = arith.constant 0 : i32
    %c128_i32 = arith.constant 128 : i32
    %18 = arith.muli %c0_i32_16, %c128_i32 : i32
    %19 = tpu.assume_multiple %18, 128 : i32
    %20 = arith.index_cast %c0_i32_16 : i32 to index
    %c0_17 = arith.constant 0 : index
    %c0_18 = arith.constant 0 : index
    %21 = vector.load %arg3[%20, %c0_17, %c0_18] : memref<1x1x128xf32, #tpu.memory_space<vmem>>, vector<1x1x128xf32>
    %22 = vector.shape_cast %21 : vector<1x1x128xf32> to vector<1x128xf32>
    %23 = arith.index_cast %19 : i32 to index
    %c0_19 = arith.constant 0 : index
    %24 = vector.load %arg22[%23, %c0_19] : memref<128x96xbf16, #tpu.memory_space<vmem>>, vector<128x8xbf16>
    %25 = arith.index_cast %19 : i32 to index
    %c32 = arith.constant 32 : index
    %26 = vector.load %arg22[%25, %c32] : memref<128x96xbf16, #tpu.memory_space<vmem>>, vector<128x8xbf16>
    %27 = arith.index_cast %19 : i32 to index
    %c64 = arith.constant 64 : index
    %28 = vector.load %arg22[%27, %c64] : memref<128x96xbf16, #tpu.memory_space<vmem>>, vector<128x8xbf16>
    %cst_20 = arith.constant dense<0.000000e+00> : vector<128x128xf32>
    %29 = tpu.matmul %24, %26, %cst_20 {dimension_numbers = #tpu.dot_dimension_numbers<[1], [1], [0], [0], [0, 0, 1, 0], [], []>} : vector<128x8xbf16>, vector<128x8xbf16>, vector<128x128xf32> -> vector<128x128xf32>
    %cst_21 = arith.constant 0.353553385 : f32
    %30 = vector.broadcast %cst_21 : f32 to vector<128x128xf32>
    %31 = arith.mulf %29, %30 : vector<128x128xf32>
    %32 = vector.broadcast %22 : vector<1x128xf32> to vector<128x128xf32>
    %33 = arith.addf %31, %32 : vector<128x128xf32>
    %cst_22 = arith.constant dense<0xFF800000> : vector<128xf32>
    %34 = vector.multi_reduction <maximumf>, %33, %cst_22 [1] : vector<128x128xf32> to vector<128xf32>
    %35 = vector.shape_cast %34 : vector<128xf32> to vector<128x1xf32>
    %36 = vector.broadcast %35 : vector<128x1xf32> to vector<128x128xf32>
    %37 = arith.subf %33, %36 : vector<128x128xf32>
    %38 = math.exp %37 : vector<128x128xf32>
    %cst_23 = arith.constant dense<0.000000e+00> : vector<128xf32>
    %39 = vector.multi_reduction <add>, %38, %cst_23 [1] : vector<128x128xf32> to vector<128xf32>
    %40 = vector.shape_cast %39 : vector<128xf32> to vector<128x1xf32>
    %41 = tpu.reciprocal %40 {approx = true} : vector<128x1xf32> -> vector<128x1xf32>
    %42 = vector.broadcast %41 : vector<128x1xf32> to vector<128x128xf32>
    %43 = arith.mulf %38, %42 : vector<128x128xf32>
    %44 = arith.truncf %43 : vector<128x128xf32> to vector<128x128xbf16>
    %cst_24 = arith.constant dense<0.000000e+00> : vector<128x8xf32>
    %45 = tpu.matmul %44, %28, %cst_24 {dimension_numbers = #tpu.dot_dimension_numbers<[1], [0], [0], [1], [0, 0, 1, 1], [], []>} : vector<128x128xbf16>, vector<128x8xbf16>, vector<128x8xf32> -> vector<128x8xf32>
    %46 = arith.index_cast %19 : i32 to index
    %c8 = arith.constant 8 : index
    %47 = vector.load %arg22[%46, %c8] : memref<128x96xbf16, #tpu.memory_space<vmem>>, vector<128x8xbf16>
    %48 = arith.index_cast %19 : i32 to index
    %c40 = arith.constant 40 : index
    %49 = vector.load %arg22[%48, %c40] : memref<128x96xbf16, #tpu.memory_space<vmem>>, vector<128x8xbf16>
    %50 = arith.index_cast %19 : i32 to index
    %c72 = arith.constant 72 : index
    %51 = vector.load %arg22[%50, %c72] : memref<128x96xbf16, #tpu.memory_space<vmem>>, vector<128x8xbf16>
    %cst_25 = arith.constant dense<0.000000e+00> : vector<128x128xf32>
    %52 = tpu.matmul %47, %49, %cst_25 {dimension_numbers = #tpu.dot_dimension_numbers<[1], [1], [0], [0], [0, 0, 1, 0], [], []>} : vector<128x8xbf16>, vector<128x8xbf16>, vector<128x128xf32> -> vector<128x128xf32>
    %cst_26 = arith.constant 0.353553385 : f32
    %53 = vector.broadcast %cst_26 : f32 to vector<128x128xf32>
    %54 = arith.mulf %52, %53 : vector<128x128xf32>
    %55 = vector.broadcast %22 : vector<1x128xf32> to vector<128x128xf32>
    %56 = arith.addf %54, %55 : vector<128x128xf32>
    %cst_27 = arith.constant dense<0xFF800000> : vector<128xf32>
    %57 = vector.multi_reduction <maximumf>, %56, %cst_27 [1] : vector<128x128xf32> to vector<128xf32>
    %58 = vector.shape_cast %57 : vector<128xf32> to vector<128x1xf32>
    %59 = vector.broadcast %58 : vector<128x1xf32> to vector<128x128xf32>
    %60 = arith.subf %56, %59 : vector<128x128xf32>
    %61 = math.exp %60 : vector<128x128xf32>
    %cst_28 = arith.constant dense<0.000000e+00> : vector<128xf32>
    %62 = vector.multi_reduction <add>, %61, %cst_28 [1] : vector<128x128xf32> to vector<128xf32>
    %63 = vector.shape_cast %62 : vector<128xf32> to vector<128x1xf32>
    %64 = tpu.reciprocal %63 {approx = true} : vector<128x1xf32> -> vector<128x1xf32>
    %65 = vector.broadcast %64 : vector<128x1xf32> to vector<128x128xf32>
    %66 = arith.mulf %61, %65 : vector<128x128xf32>
    %67 = arith.truncf %66 : vector<128x128xf32> to vector<128x128xbf16>
    %cst_29 = arith.constant dense<0.000000e+00> : vector<128x8xf32>
    %68 = tpu.matmul %67, %51, %cst_29 {dimension_numbers = #tpu.dot_dimension_numbers<[1], [0], [0], [1], [0, 0, 1, 1], [], []>} : vector<128x128xbf16>, vector<128x8xbf16>, vector<128x8xf32> -> vector<128x8xf32>
    %69 = arith.index_cast %19 : i32 to index
    %c16 = arith.constant 16 : index
    %70 = vector.load %arg22[%69, %c16] : memref<128x96xbf16, #tpu.memory_space<vmem>>, vector<128x8xbf16>
    %71 = arith.index_cast %19 : i32 to index
    %c48 = arith.constant 48 : index
    %72 = vector.load %arg22[%71, %c48] : memref<128x96xbf16, #tpu.memory_space<vmem>>, vector<128x8xbf16>
    %73 = arith.index_cast %19 : i32 to index
    %c80 = arith.constant 80 : index
    %74 = vector.load %arg22[%73, %c80] : memref<128x96xbf16, #tpu.memory_space<vmem>>, vector<128x8xbf16>
    %cst_30 = arith.constant dense<0.000000e+00> : vector<128x128xf32>
    %75 = tpu.matmul %70, %72, %cst_30 {dimension_numbers = #tpu.dot_dimension_numbers<[1], [1], [0], [0], [0, 0, 1, 0], [], []>} : vector<128x8xbf16>, vector<128x8xbf16>, vector<128x128xf32> -> vector<128x128xf32>
    %cst_31 = arith.constant 0.353553385 : f32
    %76 = vector.broadcast %cst_31 : f32 to vector<128x128xf32>
    %77 = arith.mulf %75, %76 : vector<128x128xf32>
    %78 = vector.broadcast %22 : vector<1x128xf32> to vector<128x128xf32>
    %79 = arith.addf %77, %78 : vector<128x128xf32>
    %cst_32 = arith.constant dense<0xFF800000> : vector<128xf32>
    %80 = vector.multi_reduction <maximumf>, %79, %cst_32 [1] : vector<128x128xf32> to vector<128xf32>
    %81 = vector.shape_cast %80 : vector<128xf32> to vector<128x1xf32>
    %82 = vector.broadcast %81 : vector<128x1xf32> to vector<128x128xf32>
    %83 = arith.subf %79, %82 : vector<128x128xf32>
    %84 = math.exp %83 : vector<128x128xf32>
    %cst_33 = arith.constant dense<0.000000e+00> : vector<128xf32>
    %85 = vector.multi_reduction <add>, %84, %cst_33 [1] : vector<128x128xf32> to vector<128xf32>
    %86 = vector.shape_cast %85 : vector<128xf32> to vector<128x1xf32>
    %87 = tpu.reciprocal %86 {approx = true} : vector<128x1xf32> -> vector<128x1xf32>
    %88 = vector.broadcast %87 : vector<128x1xf32> to vector<128x128xf32>
    %89 = arith.mulf %84, %88 : vector<128x128xf32>
    %90 = arith.truncf %89 : vector<128x128xf32> to vector<128x128xbf16>
    %cst_34 = arith.constant dense<0.000000e+00> : vector<128x8xf32>
    %91 = tpu.matmul %90, %74, %cst_34 {dimension_numbers = #tpu.dot_dimension_numbers<[1], [0], [0], [1], [0, 0, 1, 1], [], []>} : vector<128x128xbf16>, vector<128x8xbf16>, vector<128x8xf32> -> vector<128x8xf32>
    %92 = arith.index_cast %19 : i32 to index
    %c24 = arith.constant 24 : index
    %93 = vector.load %arg22[%92, %c24] : memref<128x96xbf16, #tpu.memory_space<vmem>>, vector<128x8xbf16>
    %94 = arith.index_cast %19 : i32 to index
    %c56 = arith.constant 56 : index
    %95 = vector.load %arg22[%94, %c56] : memref<128x96xbf16, #tpu.memory_space<vmem>>, vector<128x8xbf16>
    %96 = arith.index_cast %19 : i32 to index
    %c88 = arith.constant 88 : index
    %97 = vector.load %arg22[%96, %c88] : memref<128x96xbf16, #tpu.memory_space<vmem>>, vector<128x8xbf16>
    %cst_35 = arith.constant dense<0.000000e+00> : vector<128x128xf32>
    %98 = tpu.matmul %93, %95, %cst_35 {dimension_numbers = #tpu.dot_dimension_numbers<[1], [1], [0], [0], [0, 0, 1, 0], [], []>} : vector<128x8xbf16>, vector<128x8xbf16>, vector<128x128xf32> -> vector<128x128xf32>
    %cst_36 = arith.constant 0.353553385 : f32
    %99 = vector.broadcast %cst_36 : f32 to vector<128x128xf32>
    %100 = arith.mulf %98, %99 : vector<128x128xf32>
    %101 = vector.broadcast %22 : vector<1x128xf32> to vector<128x128xf32>
    %102 = arith.addf %100, %101 : vector<128x128xf32>
    %cst_37 = arith.constant dense<0xFF800000> : vector<128xf32>
    %103 = vector.multi_reduction <maximumf>, %102, %cst_37 [1] : vector<128x128xf32> to vector<128xf32>
    %104 = vector.shape_cast %103 : vector<128xf32> to vector<128x1xf32>
    %105 = vector.broadcast %104 : vector<128x1xf32> to vector<128x128xf32>
    %106 = arith.subf %102, %105 : vector<128x128xf32>
    %107 = math.exp %106 : vector<128x128xf32>
    %cst_38 = arith.constant dense<0.000000e+00> : vector<128xf32>
    %108 = vector.multi_reduction <add>, %107, %cst_38 [1] : vector<128x128xf32> to vector<128xf32>
    %109 = vector.shape_cast %108 : vector<128xf32> to vector<128x1xf32>
    %110 = tpu.reciprocal %109 {approx = true} : vector<128x1xf32> -> vector<128x1xf32>
    %111 = vector.broadcast %110 : vector<128x1xf32> to vector<128x128xf32>
    %112 = arith.mulf %107, %111 : vector<128x128xf32>
    %113 = arith.truncf %112 : vector<128x128xf32> to vector<128x128xbf16>
    %cst_39 = arith.constant dense<0.000000e+00> : vector<128x8xf32>
    %114 = tpu.matmul %113, %97, %cst_39 {dimension_numbers = #tpu.dot_dimension_numbers<[1], [0], [0], [1], [0, 0, 1, 1], [], []>} : vector<128x128xbf16>, vector<128x8xbf16>, vector<128x8xf32> -> vector<128x8xf32>
    %115 = tpu.concatenate %45, %68, %91, %114 in 1 : vector<128x8xf32>, vector<128x8xf32>, vector<128x8xf32>, vector<128x8xf32> -> vector<128x32xf32>
    %116 = arith.truncf %115 : vector<128x32xf32> to vector<128x32xbf16>
    %117 = arith.index_cast %19 : i32 to index
    %c0_40 = arith.constant 0 : index
    %118 = vector.load %arg23[%117, %c0_40] : memref<128x32xbf16, #tpu.memory_space<vmem>>, vector<128x32xbf16>
    tpu.vector_store %arg23[%117, %c0_40], %116 {strides = array<i32>} : memref<128x32xbf16, #tpu.memory_space<vmem>>, vector<128x32xbf16>,
    %c1_i32 = arith.constant 1 : i32
    %c0_41 = arith.constant 0 : index
    %c0_42 = arith.constant 0 : index
    %119 = vector.load %arg23[%c0_41, %c0_42] : memref<128x32xbf16, #tpu.memory_space<vmem>>, vector<128x32xbf16>
    %cst_43 = arith.constant dense<0.000000e+00> : vector<128x32xf32>
    %120 = tpu.matmul %119, %8, %cst_43 {dimension_numbers = #tpu.dot_dimension_numbers<[1], [0], [0], [1], [0, 0, 1, 1], [], []>} : vector<128x32xbf16>, vector<32x32xbf16>, vector<128x32xf32> -> vector<128x32xf32>
    %121 = vector.broadcast %10 : vector<1x32xf32> to vector<128x32xf32>
    %122 = arith.addf %120, %121 : vector<128x32xf32>
    %123 = arith.addf %11, %122 : vector<128x32xf32>
    %cst_44 = arith.constant dense<0.000000e+00> : vector<128xf32>
    %124 = vector.multi_reduction <add>, %123, %cst_44 [1] : vector<128x32xf32> to vector<128xf32>
    %125 = vector.shape_cast %124 : vector<128xf32> to vector<128x1xf32>
    %cst_45 = arith.constant 3.200000e+01 : f32
    %126 = vector.broadcast %cst_45 : f32 to vector<128x1xf32>
    %127 = arith.divf %125, %126 : vector<128x1xf32>
    %128 = vector.broadcast %127 : vector<128x1xf32> to vector<128x32xf32>
    %129 = arith.subf %123, %128 : vector<128x32xf32>
    %130 = arith.mulf %129, %129 : vector<128x32xf32>
    %cst_46 = arith.constant dense<0.000000e+00> : vector<128xf32>
    %131 = vector.multi_reduction <add>, %130, %cst_46 [1] : vector<128x32xf32> to vector<128xf32>
    %132 = vector.shape_cast %131 : vector<128xf32> to vector<128x1xf32>
    %cst_47 = arith.constant 3.200000e+01 : f32
    %133 = vector.broadcast %cst_47 : f32 to vector<128x1xf32>
    %134 = arith.divf %132, %133 : vector<128x1xf32>
    %135 = vector.broadcast %127 : vector<128x1xf32> to vector<128x32xf32>
    %136 = arith.subf %123, %135 : vector<128x32xf32>
    %cst_48 = arith.constant 9.99999974E-6 : f32
    %137 = vector.broadcast %cst_48 : f32 to vector<128x1xf32>
    %138 = arith.addf %134, %137 : vector<128x1xf32>
    %139 = math.rsqrt %138 : vector<128x1xf32>
    %140 = vector.broadcast %139 : vector<128x1xf32> to vector<128x32xf32>
    %141 = arith.mulf %136, %140 : vector<128x32xf32>
    %c0_49 = arith.constant 0 : index
    %c0_50 = arith.constant 0 : index
    %c0_51 = arith.constant 0 : index
    %142 = vector.load %arg8[%c0_49, %c0_50, %c0_51] : memref<1x1x32xf32, #tpu.memory_space<vmem>>, vector<1x1x32xf32>
    %143 = vector.shape_cast %142 : vector<1x1x32xf32> to vector<1x32xf32>
    %144 = vector.broadcast %143 : vector<1x32xf32> to vector<128x32xf32>
    %145 = arith.mulf %141, %144 : vector<128x32xf32>
    %c0_52 = arith.constant 0 : index
    %c0_53 = arith.constant 0 : index
    %c0_54 = arith.constant 0 : index
    %146 = vector.load %arg9[%c0_52, %c0_53, %c0_54] : memref<1x1x32xf32, #tpu.memory_space<vmem>>, vector<1x1x32xf32>
    %147 = vector.shape_cast %146 : vector<1x1x32xf32> to vector<1x32xf32>
    %148 = vector.broadcast %147 : vector<1x32xf32> to vector<128x32xf32>
    %149 = arith.addf %145, %148 : vector<128x32xf32>
    %150 = arith.truncf %149 : vector<128x32xf32> to vector<128x32xbf16>
    %c0_55 = arith.constant 0 : index
    %c0_56 = arith.constant 0 : index
    %c0_57 = arith.constant 0 : index
    %151 = vector.load %arg10[%c0_55, %c0_56, %c0_57] : memref<1x32x64xbf16, #tpu.memory_space<vmem>>, vector<1x32x64xbf16>
    %152 = vector.shape_cast %151 : vector<1x32x64xbf16> to vector<32x64xbf16>
    %cst_58 = arith.constant dense<0.000000e+00> : vector<128x64xf32>
    %153 = tpu.matmul %150, %152, %cst_58 {dimension_numbers = #tpu.dot_dimension_numbers<[1], [0], [0], [1], [0, 0, 1, 1], [], []>} : vector<128x32xbf16>, vector<32x64xbf16>, vector<128x64xf32> -> vector<128x64xf32>
    %c0_59 = arith.constant 0 : index
    %c0_60 = arith.constant 0 : index
    %c0_61 = arith.constant 0 : index
    %154 = vector.load %arg11[%c0_59, %c0_60, %c0_61] : memref<1x1x64xf32, #tpu.memory_space<vmem>>, vector<1x1x64xf32>
    %155 = vector.shape_cast %154 : vector<1x1x64xf32> to vector<1x64xf32>
    %156 = vector.broadcast %155 : vector<1x64xf32> to vector<128x64xf32>
    %157 = arith.addf %153, %156 : vector<128x64xf32>
    %cst_62 = arith.constant 0.000000e+00 : f32
    %158 = vector.broadcast %cst_62 : f32 to vector<128x64xf32>
    %159 = arith.maximumf %157, %158 : vector<128x64xf32>
    %160 = arith.truncf %159 : vector<128x64xf32> to vector<128x64xbf16>
    %c0_63 = arith.constant 0 : index
    %c0_64 = arith.constant 0 : index
    %c0_65 = arith.constant 0 : index
    %161 = vector.load %arg12[%c0_63, %c0_64, %c0_65] : memref<1x64x32xbf16, #tpu.memory_space<vmem>>, vector<1x64x32xbf16>
    %162 = vector.shape_cast %161 : vector<1x64x32xbf16> to vector<64x32xbf16>
    %cst_66 = arith.constant dense<0.000000e+00> : vector<128x32xf32>
    %163 = tpu.matmul %160, %162, %cst_66 {dimension_numbers = #tpu.dot_dimension_numbers<[1], [0], [0], [1], [0, 0, 1, 1], [], []>} : vector<128x64xbf16>, vector<64x32xbf16>, vector<128x32xf32> -> vector<128x32xf32>
    %c0_67 = arith.constant 0 : index
    %c0_68 = arith.constant 0 : index
    %c0_69 = arith.constant 0 : index
    %164 = vector.load %arg13[%c0_67, %c0_68, %c0_69] : memref<1x1x32xf32, #tpu.memory_space<vmem>>, vector<1x1x32xf32>
    %165 = vector.shape_cast %164 : vector<1x1x32xf32> to vector<1x32xf32>
    %166 = vector.broadcast %165 : vector<1x32xf32> to vector<128x32xf32>
    %167 = arith.addf %163, %166 : vector<128x32xf32>
    %168 = arith.addf %149, %167 : vector<128x32xf32>
    %cst_70 = arith.constant dense<0.000000e+00> : vector<128xf32>
    %169 = vector.multi_reduction <add>, %168, %cst_70 [1] : vector<128x32xf32> to vector<128xf32>
    %170 = vector.shape_cast %169 : vector<128xf32> to vector<128x1xf32>
    %cst_71 = arith.constant 3.200000e+01 : f32
    %171 = vector.broadcast %cst_71 : f32 to vector<128x1xf32>
    %172 = arith.divf %170, %171 : vector<128x1xf32>
    %173 = vector.broadcast %172 : vector<128x1xf32> to vector<128x32xf32>
    %174 = arith.subf %168, %173 : vector<128x32xf32>
    %175 = arith.mulf %174, %174 : vector<128x32xf32>
    %cst_72 = arith.constant dense<0.000000e+00> : vector<128xf32>
    %176 = vector.multi_reduction <add>, %175, %cst_72 [1] : vector<128x32xf32> to vector<128xf32>
    %177 = vector.shape_cast %176 : vector<128xf32> to vector<128x1xf32>
    %cst_73 = arith.constant 3.200000e+01 : f32
    %178 = vector.broadcast %cst_73 : f32 to vector<128x1xf32>
    %179 = arith.divf %177, %178 : vector<128x1xf32>
    %180 = vector.broadcast %172 : vector<128x1xf32> to vector<128x32xf32>
    %181 = arith.subf %168, %180 : vector<128x32xf32>
    %cst_74 = arith.constant 9.99999974E-6 : f32
    %182 = vector.broadcast %cst_74 : f32 to vector<128x1xf32>
    %183 = arith.addf %179, %182 : vector<128x1xf32>
    %184 = math.rsqrt %183 : vector<128x1xf32>
    %185 = vector.broadcast %184 : vector<128x1xf32> to vector<128x32xf32>
    %186 = arith.mulf %181, %185 : vector<128x32xf32>
    %c0_75 = arith.constant 0 : index
    %c0_76 = arith.constant 0 : index
    %c0_77 = arith.constant 0 : index
    %187 = vector.load %arg14[%c0_75, %c0_76, %c0_77] : memref<1x1x32xf32, #tpu.memory_space<vmem>>, vector<1x1x32xf32>
    %188 = vector.shape_cast %187 : vector<1x1x32xf32> to vector<1x32xf32>
    %189 = vector.broadcast %188 : vector<1x32xf32> to vector<128x32xf32>
    %190 = arith.mulf %186, %189 : vector<128x32xf32>
    %c0_78 = arith.constant 0 : index
    %c0_79 = arith.constant 0 : index
    %c0_80 = arith.constant 0 : index
    %191 = vector.load %arg15[%c0_78, %c0_79, %c0_80] : memref<1x1x32xf32, #tpu.memory_space<vmem>>, vector<1x1x32xf32>
    %192 = vector.shape_cast %191 : vector<1x1x32xf32> to vector<1x32xf32>
    %193 = vector.broadcast %192 : vector<1x32xf32> to vector<128x32xf32>
    %194 = arith.addf %190, %193 : vector<128x32xf32>
    %c0_81 = arith.constant 0 : index
    %c0_82 = arith.constant 0 : index
    %195 = vector.load %arg21[%c0_81, %c0_82] : memref<128x32xf32, #tpu.memory_space<vmem>>, vector<128x32xf32>
    tpu.vector_store %arg21[%c0_81, %c0_82], %194 {strides = array<i32>} : memref<128x32xf32, #tpu.memory_space<vmem>>, vector<128x32xf32>,
    %c1_i32_83 = arith.constant 1 : i32
    %196 = arith.cmpi eq, %arg1, %c1_i32_83 : i32
    %197 = arith.extui %196 : i1 to i32
    %c0_i32_84 = arith.constant 0 : i32
    %198 = arith.cmpi ne, %197, %c0_i32_84 : i32
    scf.if %198 {
      %199 = tpu.iota {dimensions = array<i32: 0>} : vector<128x1xi32>
      %c8_i32 = arith.constant 8 : i32
      %200 = vector.broadcast %c8_i32 : i32 to vector<128x1xi32>
      %201 = arith.cmpi slt, %199, %200 : vector<128x1xi32>
      %202 = arith.extui %201 : vector<128x1xi1> to vector<128x1xi32>
      %203 = arith.sitofp %202 : vector<128x1xi32> to vector<128x1xf32>
      %cst_85 = arith.constant 1.250000e-01 : f32
      %204 = vector.broadcast %cst_85 : f32 to vector<128x1xf32>
      %205 = arith.mulf %203, %204 : vector<128x1xf32>
      %206 = vector.shape_cast %194 : vector<128x32xf32> to vector<1x128x32xf32>
      %207 = vector.shape_cast %205 : vector<128x1xf32> to vector<1x128x1xf32>
      %208 = vector.broadcast %207 : vector<1x128x1xf32> to vector<1x128x32xf32>
      %209 = arith.mulf %206, %208 : vector<1x128x32xf32>
      %cst_86 = arith.constant dense<0.000000e+00> : vector<1x32xf32>
      %210 = vector.multi_reduction <add>, %209, %cst_86 [1] : vector<1x128x32xf32> to vector<1x32xf32>
      %211 = arith.truncf %210 : vector<1x32xf32> to vector<1x32xbf16>
      %c0_87 = arith.constant 0 : index
      %c0_88 = arith.constant 0 : index
      %212 = vector.load %arg16[%c0_87, %c0_88] : memref<32x16xbf16, #tpu.memory_space<vmem>>, vector<32x16xbf16>
      %cst_89 = arith.constant dense<0.000000e+00> : vector<1x16xf32>
      %213 = tpu.matmul %211, %212, %cst_89 {dimension_numbers = #tpu.dot_dimension_numbers<[1], [0], [0], [1], [0, 0, 1, 1], [], []>} : vector<1x32xbf16>, vector<32x16xbf16>, vector<1x16xf32> -> vector<1x16xf32>
      %c0_90 = arith.constant 0 : index
      %c0_91 = arith.constant 0 : index
      %214 = vector.load %arg17[%c0_90, %c0_91] : memref<1x16xf32, #tpu.memory_space<vmem>>, vector<1x16xf32>
      %215 = arith.addf %213, %214 : vector<1x16xf32>
      %cst_92 = arith.constant 0.000000e+00 : f32
      %216 = vector.broadcast %cst_92 : f32 to vector<1x16xf32>
      %217 = arith.maximumf %215, %216 : vector<1x16xf32>
      %218 = arith.truncf %217 : vector<1x16xf32> to vector<1x16xbf16>
      %c0_93 = arith.constant 0 : index
      %c0_94 = arith.constant 0 : index
      %219 = vector.load %arg18[%c0_93, %c0_94] : memref<16x2xbf16, #tpu.memory_space<vmem>>, vector<16x2xbf16>
      %cst_95 = arith.constant dense<0.000000e+00> : vector<1x2xf32>
      %220 = tpu.matmul %218, %219, %cst_95 {dimension_numbers = #tpu.dot_dimension_numbers<[1], [0], [0], [1], [0, 0, 1, 1], [], []>} : vector<1x16xbf16>, vector<16x2xbf16>, vector<1x2xf32> -> vector<1x2xf32>
      %c0_96 = arith.constant 0 : index
      %c0_97 = arith.constant 0 : index
      %221 = vector.load %arg19[%c0_96, %c0_97] : memref<1x2xf32, #tpu.memory_space<vmem>>, vector<1x2xf32>
      %222 = arith.addf %220, %221 : vector<1x2xf32>
      %223 = vector.shape_cast %222 : vector<1x2xf32> to vector<1x1x2xf32>
      %c0_98 = arith.constant 0 : index
      %c0_99 = arith.constant 0 : index
      %c0_100 = arith.constant 0 : index
      %224 = vector.load %arg20[%c0_98, %c0_99, %c0_100] : memref<1x1x2xf32, #tpu.memory_space<vmem>>, vector<1x1x2xf32>
      tpu.vector_store %arg20[%c0_98, %c0_99, %c0_100], %223 {strides = array<i32>} : memref<1x1x2xf32, #tpu.memory_space<vmem>>, vector<1x1x2xf32>,
    } else {
    }
    return
  }
  func.func @transform_0(%arg0: i32, %arg1: i32) -> (i32, i32) {
    %c0_i32 = arith.constant 0 : i32
    %c0_i32_0 = arith.constant 0 : i32
    return %arg0, %c0_i32 : i32, i32
  }
  func.func @transform_1(%arg0: i32, %arg1: i32) -> (i32, i32, i32) {
    %c0_i32 = arith.constant 0 : i32
    %c0_i32_0 = arith.constant 0 : i32
    %c0_i32_1 = arith.constant 0 : i32
    return %arg0, %c0_i32, %c0_i32_0 : i32, i32, i32
  }
  func.func @transform_2(%arg0: i32, %arg1: i32) -> (i32, i32, i32) {
    %c0_i32 = arith.constant 0 : i32
    %c0_i32_0 = arith.constant 0 : i32
    %c0_i32_1 = arith.constant 0 : i32
    return %arg1, %c0_i32, %c0_i32_0 : i32, i32, i32
  }
  func.func @transform_3(%arg0: i32, %arg1: i32) -> (i32, i32, i32) {
    %c0_i32 = arith.constant 0 : i32
    %c0_i32_0 = arith.constant 0 : i32
    %c0_i32_1 = arith.constant 0 : i32
    return %arg1, %c0_i32, %c0_i32_0 : i32, i32, i32
  }
  func.func @transform_4(%arg0: i32, %arg1: i32) -> (i32, i32, i32) {
    %c0_i32 = arith.constant 0 : i32
    %c0_i32_0 = arith.constant 0 : i32
    %c0_i32_1 = arith.constant 0 : i32
    return %arg1, %c0_i32, %c0_i32_0 : i32, i32, i32
  }
  func.func @transform_5(%arg0: i32, %arg1: i32) -> (i32, i32, i32) {
    %c0_i32 = arith.constant 0 : i32
    %c0_i32_0 = arith.constant 0 : i32
    %c0_i32_1 = arith.constant 0 : i32
    return %arg1, %c0_i32, %c0_i32_0 : i32, i32, i32
  }
  func.func @transform_6(%arg0: i32, %arg1: i32) -> (i32, i32, i32) {
    %c0_i32 = arith.constant 0 : i32
    %c0_i32_0 = arith.constant 0 : i32
    %c0_i32_1 = arith.constant 0 : i32
    return %arg1, %c0_i32, %c0_i32_0 : i32, i32, i32
  }
  func.func @transform_7(%arg0: i32, %arg1: i32) -> (i32, i32, i32) {
    %c0_i32 = arith.constant 0 : i32
    %c0_i32_0 = arith.constant 0 : i32
    %c0_i32_1 = arith.constant 0 : i32
    return %arg1, %c0_i32, %c0_i32_0 : i32, i32, i32
  }
  func.func @transform_8(%arg0: i32, %arg1: i32) -> (i32, i32, i32) {
    %c0_i32 = arith.constant 0 : i32
    %c0_i32_0 = arith.constant 0 : i32
    %c0_i32_1 = arith.constant 0 : i32
    return %arg1, %c0_i32, %c0_i32_0 : i32, i32, i32
  }
  func.func @transform_9(%arg0: i32, %arg1: i32) -> (i32, i32, i32) {
    %c0_i32 = arith.constant 0 : i32
    %c0_i32_0 = arith.constant 0 : i32
    %c0_i32_1 = arith.constant 0 : i32
    return %arg1, %c0_i32, %c0_i32_0 : i32, i32, i32
  }
  func.func @transform_10(%arg0: i32, %arg1: i32) -> (i32, i32, i32) {
    %c0_i32 = arith.constant 0 : i32
    %c0_i32_0 = arith.constant 0 : i32
    %c0_i32_1 = arith.constant 0 : i32
    return %arg1, %c0_i32, %c0_i32_0 : i32, i32, i32
  }
  func.func @transform_11(%arg0: i32, %arg1: i32) -> (i32, i32, i32) {
    %c0_i32 = arith.constant 0 : i32
    %c0_i32_0 = arith.constant 0 : i32
    %c0_i32_1 = arith.constant 0 : i32
    return %arg1, %c0_i32, %c0_i32_0 : i32, i32, i32
  }
  func.func @transform_12(%arg0: i32, %arg1: i32) -> (i32, i32, i32) {
    %c0_i32 = arith.constant 0 : i32
    %c0_i32_0 = arith.constant 0 : i32
    %c0_i32_1 = arith.constant 0 : i32
    return %arg1, %c0_i32, %c0_i32_0 : i32, i32, i32
  }
  func.func @transform_13(%arg0: i32, %arg1: i32) -> (i32, i32, i32) {
    %c0_i32 = arith.constant 0 : i32
    %c0_i32_0 = arith.constant 0 : i32
    %c0_i32_1 = arith.constant 0 : i32
    return %arg1, %c0_i32, %c0_i32_0 : i32, i32, i32
  }
  func.func @transform_14(%arg0: i32, %arg1: i32) -> (i32, i32) {
    %c0_i32 = arith.constant 0 : i32
    %c0_i32_0 = arith.constant 0 : i32
    %c0_i32_1 = arith.constant 0 : i32
    return %c0_i32, %c0_i32_0 : i32, i32
  }
  func.func @transform_15(%arg0: i32, %arg1: i32) -> (i32, i32) {
    %c0_i32 = arith.constant 0 : i32
    %c0_i32_0 = arith.constant 0 : i32
    %c0_i32_1 = arith.constant 0 : i32
    return %c0_i32, %c0_i32_0 : i32, i32
  }
  func.func @transform_16(%arg0: i32, %arg1: i32) -> (i32, i32) {
    %c0_i32 = arith.constant 0 : i32
    %c0_i32_0 = arith.constant 0 : i32
    %c0_i32_1 = arith.constant 0 : i32
    return %c0_i32, %c0_i32_0 : i32, i32
  }
  func.func @transform_17(%arg0: i32, %arg1: i32) -> (i32, i32) {
    %c0_i32 = arith.constant 0 : i32
    %c0_i32_0 = arith.constant 0 : i32
    %c0_i32_1 = arith.constant 0 : i32
    return %c0_i32, %c0_i32_0 : i32, i32
  }
  func.func @transform_18(%arg0: i32, %arg1: i32) -> (i32, i32, i32) {
    %c0_i32 = arith.constant 0 : i32
    %c0_i32_0 = arith.constant 0 : i32
    %c0_i32_1 = arith.constant 0 : i32
    return %arg0, %c0_i32, %c0_i32_0 : i32, i32, i32
  }
}

</mosaic_0001>

<bundles_post_ra>
// kernel: tpu_custom_call.1
= control target key start
LH: loop header
LB: loop body
LE: loop exit
PB: predicated region body
PF: predicated region fallthrough
CT: control target
= control target key end

     0   :  { %s8277_s0 = inlined_call_operand.vmem [shape: f32[256,32], index: 0, kind: input, shape index: {}]   ;;  %s8278_s1 = inlined_call_operand.vmem [shape: f32[2,1,128], index: 1, kind: input, shape index: {}]   ;;  %s8279_s2 = inlined_call_operand.vmem [shape: bf16[2,32,96], index: 2, kind: input, shape index: {}]   ;;  %s8280_s3 = inlined_call_operand.vmem [shape: f32[2,1,96], index: 3, kind: input, shape index: {}]   ;;  %s8281_s4 = inlined_call_operand.vmem [shape: bf16[2,32,32], index: 4, kind: input, shape index: {}]   ;;  %s8282_s5 = inlined_call_operand.vmem [shape: f32[2,1,32], index: 5, kind: input, shape index: {}]   ;;  %s8283_s6 = inlined_call_operand.vmem [shape: f32[2,1,32], index: 6, kind: input, shape index: {}]   ;;  %s8284_s7 = inlined_call_operand.vmem [shape: f32[2,1,32], index: 7, kind: input, shape index: {}]   ;;  %s8285_s8 = inlined_call_operand.vmem [shape: bf16[2,32,64], index: 8, kind: input, shape index: {}]   ;;  %s8286_s9 = inlined_call_operand.vmem [shape: f32[2,1,64], index: 9, kind: input, shape index: {}]   ;;  %s8287_s10 = inlined_call_operand.vmem [shape: bf16[2,64,32], index: 10, kind: input, shape index: {}]   ;;  %s8288_s11 = inlined_call_operand.vmem [shape: f32[2,1,32], index: 11, kind: input, shape index: {}]   ;;  %s8289_s12 = inlined_call_operand.vmem [shape: f32[2,1,32], index: 12, kind: input, shape index: {}]   ;;  %s8290_s13 = inlined_call_operand.vmem [shape: f32[2,1,32], index: 13, kind: input, shape index: {}]   ;;  %s8291_s14 = inlined_call_operand.vmem [shape: bf16[32,16], index: 14, kind: input, shape index: {}]   ;;  %s8292_s15 = inlined_call_operand.vmem [shape: f32[1,16], index: 15, kind: input, shape index: {}]   ;;  %s8293_s16 = inlined_call_operand.vmem [shape: bf16[16,2], index: 16, kind: input, shape index: {}]   ;;  %s8294_s17 = inlined_call_operand.vmem [shape: f32[1,2], index: 17, kind: input, shape index: {}]   ;;  %s8295_s18 = inlined_call_operand.hbm [shape: f32[2,1,2], index: 18, kind: output, shape index: {}]  }
   0x1   :  { %8312 = sst [smem:[#allocation37_spill]] %s8277_s0 }
   0x2   :  { %8313 = sst [smem:[#allocation38_spill]] %s8278_s1 }
   0x3   :  { %8314 = sst [smem:[#allocation39_spill]] %s8279_s2 }
   0x4   :  { %8315 = sst [smem:[#allocation40_spill]] %s8281_s4 }
   0x5   :  { %8316 = sst [smem:[#allocation41_spill]] %s8291_s14 }
   0x6   :  { %8317 = sst [smem:[#allocation42_spill]] %s8292_s15 }
   0x7   :  { %8318 = sst [smem:[#allocation43_spill]] %s8293_s16 }
   0x8   :  { %8319 = sst [smem:[#allocation44_spill]] %s8294_s17 }
   0x9   :  { %8320 = sst [smem:[#allocation45_spill]] %s8295_s18 }
   0xa   :  { %23 = vsyncpa [#allocation6], 0 }
   0xb   :  { %25 = vsyncpa [#allocation6 + $0x1], 0  ;;  %s6188_s27 = smov 0   ;;  %s6190_s28 = smov 0  }
   0xc   :  { %s6192_s29 = smov 0   ;;  %s6194_s30 = smov 0  }
   0xd   :  { %s6196_s0 = smov 0   ;;  %s6198_s19 = smov 0  }
   0xe   :  { %s6200_s1 = smov 0   ;;  %s6202_s20 = smov 0  }
   0xf LB: > { %8321 = sst [smem:[#allocation8_spill]] %s6046_s27  ;;  %s4720_s21 = sadd.s32 4294967295, %s6074_s20   ;;  %s6074_s20 = sphi %s6202_s20, %s31_s20   ;;  %s6070_s1 = sphi %s6200_s1, %s8412_s1   ;;  %s6066_s19 = sphi %s6198_s19, %s8411_s19   ;;  %s6062_s0 = sphi %s6196_s0, %s8410_s0   ;;  %s6058_s30 = sphi %s6194_s30, %s8409_s30   ;;  %s6054_s29 = sphi %s6192_s29, %s8408_s29   ;;  %s6050_s28 = sphi %s6190_s28, %s8414_s28   ;;  %s6046_s27 = sphi %s6188_s27, %s8413_s27  }
  0x10   : > { %8322 = sst [smem:[#allocation9_spill]] %s6054_s29  ;;  %s4721_s22 = sadd.s32 4294967294, %s6074_s20  }
  0x11   : > { %8323 = sst [smem:[#allocation10_spill]] %s6066_s19  ;;  %s40_s2 = sadd.s32 1, %s6066_s19 }
  0x12   : > { %8324 = sst [smem:[#allocation11_spill]] %s6070_s1  ;;  %p41_p0 = scmp.ge.s32.totalorder %s40_s2, 2 }
  0x13   : > { %8325 = sst [smem:[#allocation12_spill]] %s6074_s20  ;;  %s43_s23 = sadd.s32 1, %s6070_s1 }
  0x14   : > { %p508_p1 = scmp.ne.s32.totalorder %s6054_s29, %s6050_s28  ;;  %p509_p2 = scmp.eq.s32.totalorder %s4720_s21, 3 }
  0x15   : > { %s8416_s2 = smov (%p41_p0, %s40_s2), 0  ;;  %s8418_s23 = smov (!%p41_p0, %s43_s23), %s6070_s1 }
  0x16   : > { %8326 = sst [smem:[#allocation13_spill]] %s8416_s2  ;;  %p6237_p3 = por %p509_p2, %p508_p1 }
  0x17   : > { %p514_p4 = scmp.ne.s32.totalorder %s6050_s28, %s6046_s27  ;;  %p45_p5 = scmp.ge.s32.totalorder %s8418_s23, 2 }
  0x18   : > { %s8327_s24 = scalar_select %p6237_p3, 1, 0 }
  0x19   : > { %p515_p6 = scmp.eq.s32.totalorder %s4721_s22, 3  ;;  %p4724_p7 = scmp.ge.s32.totalorder %s6074_s20, 1 }
  0x1a   : > { %8328 = sst [smem:[#allocation14_spill]] %s8327_s24  ;;  %p640_p8 = scmp.lt.s32.totalorder %s6074_s20, 5 }
  0x1b   : > { %s8420_s23 = smov (%p45_p5, %s8418_s23), 0  ;;  %p6247_p9 = por %p515_p6, %p514_p4 }
  0x1c   : > { %8329 = sst [smem:[#allocation15_spill]] %s8420_s23  ;;  %p641_p10 = pnand %p4724_p7, %p640_p8 }
  0x1d   : > { %s8330_s25 = scalar_select %p6247_p9, 1, 0 }
  0x1e   : > { %s495_s26 = ssub.s32 %s6070_s1, %s8420_s23  ;;  %s498_s21 = sadd.s32 1, %s6054_s29 }
  0x1f   : > { %8331 = sst [smem:[#allocation16_spill]] %s8330_s25  ;;  %p496_p11 = scmp.eq.s32.totalorder %s495_s26, 0 }
  0x20   : > { %644 = sbr.rel (%p641_p10) target bundleno = 5260 (0x148c), region = 92 }
  0x21   : > { %s6255_s2 = scalar_select %p496_p11, %s6054_s29, %s498_s21  }
  0x23   : > { %8332 = sst [smem:[#allocation17_spill]] %s6255_s2 }
  0x27   : > { %s6259_s19 = sshll.u32 %s6062_s0, 4  ;;  %p746_p13 = scmp.lt.s32.totalorder %s6062_s0, 1 }
  0x28   : > { %8333 = sst [smem:[#allocation18_spill]] %s6259_s19  ;;  %p741_p12 = scmp.lt.s32.totalorder %s6259_s19, 31 }
  0x29   : > { %p749_p0 = scmp.lt.s32.totalorder %s6058_s30, 1  ;;  %s8422_s0 = smov (!%p746_p13, %s6062_s0), 1 }
  0x2a   : > { %s742_s23 = scalar_select %p741_p12, %s6259_s19, 31 }
  0x2b   : > { %s8334_s2 = sld [smem:[#allocation37_spill]]  ;;  %s8336_s20 = sld [smem:[#allocation38_spill]] }
  0x2c   : > { %s4726_s26 = sshll.u32 %s742_s23, 3  ;;  %s8338_s25 = sld [smem:[#allocation39_spill]] }
  0x2d   : > { %s6277_s22 = scalar_select %p749_p0, %s6058_s30, 1 }
  0x2e   : > { %s8339_s4 = sld [smem:[#allocation40_spill]]  ;;  %s8341_s18 = sand.u32 1, %s6050_s28  }
  0x2f   : > { %s4828_s1 = sshll.u32 %s6277_s22, 4  ;;  %s6335_s21 = scalar_lea.vmem [#allocation5], %s8341_s18 }
  0x30   : > { %p4735_p1 = scmp.ne.s32.totalorder %s6058_s30, 0 }
  0x31   : > { %s6269_s29 = scalar_lea.vmem %s8334_s2, %s4726_s26  ;;  %s6274_s24 = scalar_lea.vmem %s8336_s20, %s8422_s0  ;;  %vm814_vm0 = vcmask (!%p4735_p1), 261120  }
  0x32   : > { %8335 = sst [smem:[#allocation19_spill]] %s6269_s29  ;;  %s6287_s26 = scalar_lea.vmem %s8338_s25, %s4828_s1 }
  0x33   : > { %8337 = sst [smem:[#allocation20_spill]] %s6274_s24  ;;  %s6309_s25 = scalar_lea.vmem %s8285_s8, %s4828_s1 }
  0x34   : > { %s6292_s19 = scalar_lea.vmem %s8339_s4, %s4828_s1  ;;  %s778_s4 = scalar_lea.vmem %s8286_s9, %s6277_s22 }
  0x35   : > { %8340 = sst [smem:[#allocation21_spill]] %s6292_s19  ;;  %s4831_s19 = sshll.u32 %s6277_s22, 5 }
  0x36   : > { %s6319_s16 = scalar_lea.vmem %s8287_s10, %s4831_s19  ;;  %s786_s2 = scalar_lea.vmem %s8288_s11, %s6277_s22 }
  0x37   : > { %s789_s0 = scalar_lea.vmem %s8289_s12, %s6277_s22  ;;  %s792_s29 = scalar_lea.vmem %s8290_s13, %s6277_s22 }
  0x38   : > { %797 = sbr.rel (%p4735_p1) target bundleno = 71 (0x47), region = 96  ;;  %s8342_s19 = sld [smem:[#allocation19_spill]] (!%p4735_p1) }
  0x3e   : > { %v798_v0 = vld [vmem:[%s8342_s19] sm:$0xff] (!%p4735_p1)  ;;  %v799_v1 = vld [vmem:[%s8342_s19 + $0x8] sm:$0xff] (!%p4735_p1)  ;;  %v800_v2 = vld [vmem:[%s8342_s19 + $0x10] sm:$0xff] (!%p4735_p1) }
  0x3f   : > { %815 = vst.msk [vmem:[#allocation2] sm:$0xff] %vm814_vm0, %v798_v0  ;;  %816 = vst.msk [vmem:[#allocation2 + $0x8] sm:$0xff] %vm814_vm0, %v799_v1  ;;  %v801_v3 = vld [vmem:[%s8342_s19 + $0x18] sm:$0xff]  ;;  %v802_v4 = vld [vmem:[%s8342_s19 + $0x20] sm:$0xff] }
  0x40   : > { %817 = vst.msk [vmem:[#allocation2 + $0x10] sm:$0xff] %vm814_vm0, %v800_v2  ;;  %v803_v5 = vld [vmem:[%s8342_s19 + $0x28] sm:$0xff]  ;;  %818 = vst.msk [vmem:[#allocation2 + $0x18] sm:$0xff] %vm814_vm0, %v801_v3  ;;  %v804_v6 = vld [vmem:[%s8342_s19 + $0x30] sm:$0xff] }
  0x41   : > { %819 = vst.msk [vmem:[#allocation2 + $0x20] sm:$0xff] %vm814_vm0, %v802_v4  ;;  %820 = vst.msk [vmem:[#allocation2 + $0x28] sm:$0xff] %vm814_vm0, %v803_v5  ;;  %v805_v7 = vld [vmem:[%s8342_s19 + $0x38] sm:$0xff]  ;;  %v806_v8 = vld [vmem:[%s8342_s19 + $0x40] sm:$0xff] }
  0x42   : > { %821 = vst.msk [vmem:[#allocation2 + $0x30] sm:$0xff] %vm814_vm0, %v804_v6  ;;  %822 = vst.msk [vmem:[#allocation2 + $0x38] sm:$0xff] %vm814_vm0, %v805_v7  ;;  %v807_v9 = vld [vmem:[%s8342_s19 + $0x48] sm:$0xff]  ;;  %v808_v10 = vld [vmem:[%s8342_s19 + $0x50] sm:$0xff] }
  0x43   : > { %823 = vst.msk [vmem:[#allocation2 + $0x40] sm:$0xff] %vm814_vm0, %v806_v8  ;;  %v809_v11 = vld [vmem:[%s8342_s19 + $0x58] sm:$0xff]  ;;  %824 = vst.msk [vmem:[#allocation2 + $0x48] sm:$0xff] %vm814_vm0, %v807_v9  ;;  %v810_v12 = vld [vmem:[%s8342_s19 + $0x60] sm:$0xff] }
  0x44   : > { %825 = vst.msk [vmem:[#allocation2 + $0x50] sm:$0xff] %vm814_vm0, %v808_v10  ;;  %826 = vst.msk [vmem:[#allocation2 + $0x58] sm:$0xff] %vm814_vm0, %v809_v11  ;;  %v811_v13 = vld [vmem:[%s8342_s19 + $0x68] sm:$0xff]  ;;  %v812_v14 = vld [vmem:[%s8342_s19 + $0x70] sm:$0xff] }
  0x45   : > { %827 = vst.msk [vmem:[#allocation2 + $0x60] sm:$0xff] %vm814_vm0, %v810_v12  ;;  %828 = vst.msk [vmem:[#allocation2 + $0x68] sm:$0xff] %vm814_vm0, %v811_v13  ;;  %v813_v15 = vld [vmem:[%s8342_s19 + $0x78] sm:$0xff] }
  0x46   : > { %829 = vst.msk [vmem:[#allocation2 + $0x70] sm:$0xff] %vm814_vm0, %v812_v14  ;;  %830 = vst.msk [vmem:[#allocation2 + $0x78] sm:$0xff] %vm814_vm0, %v813_v15 }
  0x47 PF: > { %v5616_v16 = vld [vmem:[%s6287_s26] sm:$0xff]   ;;  %v5617_v17 = vld [vmem:[%s6287_s26 + $0x8] sm:$0xff]   ;;  %vm883_vm1 = vcmask 261120   ;;  %v843_v21 = vld [vmem:[#allocation2 + $0x10] sm:$0xff]  ;;  %s8343_s15 = scalar_lea.vmem %s8280_s3, %s6277_s22  ;;  %vm1013_vm2 = vcmask 785408   ;;  %vm1055_vm3 = vcmask 64512  }
  0x48   : > { %5007 = vmatprep.subr.bf16.mxu0 %v5616_v16  ;;  %v844_v22 = vld [vmem:[#allocation2 + $0x18] sm:$0xff]  ;;  %v845_v23 = vld [vmem:[#allocation2 + $0x20] sm:$0xff]  ;;  %v846_v24 = vld [vmem:[#allocation2 + $0x28] sm:$0xff]  ;;  %s6076_s17 = smov 96   ;;  %s6077_s14 = smov 64   ;;  %vm3166_vm4 = vcmask 130048  }
  0x49   : > { %5008 = vmatpush3.bf16.msra.mxu0 %v5616_v16  ;;  %v858_v25 = vpack.c.bf16 %v844_v22, %v843_v21  ;;  %v859_v26 = vpack.c.bf16 %v846_v24, %v845_v23  ;;  %v847_v27 = vld [vmem:[#allocation2 + $0x30] sm:$0xff]  ;;  %v848_v28 = vld [vmem:[#allocation2 + $0x38] sm:$0xff]  ;;  %v4736_v43 = vld [vmem:[%s8343_s15] ss:$0 sm:$0xff]  ;;  %s8344_s24 = sld [smem:[#allocation20_spill]]  ;;  %s6078_s23 = smov 88  }
  0x4a   : > { %5009 = vmatprep.subr.bf16.mxu0 %v5617_v17  ;;  %v849_v29 = vld [vmem:[#allocation2 + $0x40] sm:$0xff]  ;;  %v850_v30 = vld [vmem:[#allocation2 + $0x48] sm:$0xff]  ;;  %v860_v31 = vpack.c.bf16 %v848_v28, %v847_v27  ;;  %s6079_s1 = smov 120   ;;  %s6080_s20 = smov 56   ;;  %vm3183_vm5 = vcmask 195584   ;;  %vm3849_vm6 = vcmask 523264  }
  0x4b   : > { %v861_v32 = vpack.c.bf16 %v850_v30, %v849_v29  ;;  %v851_v33 = vld [vmem:[#allocation2 + $0x50] sm:$0xff]  ;;  %v852_v34 = vld [vmem:[#allocation2 + $0x58] sm:$0xff]  ;;  %s6081_s18 = smov 80   ;;  %s6082_s19 = smov 112  }
  0x4c   : > { %v853_v35 = vld [vmem:[#allocation2 + $0x60] sm:$0xff]  ;;  %v854_v36 = vld [vmem:[#allocation2 + $0x68] sm:$0xff]  ;;  %v862_v37 = vpack.c.bf16 %v852_v34, %v851_v33  ;;  %s6083_s27 = smov 48   ;;  %s6084_s26 = smov 72  }
  0x4d   : > { %5010 = vmatpush3.bf16.msra.mxu0 %v5617_v17  ;;  %v863_v38 = vpack.c.bf16 %v854_v36, %v853_v35  ;;  %v855_v39 = vld [vmem:[#allocation2 + $0x70] sm:$0xff]  ;;  %v856_v40 = vld [vmem:[#allocation2 + $0x78] sm:$0xff]  ;;  %s6085_s15 = smov 104   ;;  %p4819_p2 = scmp.ne.s32.totalorder %s6058_s30, 1 }
  0x4e   : > { %v841_v18 = vld [vmem:[#allocation2] sm:$0xff]  ;;  %v842_v19 = vld [vmem:[#allocation2 + $0x8] sm:$0xff]  ;;  %v864_v41 = vpack.c.bf16 %v856_v40, %v855_v39  ;;  %vm6091_vm7 = vmmov (!%p4819_p2), 0   ;;  %vm4510_vm8 = vcmask (!%p4819_p2), 8192  }
  0x4f   : > { %v857_v20 = vpack.c.bf16 %v842_v19, %v841_v18 }
  0x51   : > { %5011 = vmatprep.mubr.msk.bf16.mxu0 %vm883_vm1, %v857_v20 }
  0x52   : > { %5012 = vmatmul.mubr.msk.bf16.vlgmr.msra.gmra.mrb[0].mxu0 %vm883_vm1, %v858_v25 }
  0x53   : > { %5015 = vmatprep.mubr.msk.bf16.mxu0 %vm883_vm1, %v859_v26 }
  0x5a   : > { %5016 = vmatmul.mubr.msk.bf16.gmra.mrb[4].mxu0 %vm883_vm1, %v860_v31 }
  0x5b   : > { %5019 = vmatprep.mubr.msk.bf16.mxu0 %vm883_vm1, %v861_v32 }
  0x62   : > { %5020 = vmatmul.mubr.msk.bf16.gmra.mrb[8].mxu0 %vm883_vm1, %v862_v37 }
  0x63   : > { %5023 = vmatprep.mubr.msk.bf16.mxu0 %vm883_vm1, %v863_v38 }
  0x6a   : > { %5024 = vmatmul.mubr.msk.bf16.gmra.mrb[12].mxu0 %vm883_vm1, %v864_v41 }
 0x125   : > { %v5013_v42 = vpop.f32.mrb[0].mxu0 }
 0x126   : > { %v942_v44 = vpop.f32.mrb[1].mxu0  ;;  %v951_v46 = vadd.f32 %v5013_v42, %v4736_v43 }
 0x127   : > { %v5014_v45 = vpop.f32.mrb[2].mxu0  ;;  %v943_v49 = vadd.f32 %v4736_v43, %v942_v44 }
 0x128   : > { %v954_v47 = vadd.f32 %v5014_v45, %v4736_v43  ;;  %v945_v48 = vpop.f32.mrb[3].mxu0 }
 0x129   : > { %v946_v50 = vadd.f32 %v4736_v43, %v945_v48 }
 0x12a   : > { %v1006_v51 = vpack.c.bf16 %v954_v47, %v951_v46 }
 0x12b   : > { %v1005_v52 = vpack.c.bf16 %v946_v50, %v943_v49 }
 0x12c   : > { %1015 = vst.msk [vmem:[#allocation3 + $0x8] sm:$0xff] %vm1013_vm2, %v1006_v51 }
 0x12d   : > { %1014 = vst.msk [vmem:[#allocation3] sm:$0xff] %vm1013_vm2, %v1005_v52  ;;  %v5017_v53 = vpop.f32.mrb[4].mxu0  ;;  %v6466_v52 = vld [vmem:[%s8344_s24] ss:$0 sm:$0xff] }
 0x12e   : > { %v967_v54 = vadd.f32 %v5017_v53, %v4736_v43  ;;  %v958_v55 = vpop.f32.mrb[5].mxu0 }
 0x12f   : > { %v959_v56 = vadd.f32 %v4736_v43, %v958_v55  ;;  %v5018_v57 = vpop.f32.mrb[6].mxu0 }
 0x130   : > { %v970_v58 = vadd.f32 %v5018_v57, %v4736_v43  ;;  %v961_v59 = vpop.f32.mrb[7].mxu0 }
 0x131   : > { %v962_v60 = vadd.f32 %v4736_v43, %v961_v59 }
 0x132   : > { %v1008_v61 = vpack.c.bf16 %v970_v58, %v967_v54 }
 0x133   : > { %v1007_v62 = vpack.c.bf16 %v962_v60, %v959_v56  ;;  %v6395_v5 = vld [vmem:[#allocation3 + $0x8] sm:$0xff] }
 0x134   : > { %1017 = vst.msk [vmem:[#allocation3 + $0x18] sm:$0xff] %vm1013_vm2, %v1008_v61  ;;  %v6388_v63 = vld [vmem:[#allocation3] sm:$0xff] }
 0x135   : > { %1016 = vst.msk [vmem:[#allocation3 + $0x10] sm:$0xff] %vm1013_vm2, %v1007_v62  ;;  %1039 = vrot.lane.b32.xlu0 %v6388_v63, %s6076_s17  ;;  %5043 = vmatprep.mubr.msk.bf16.mxu1 %vm1055_vm3, %v6388_v63  ;;  %v5021_v0 = vpop.f32.mrb[8].mxu0 }
 0x136   : > { %v983_v1 = vadd.f32 %v5021_v0, %v4736_v43  ;;  %v974_v2 = vpop.f32.mrb[9].mxu0 }
 0x137   : > { %v975_v3 = vadd.f32 %v4736_v43, %v974_v2  ;;  %v5022_v4 = vpop.f32.mrb[10].mxu0 }
 0x138   : > { %v986_v6 = vadd.f32 %v5022_v4, %v4736_v43  ;;  %v977_v7 = vpop.f32.mrb[11].mxu0 }
 0x139   : > { %1041 = vrot.lane.b32.xlu0 %v6395_v5, %s6076_s17  ;;  %v978_v8 = vadd.f32 %v4736_v43, %v977_v7 }
 0x13a   : > { %v1010_v9 = vpack.c.bf16 %v986_v6, %v983_v1 }
 0x13b   : > { %v1009_v10 = vpack.c.bf16 %v978_v8, %v975_v3  ;;  %v6405_v15 = vld [vmem:[#allocation3 + $0x18] sm:$0xff] }
 0x13c   : > { %1019 = vst.msk [vmem:[#allocation3 + $0x28] sm:$0xff] %vm1013_vm2, %v1010_v9  ;;  %v6400_v11 = vld [vmem:[#allocation3 + $0x10] sm:$0xff] }
 0x13d   : > { %1018 = vst.msk [vmem:[#allocation3 + $0x20] sm:$0xff] %vm1013_vm2, %v1009_v10  ;;  %v5025_v12 = vpop.f32.mrb[12].mxu0  ;;  %1043 = vrot.lane.b32.xlu1 %v6400_v11, %s6076_s17 }
 0x13e   : > { %v999_v13 = vadd.f32 %v5025_v12, %v4736_v43  ;;  %v990_v14 = vpop.f32.mrb[13].mxu0 }
 0x13f   : > { %v991_v16 = vadd.f32 %v4736_v43, %v990_v14  ;;  %v5026_v17 = vpop.f32.mrb[14].mxu0 }
 0x140   : > { %v1002_v18 = vadd.f32 %v5026_v17, %v4736_v43  ;;  %v993_v19 = vpop.f32.mrb[15].mxu0 }
 0x141   : > { %v994_v20 = vadd.f32 %v4736_v43, %v993_v19  ;;  %1045 = vrot.lane.b32.xlu1 %v6405_v15, %s6076_s17 }
 0x142   : > { %v1012_v21 = vpack.c.bf16 %v1002_v18, %v999_v13 }
 0x143   : > { %v1011_v22 = vpack.c.bf16 %v994_v20, %v991_v16  ;;  %v6409_v23 = vld [vmem:[#allocation3 + $0x28] sm:$0xff] }
 0x144   : > { %1021 = vst.msk [vmem:[#allocation3 + $0x38] sm:$0xff] %vm1013_vm2, %v1012_v21  ;;  %v6412_v24 = vld [vmem:[#allocation3 + $0x20] sm:$0xff] }
 0x145   : > { %1020 = vst.msk [vmem:[#allocation3 + $0x30] sm:$0xff] %vm1013_vm2, %v1011_v22  ;;  %1049 = vrot.lane.b32.xlu1 %v6409_v23, %s6076_s17  ;;  %1047 = vrot.lane.b32.xlu0 %v6412_v24, %s6076_s17 }
 0x14b   : > { %v6419_v25 = vld [vmem:[#allocation3 + $0x38] sm:$0xff] }
 0x14c   : > { %1053 = vrot.lane.b32.xlu1 %v6419_v25, %s6076_s17  ;;  %v6423_v26 = vld [vmem:[#allocation3 + $0x30] sm:$0xff] }
 0x14d   : > { %1051 = vrot.lane.b32.xlu0 %v6423_v26, %s6076_s17  ;;  %s6086_s17 = smov 40  }
 0x150   : > { %1391 = vrot.lane.b32.xlu1 %v6388_v63, %s6077_s14 }
 0x151   : > { %1393 = vrot.lane.b32.xlu0 %v6395_v5, %s6077_s14 }
 0x154   : > { %1395 = vrot.lane.b32.xlu1 %v6400_v11, %s6077_s14 }
 0x155   : > { %1397 = vrot.lane.b32.xlu0 %v6405_v15, %s6077_s14 }
 0x158   : > { %1399 = vrot.lane.b32.xlu1 %v6412_v24, %s6077_s14 }
 0x15c   : > { %1401 = vrot.lane.b32.xlu1 %v6409_v23, %s6077_s14 }
 0x160   : > { %1405 = vrot.lane.b32.xlu1 %v6419_v25, %s6077_s14 }
 0x164   : > { %1403 = vrot.lane.b32.xlu1 %v6423_v26, %s6077_s14  ;;  %s6087_s14 = smov 8  }
 0x1a7   : > { %v1040_v27 = vpop.permute.xlu0 %1039 }
 0x1a8   : > { %5377 = vmatprep.subr.msk.bf16.mxu1 %vm1055_vm3, %v1040_v27  ;;  %v1081_v28 = vsel %vm1055_vm3, %v1040_v27, 0 }
 0x1a9   : > { %5028 = vmatpush3.bf16.xpose.msra.mxu1 %v1081_v28 }
 0x1ab   : > { %v1042_v29 = vpop.permute.xlu0 %1041 }
 0x1ac   : > { %5378 = vmatprep.subr.msk.bf16.mxu1 %vm1055_vm3, %v1042_v29  ;;  %v1084_v31 = vsel %vm1055_vm3, %v1042_v29, 0 }
 0x1af   : > { %v1044_v30 = vpop.permute.xlu1 %1043 }
 0x1b0   : > { %v1087_v33 = vsel %vm1055_vm3, %v1044_v30, 0 }
 0x1b1   : > { %5030 = vmatpush3.bf16.xpose.msra.mxu1 %v1084_v31 }
 0x1b2   : > { %5379 = vmatprep.subr.msk.bf16.mxu1 %vm1055_vm3, %v1044_v30 }
 0x1b3   : > { %v1046_v32 = vpop.permute.xlu1 %1045 }
 0x1b4   : > { %v1090_v38 = vsel %vm1055_vm3, %v1046_v32, 0 }
 0x1b7   : > { %v1050_v34 = vpop.permute.xlu1 %1049  ;;  %v1048_v35 = vpop.permute.xlu0 %1047 }
 0x1b8   : > { %v1093_v42 = vsel %vm1055_vm3, %v1048_v35, 0  ;;  %v1096_v46 = vsel %vm1055_vm3, %v1050_v34, 0 }
 0x1b9   : > { %5032 = vmatpush3.bf16.xpose.msra.mxu1 %v1087_v33 }
 0x1ba   : > { %5380 = vmatprep.subr.msk.bf16.mxu1 %vm1055_vm3, %v1046_v32 }
 0x1be   : > { %v1054_v36 = vpop.permute.xlu1 %1053 }
 0x1bf   : > { %v1052_v37 = vpop.permute.xlu0 %1051  ;;  %v1102_v50 = vsel %vm1055_vm3, %v1054_v36, 0 }
 0x1c0   : > { %v1099_v49 = vsel %vm1055_vm3, %v1052_v37, 0 }
 0x1c1   : > { %5034 = vmatpush3.bf16.xpose.msra.mxu1 %v1090_v38 }
 0x1c2   : > { %v1392_v39 = vpop.permute.xlu1 %1391  ;;  %5381 = vmatprep.subr.msk.bf16.mxu1 %vm1055_vm3, %v1048_v35 }
 0x1c3   : > { %5059 = vmatprep.subr.bf16.mxu0 %v1392_v39  ;;  %v1394_v40 = vpop.permute.xlu0 %1393 }
 0x1c4   : > { %5060 = vmatpush3.bf16.msra.mxu0 %v1392_v39 }
 0x1c5   : > { %5061 = vmatprep.subr.bf16.mxu0 %v1394_v40 }
 0x1c6   : > { %v1396_v41 = vpop.permute.xlu1 %1395 }
 0x1c7   : > { %v1398_v44 = vpop.permute.xlu0 %1397 }
 0x1c8   : > { %5062 = vmatpush3.bf16.msra.mxu0 %v1394_v40 }
 0x1c9   : > { %5036 = vmatpush3.bf16.xpose.msra.mxu1 %v1093_v42  ;;  %5063 = vmatprep.subr.bf16.mxu0 %v1396_v41 }
 0x1ca   : > { %v1400_v43 = vpop.permute.xlu1 %1399  ;;  %5382 = vmatprep.subr.msk.bf16.mxu1 %vm1055_vm3, %v1050_v34 }
 0x1cc   : > { %5064 = vmatpush3.bf16.msra.mxu0 %v1396_v41 }
 0x1cd   : > { %5065 = vmatprep.subr.bf16.mxu0 %v1398_v44 }
 0x1ce   : > { %v1402_v45 = vpop.permute.xlu1 %1401 }
 0x1d0   : > { %5066 = vmatpush3.bf16.msra.mxu0 %v1398_v44 }
 0x1d1   : > { %5038 = vmatpush3.bf16.xpose.msra.mxu1 %v1096_v46  ;;  %5067 = vmatprep.subr.bf16.mxu0 %v1400_v43 }
 0x1d2   : > { %v1406_v47 = vpop.permute.xlu1 %1405  ;;  %5383 = vmatprep.subr.msk.bf16.mxu1 %vm1055_vm3, %v1052_v37 }
 0x1d4   : > { %5068 = vmatpush3.bf16.msra.mxu0 %v1400_v43 }
 0x1d5   : > { %5069 = vmatprep.subr.bf16.mxu0 %v1402_v45 }
 0x1d6   : > { %v1404_v48 = vpop.permute.xlu1 %1403 }
 0x1d8   : > { %5070 = vmatpush3.bf16.msra.mxu0 %v1402_v45 }
 0x1d9   : > { %5040 = vmatpush3.bf16.xpose.msra.mxu1 %v1099_v49  ;;  %5071 = vmatprep.subr.bf16.mxu0 %v1404_v48 }
 0x1da   : > { %5384 = vmatprep.subr.msk.bf16.mxu1 %vm1055_vm3, %v1054_v36 }
 0x1dc   : > { %5072 = vmatpush3.bf16.msra.mxu0 %v1404_v48 }
 0x1dd   : > { %5073 = vmatprep.subr.bf16.mxu0 %v1406_v47 }
 0x1e0   : > { %5074 = vmatpush3.bf16.msra.mxu0 %v1406_v47 }
 0x1e1   : > { %5042 = vmatpush3.bf16.xpose.msra.mxu1 %v1102_v50 }
 0x1e8   : > { %5044 = vmatmul.mubr.msk.bf16.vlgmr.msra.gmra.mrb[0].mxu1 %vm1055_vm3, %v6395_v5 }
 0x1e9   : > { %5047 = vmatprep.mubr.msk.bf16.mxu1 %vm1055_vm3, %v6400_v11 }
 0x1f0   : > { %5048 = vmatmul.mubr.msk.bf16.gmra.mrb[4].mxu1 %vm1055_vm3, %v6405_v15 }
 0x1f1   : > { %5051 = vmatprep.mubr.msk.bf16.mxu1 %vm1055_vm3, %v6412_v24 }
 0x1f8   : > { %5052 = vmatmul.mubr.msk.bf16.gmra.mrb[8].mxu1 %vm1055_vm3, %v6409_v23 }
 0x1f9   : > { %5055 = vmatprep.mubr.msk.bf16.mxu1 %vm1055_vm3, %v6423_v26 }
 0x200   : > { %5056 = vmatmul.mubr.msk.bf16.gmra.mrb[12].mxu1 %vm1055_vm3, %v6419_v25 }
 0x2bb   : > { %v5045_v51 = vpop.f32.mrb[0].mxu1 }
 0x2bc   : > { %v1203_v53 = vmul.f32 0.35355338, %v5045_v51  ;;  %v1138_v54 = vpop.f32.mrb[1].mxu1 }
 0x2bd   : > { %v5046_v55 = vpop.f32.mrb[2].mxu1  ;;  %v1201_v56 = vmul.f32 0.35355338, %v1138_v54 }
 0x2be   : > { %v1141_v57 = vpop.f32.mrb[3].mxu1  ;;  %v6469_v58 = vadd.f32 %v6466_v52, %v1203_v53  ;;  %v1204_v61 = vmul.f32 0.35355338, %v5046_v55 }
 0x2bf   : > { %v1202_v59 = vmul.f32 0.35355338, %v1141_v57  ;;  %v6476_v62 = vadd.f32 %v6466_v52, %v1201_v56 }
 0x2c0   : > { %1243 = vmax.xlane.f32.xlu0 %v6469_v58  ;;  %v1226_v4 = vadd.f32 %v6466_v52, %v1204_v61 }
 0x2c1   : > { %v6473_v60 = vadd.f32 %v6466_v52, %v1202_v59 }
 0x2c3   : > { %1241 = vmax.xlane.f32.xlu1 %v6473_v60  ;;  %v5049_v0 = vpop.f32.mrb[4].mxu1 }
 0x2c4   : > { %1239 = vmax.xlane.f32.xlu0 %v6476_v62  ;;  %v1154_v1 = vpop.f32.mrb[5].mxu1  ;;  %v1207_v16 = vmul.f32 0.35355338, %v5049_v0 }
 0x2c5   : > { %v5050_v2 = vpop.f32.mrb[6].mxu1  ;;  %v1205_v17 = vmul.f32 0.35355338, %v1154_v1 }
 0x2c6   : > { %v1157_v3 = vpop.f32.mrb[7].mxu1  ;;  %v6486_v18 = vadd.f32 %v6466_v52, %v1207_v16  ;;  %v1208_v19 = vmul.f32 0.35355338, %v5050_v2 }
 0x2c7   : > { %v6490_v21 = vadd.f32 %v6466_v52, %v1205_v17  ;;  %v1206_v22 = vmul.f32 0.35355338, %v1157_v3 }
 0x2c8   : > { %1245 = vmax.xlane.f32.xlu0 %v1226_v4  ;;  %v6493_v27 = vadd.f32 %v6466_v52, %v1208_v19 }
 0x2c9   : > { %v6501_v31 = vadd.f32 %v6466_v52, %v1206_v22 }
 0x2cb   : > { %v5053_v6 = vpop.f32.mrb[8].mxu1 }
 0x2cc   : > { %v1170_v7 = vpop.f32.mrb[9].mxu1  ;;  %v1211_v20 = vmul.f32 0.35355338, %v5053_v6 }
 0x2cd   : > { %v5054_v8 = vpop.f32.mrb[10].mxu1  ;;  %v1209_v28 = vmul.f32 0.35355338, %v1170_v7 }
 0x2ce   : > { %v1173_v9 = vpop.f32.mrb[11].mxu1  ;;  %v6498_v29 = vadd.f32 %v6466_v52, %v1211_v20  ;;  %v1212_v30 = vmul.f32 0.35355338, %v5054_v8 }
 0x2cf   : > { %v6506_v33 = vadd.f32 %v6466_v52, %v1209_v28  ;;  %v1210_v34 = vmul.f32 0.35355338, %v1173_v9 }
 0x2d0   : > { %v6509_v35 = vadd.f32 %v6466_v52, %v1212_v30 }
 0x2d1   : > { %v6517_v39 = vadd.f32 %v6466_v52, %v1210_v34 }
 0x2d3   : > { %v5057_v10 = vpop.f32.mrb[12].mxu1 }
 0x2d4   : > { %1530 = vrot.lane.b32.xlu1 %v6395_v5, %s6078_s23  ;;  %v1186_v12 = vpop.f32.mrb[13].mxu1  ;;  %v1215_v32 = vmul.f32 0.35355338, %v5057_v10 }
 0x2d5   : > { %v5058_v13 = vpop.f32.mrb[14].mxu1  ;;  %v1213_v36 = vmul.f32 0.35355338, %v1186_v12 }
 0x2d6   : > { %v1189_v14 = vpop.f32.mrb[15].mxu1  ;;  %v6514_v37 = vadd.f32 %v6466_v52, %v1215_v32  ;;  %v1216_v38 = vmul.f32 0.35355338, %v5058_v13 }
 0x2d7   : > { %v6522_v40 = vadd.f32 %v6466_v52, %v1213_v36  ;;  %v1214_v41 = vmul.f32 0.35355338, %v1189_v14 }
 0x2d8   : > { %v6525_v42 = vadd.f32 %v6466_v52, %v1216_v38 }
 0x2d9   : > { %v6530_v43 = vadd.f32 %v6466_v52, %v1214_v41 }
 0x2de   : > { %1528 = vrot.lane.b32.xlu0 %v6388_v63, %s6078_s23 }
 0x2f8   : > { %1251 = vmax.xlane.f32.xlu1 %v6486_v18 }
 0x2fc   : > { %1247 = vmax.xlane.f32.xlu1 %v6490_v21 }
 0x2fd   : > { %1253 = vmax.xlane.f32.xlu0 %v6493_v27 }
 0x300   : > { %1259 = vmax.xlane.f32.xlu1 %v6498_v29 }
 0x301   : > { %1249 = vmax.xlane.f32.xlu0 %v6501_v31 }
 0x304   : > { %1255 = vmax.xlane.f32.xlu1 %v6506_v33 }
 0x305   : > { %1261 = vmax.xlane.f32.xlu0 %v6509_v35 }
 0x308   : > { %1267 = vmax.xlane.f32.xlu1 %v6514_v37 }
 0x309   : > { %1257 = vmax.xlane.f32.xlu0 %v6517_v39 }
 0x30c   : > { %1263 = vmax.xlane.f32.xlu1 %v6522_v40 }
 0x30d   : > { %1269 = vmax.xlane.f32.xlu0 %v6525_v42 }
 0x311   : > { %1265 = vmax.xlane.f32.xlu0 %v6530_v43 }
 0x31d   : > { %1532 = vrot.lane.b32.xlu1 %v6400_v11, %s6078_s23 }
 0x34d   : > { %v1244_v44 = vpop.xlane.xlu0 %1243 }
 0x34e   : > { %v1273_v45 = vsub.f32 %v6469_v58, %v1244_v44 }
 0x350   : > { %v1291_v46 = vmul.f32 1.442695, %v1273_v45  ;;  %v1242_v49 = vpop.xlane.xlu1 %1241 }
 0x351   : > { %v1240_v47 = vpop.xlane.xlu0 %1239  ;;  %v1272_v53 = vsub.f32 %v6473_v60, %v1242_v49 }
 0x352   : > { %5626 = vpow2.f32 %v1291_v46  ;;  %v1271_v48 = vsub.f32 %v6476_v62, %v1240_v47 }
 0x353   : > { %v1289_v57 = vmul.f32 1.442695, %v1272_v53 }
 0x354   : > { %v1287_v50 = vmul.f32 1.442695, %v1271_v48  ;;  %v6554_v62 = vpop.permute.xlu1 %1530 }
 0x355   : > { %v1246_v51 = vpop.xlane.xlu0 %1245 }
 0x356   : > { %5628 = vpow2.f32 %v1287_v50  ;;  %v1274_v54 = vsub.f32 %v1226_v4, %v1246_v51 }
 0x358   : > { %v1293_v55 = vmul.f32 1.442695, %v1274_v54 }
 0x359   : > { %v6538_v56 = vpop.permute.xlu0 %1528 }
 0x35a   : > { %5630 = vpow2.f32 %v1293_v55  ;;  %5385 = vmatprep.subr.msk.bf16.mxu0 %vm1055_vm3, %v6538_v56 }
 0x35b   : > { %5632 = vpow2.f32 %v1289_v57 }
 0x35c   : > { %v6542_v58 = vpop.eup %5626 }
 0x35d   : > { %1323 = vadd.xlane.f32.xlu0 %v6542_v58 }
 0x360   : > { %v6545_v59 = vpop.eup %5628 }
 0x361   : > { %1319 = vadd.xlane.f32.xlu1 %v6545_v59 }
 0x364   : > { %v6548_v60 = vpop.eup %5630 }
 0x365   : > { %1325 = vadd.xlane.f32.xlu0 %v6548_v60  ;;  %v6551_v61 = vpop.eup %5632 }
 0x369   : > { %1321 = vadd.xlane.f32.xlu0 %v6551_v61 }
 0x385   : > { %v1252_v0 = vpop.xlane.xlu1 %1251 }
 0x386   : > { %v1277_v1 = vsub.f32 %v6486_v18, %v1252_v0 }
 0x388   : > { %v1299_v2 = vmul.f32 1.442695, %v1277_v1 }
 0x389   : > { %v1248_v3 = vpop.xlane.xlu1 %1247 }
 0x38a   : > { %5634 = vpow2.f32 %v1299_v2  ;;  %v1275_v4 = vsub.f32 %v6490_v21, %v1248_v3  ;;  %v1254_v6 = vpop.xlane.xlu0 %1253 }
 0x38b   : > { %v1278_v7 = vsub.f32 %v6493_v27, %v1254_v6 }
 0x38c   : > { %v1295_v8 = vmul.f32 1.442695, %v1275_v4 }
 0x38d   : > { %v1301_v9 = vmul.f32 1.442695, %v1278_v7  ;;  %v1260_v27 = vpop.xlane.xlu1 %1259 }
 0x38e   : > { %5636 = vpow2.f32 %v1295_v8  ;;  %v1250_v10 = vpop.xlane.xlu0 %1249  ;;  %v1281_v30 = vsub.f32 %v6498_v29, %v1260_v27 }
 0x38f   : > { %v1276_v12 = vsub.f32 %v6501_v31, %v1250_v10  ;;  %5638 = vpow2.f32 %v1301_v9 }
 0x390   : > { %v1307_v34 = vmul.f32 1.442695, %v1281_v30 }
 0x391   : > { %v1297_v13 = vmul.f32 1.442695, %v1276_v12  ;;  %v1256_v31 = vpop.xlane.xlu1 %1255 }
 0x392   : > { %v1262_v19 = vpop.xlane.xlu0 %1261  ;;  %v1279_v36 = vsub.f32 %v6506_v33, %v1256_v31 }
 0x393   : > { %5640 = vpow2.f32 %v1297_v13  ;;  %v1282_v41 = vsub.f32 %v6509_v35, %v1262_v19 }
 0x394   : > { %v6560_v14 = vpop.eup %5634  ;;  %v1303_v38 = vmul.f32 1.442695, %v1279_v36 }
 0x395   : > { %1331 = vadd.xlane.f32.xlu0 %v6560_v14  ;;  %v1268_v44 = vpop.xlane.xlu1 %1267  ;;  %v1309_v45 = vmul.f32 1.442695, %v1282_v41 }
 0x396   : > { %v1258_v20 = vpop.xlane.xlu0 %1257  ;;  %v1285_v29 = vsub.f32 %v6514_v37, %v1268_v44 }
 0x397   : > { %v1280_v46 = vsub.f32 %v6517_v39, %v1258_v20 }
 0x398   : > { %v6563_v16 = vpop.eup %5636  ;;  %v1315_v49 = vmul.f32 1.442695, %v1285_v29 }
 0x399   : > { %1327 = vadd.xlane.f32.xlu0 %v6563_v16  ;;  %v6566_v17 = vpop.eup %5638  ;;  %v1264_v48 = vpop.xlane.xlu1 %1263 }
 0x39a   : > { %v1270_v21 = vpop.xlane.xlu0 %1269  ;;  %v1283_v35 = vsub.f32 %v6522_v40, %v1264_v48 }
 0x39b   : > { %v1286_v37 = vsub.f32 %v6525_v42, %v1270_v21  ;;  %v1569_v21 = vsel %vm1055_vm3, %v6538_v56, 0 }
 0x39c   : > { %v1311_v39 = vmul.f32 1.442695, %v1283_v35 }
 0x39d   : > { %v6568_v18 = vpop.eup %5640  ;;  %1333 = vadd.xlane.f32.xlu0 %v6566_v17  ;;  %v1317_v53 = vmul.f32 1.442695, %v1286_v37  ;;  %v1533_v57 = vpop.permute.xlu1 %1532 }
 0x39e   : > { %1329 = vadd.xlane.f32.xlu1 %v6568_v18  ;;  %v1266_v22 = vpop.xlane.xlu0 %1265  ;;  %v1575_v56 = vsel %vm1055_vm3, %v1533_v57, 0 }
 0x39f   : > { %v1284_v28 = vsub.f32 %v6530_v43, %v1266_v22  ;;  %v1305_v43 = vmul.f32 1.442695, %v1280_v46 }
 0x3a1   : > { %v1313_v32 = vmul.f32 1.442695, %v1284_v28 }
 0x3a3   : > { %5642 = vpow2.f32 %v1313_v32 }
 0x3a4   : > { %5644 = vpow2.f32 %v1307_v34 }
 0x3a5   : > { %5646 = vpow2.f32 %v1303_v38 }
 0x3a6   : > { %5648 = vpow2.f32 %v1309_v45 }
 0x3a7   : > { %5650 = vpow2.f32 %v1305_v43 }
 0x3a8   : > { %5652 = vpow2.f32 %v1315_v49 }
 0x3a9   : > { %5654 = vpow2.f32 %v1311_v39 }
 0x3aa   : > { %5656 = vpow2.f32 %v1317_v53 }
 0x3ad   : > { %v6583_v47 = vpop.eup %5642 }
 0x3ae   : > { %v6587_v33 = vpop.eup %5644 }
 0x3af   : > { %1534 = vrot.lane.b32.xlu1 %v6405_v15, %s6078_s23  ;;  %v6591_v50 = vpop.eup %5646 }
 0x3b0   : > { %v6595_v51 = vpop.eup %5648 }
 0x3b1   : > { %v6598_v54 = vpop.eup %5650 }
 0x3b2   : > { %v6603_v40 = vpop.eup %5652 }
 0x3b3   : > { %1536 = vrot.lane.b32.xlu0 %v6412_v24, %s6078_s23  ;;  %v6608_v42 = vpop.eup %5654 }
 0x3b4   : > { %v6613_v55 = vpop.eup %5656 }
 0x3b7   : > { %1538 = vrot.lane.b32.xlu0 %v6409_v23, %s6078_s23 }
 0x3d3   : > { %1345 = vadd.xlane.f32.xlu1 %v6583_v47 }
 0x3d6   : > { %1339 = vadd.xlane.f32.xlu0 %v6587_v33 }
 0x3da   : > { %1335 = vadd.xlane.f32.xlu0 %v6591_v50 }
 0x3de   : > { %1341 = vadd.xlane.f32.xlu0 %v6595_v51 }
 0x3e2   : > { %1337 = vadd.xlane.f32.xlu0 %v6598_v54 }
 0x3e4   : > { %1542 = vrot.lane.b32.xlu1 %v6419_v25, %s6078_s23 }
 0x3e6   : > { %1347 = vadd.xlane.f32.xlu0 %v6603_v40 }
 0x3e8   : > { %1520 = vrot.lane.b32.xlu1 %v6412_v24, %s6079_s1 }
 0x3ea   : > { %1343 = vadd.xlane.f32.xlu0 %v6608_v42  ;;  %v1324_v0 = vpop.xlane.xlu0 %1323 }
 0x3ec   : > { %1524 = vrot.lane.b32.xlu1 %v6423_v26, %s6079_s1 }
 0x3ee   : > { %1349 = vadd.xlane.f32.xlu0 %v6613_v55  ;;  %v1320_v1 = vpop.xlane.xlu1 %1319 }
 0x3f0   : > { %1875 = vrot.lane.b32.xlu1 %v6395_v5, %s6080_s20 }
 0x3f2   : > { %v1326_v2 = vpop.xlane.xlu0 %1325 }
 0x3f3   : > { %5658 = vrcp.f32 %v1326_v2 }
 0x3f4   : > { %1879 = vrot.lane.b32.xlu1 %v6405_v15, %s6080_s20  ;;  %5660 = vrcp.f32 %v1320_v1 }
 0x3f5   : > { %5662 = vrcp.f32 %v1324_v0 }
 0x3f6   : > { %v1322_v3 = vpop.xlane.xlu0 %1321 }
 0x3f7   : > { %5664 = vrcp.f32 %v1322_v3 }
 0x3f8   : > { %1885 = vrot.lane.b32.xlu1 %v6423_v26, %s6080_s20 }
 0x3fd   : > { %v5659_v4 = vpop.eup %5658 }
 0x3fe   : > { %v5661_v6 = vpop.eup %5660  ;;  %v1370_v9 = vmul.f32 %v5659_v4, %v6548_v60 }
 0x3ff   : > { %v5663_v7 = vpop.eup %5662  ;;  %v1367_v10 = vmul.f32 %v5661_v6, %v6545_v59 }
 0x400   : > { %v1369_v13 = vmul.f32 %v5663_v7, %v6542_v58 }
 0x401   : > { %v5665_v8 = vpop.eup %5664 }
 0x402   : > { %v1368_v12 = vmul.f32 %v5665_v8, %v6551_v61  ;;  %v1384_v20 = vpack.c.bf16 %v1370_v9, %v1369_v13 }
 0x404   : > { %1540 = vrot.lane.b32.xlu0 %v6423_v26, %s6078_s23  ;;  %v1383_v19 = vpack.c.bf16 %v1368_v12, %v1367_v10  ;;  %v1572_v26 = vsel %vm1055_vm3, %v6554_v62, 0  ;;  %s8370_s23 = sld [smem:[#allocation21_spill]] }
 0x406   : > { %5075 = vmatprep.mubr.bf16.mxu0 %v1383_v19 }
 0x407   : > { %5076 = vmatmul.mubr.bf16.vlgmr.msra.gmra.mrb[16].mxu0 %v1384_v20 }
 0x408   : > { %5092 = vmatpush3.bf16.xpose.msra.mxu0 %v1569_v21  ;;  %1512 = vrot.lane.b32.xlu0 %v6388_v63, %s6079_s1 }
 0x409   : > { %5386 = vmatprep.subr.msk.bf16.mxu0 %vm1055_vm3, %v6554_v62 }
 0x40c   : > { %1514 = vrot.lane.b32.xlu0 %v6395_v5, %s6079_s1 }
 0x410   : > { %5094 = vmatpush3.bf16.xpose.msra.mxu0 %v1572_v26  ;;  %1516 = vrot.lane.b32.xlu0 %v6400_v11, %s6079_s1 }
 0x411   : > { %5387 = vmatprep.subr.msk.bf16.mxu0 %vm1055_vm3, %v1533_v57 }
 0x414   : > { %1518 = vrot.lane.b32.xlu0 %v6405_v15, %s6079_s1 }
 0x418   : > { %5096 = vmatpush3.bf16.xpose.msra.mxu0 %v1575_v56  ;;  %1522 = vrot.lane.b32.xlu0 %v6409_v23, %s6079_s1 }
 0x41c   : > { %1526 = vrot.lane.b32.xlu0 %v6419_v25, %s6079_s1  ;;  %s6089_s1 = smov 24  }
 0x420   : > { %1873 = vrot.lane.b32.xlu0 %v6388_v63, %s6080_s20 }
 0x422   : > { %v1332_v58 = vpop.xlane.xlu0 %1331 }
 0x423   : > { %5666 = vrcp.f32 %v1332_v58 }
 0x424   : > { %1877 = vrot.lane.b32.xlu0 %v6400_v11, %s6080_s20 }
 0x426   : > { %v1328_v59 = vpop.xlane.xlu0 %1327 }
 0x427   : > { %5668 = vrcp.f32 %v1328_v59 }
 0x428   : > { %1881 = vrot.lane.b32.xlu0 %v6412_v24, %s6080_s20 }
 0x42a   : > { %v1334_v15 = vpop.xlane.xlu0 %1333 }
 0x42b   : > { %5670 = vrcp.f32 %v1334_v15  ;;  %v1330_v60 = vpop.xlane.xlu1 %1329 }
 0x42c   : > { %5672 = vrcp.f32 %v1330_v60  ;;  %1883 = vrot.lane.b32.xlu0 %v6409_v23, %s6080_s20 }
 0x42d   : > { %v5667_v24 = vpop.eup %5666 }
 0x42e   : > { %v1537_v62 = vpop.permute.xlu0 %1536  ;;  %v1373_v32 = vmul.f32 %v5667_v24, %v6560_v14 }
 0x42f   : > { %v1535_v61 = vpop.permute.xlu1 %1534 }
 0x430   : > { %1887 = vrot.lane.b32.xlu0 %v6419_v25, %s6080_s20  ;;  %5388 = vmatprep.subr.msk.bf16.mxu0 %vm1055_vm3, %v1535_v61  ;;  %v1578_v11 = vsel %vm1055_vm3, %v1535_v61, 0  ;;  %v1581_v25 = vsel %vm1055_vm3, %v1537_v62, 0 }
 0x431   : > { %5098 = vmatpush3.bf16.xpose.msra.mxu0 %v1578_v11  ;;  %v5669_v22 = vpop.eup %5668 }
 0x432   : > { %5389 = vmatprep.subr.msk.bf16.mxu0 %vm1055_vm3, %v1537_v62  ;;  %v1371_v23 = vmul.f32 %v5669_v22, %v6563_v16  ;;  %v1539_v34 = vpop.permute.xlu0 %1538 }
 0x433   : > { %v1584_v41 = vsel %vm1055_vm3, %v1539_v34, 0 }
 0x435   : > { %v5671_v27 = vpop.eup %5670 }
 0x436   : > { %v5673_v28 = vpop.eup %5672  ;;  %v1374_v30 = vmul.f32 %v5671_v27, %v6566_v17 }
 0x437   : > { %v1372_v31 = vmul.f32 %v5673_v28, %v6568_v18 }
 0x438   : > { %v1386_v38 = vpack.c.bf16 %v1374_v30, %v1373_v32 }
 0x439   : > { %5100 = vmatpush3.bf16.xpose.msra.mxu0 %v1581_v25  ;;  %v1385_v36 = vpack.c.bf16 %v1372_v31, %v1371_v23 }
 0x43a   : > { %5390 = vmatprep.subr.msk.bf16.mxu0 %vm1055_vm3, %v1539_v34 }
 0x43b   : > { %5079 = vmatprep.mubr.bf16.mxu0 %v1385_v36 }
 0x43c   : > { %5080 = vmatmul.mubr.bf16.gmra.mrb[20].mxu0 %v1386_v38 }
 0x441   : > { %5102 = vmatpush3.bf16.xpose.msra.mxu0 %v1584_v41 }
 0x460   : > { %v1346_v14 = vpop.xlane.xlu1 %1345 }
 0x463   : > { %v1340_v17 = vpop.xlane.xlu0 %1339 }
 0x464   : > { %v1543_v6 = vpop.permute.xlu1 %1542 }
 0x465   : > { %v1590_v19 = vsel %vm1055_vm3, %v1543_v6, 0 }
 0x467   : > { %v1336_v44 = vpop.xlane.xlu0 %1335 }
 0x468   : > { %v1521_v26 = vpop.permute.xlu1 %1520 }
 0x46b   : > { %v1342_v16 = vpop.xlane.xlu0 %1341 }
 0x46c   : > { %5674 = vrcp.f32 %v1342_v16  ;;  %v1525_v56 = vpop.permute.xlu1 %1524 }
 0x46d   : > { %5676 = vrcp.f32 %v1336_v44 }
 0x46e   : > { %5678 = vrcp.f32 %v1340_v17 }
 0x46f   : > { %v1338_v18 = vpop.xlane.xlu0 %1337 }
 0x470   : > { %5680 = vrcp.f32 %v1338_v18 }
 0x471   : > { %5682 = vrcp.f32 %v1346_v14 }
 0x473   : > { %v1348_v45 = vpop.xlane.xlu0 %1347 }
 0x476   : > { %v5675_v46 = vpop.eup %5674 }
 0x477   : > { %v1344_v29 = vpop.xlane.xlu0 %1343  ;;  %v5677_v43 = vpop.eup %5676  ;;  %v1378_v35 = vmul.f32 %v5675_v46, %v6595_v51 }
 0x478   : > { %5684 = vrcp.f32 %v1344_v29  ;;  %v5679_v48 = vpop.eup %5678  ;;  %v1375_v37 = vmul.f32 %v5677_v43, %v6591_v50 }
 0x479   : > { %5686 = vrcp.f32 %v1348_v45  ;;  %v1377_v57 = vmul.f32 %v5679_v48, %v6587_v33 }
 0x47a   : > { %v5681_v49 = vpop.eup %5680 }
 0x47b   : > { %v1350_v39 = vpop.xlane.xlu0 %1349  ;;  %v1376_v53 = vmul.f32 %v5681_v49, %v6598_v54  ;;  %v1388_v1 = vpack.c.bf16 %v1378_v35, %v1377_v57  ;;  %v5683_v3 = vpop.eup %5682 }
 0x47c   : > { %5688 = vrcp.f32 %v1350_v39  ;;  %v1380_v33 = vmul.f32 %v5683_v3, %v6583_v47 }
 0x47d   : > { %v1387_v0 = vpack.c.bf16 %v1376_v53, %v1375_v37 }
 0x47f   : > { %5083 = vmatprep.mubr.bf16.mxu0 %v1387_v0  ;;  %v1541_v2 = vpop.permute.xlu0 %1540 }
 0x480   : > { %5084 = vmatmul.mubr.bf16.gmra.mrb[24].mxu0 %v1388_v1  ;;  %5391 = vmatprep.subr.msk.bf16.mxu0 %vm1055_vm3, %v1541_v2  ;;  %v1587_v4 = vsel %vm1055_vm3, %v1541_v2, 0 }
 0x481   : > { %5104 = vmatpush3.bf16.xpose.msra.mxu0 %v1587_v4 }
 0x482   : > { %v5685_v51 = vpop.eup %5684  ;;  %5392 = vmatprep.subr.msk.bf16.mxu0 %vm1055_vm3, %v1543_v6 }
 0x483   : > { %v1513_v50 = vpop.permute.xlu0 %1512  ;;  %v1379_v54 = vmul.f32 %v5685_v51, %v6608_v42  ;;  %v5687_v7 = vpop.eup %5686 }
 0x484   : > { %v1381_v12 = vmul.f32 %v5687_v7, %v6603_v40 }
 0x485   : > { %v1389_v8 = vpack.c.bf16 %v1380_v33, %v1379_v54 }
 0x486   : > { %v5689_v9 = vpop.eup %5688 }
 0x487   : > { %5087 = vmatprep.mubr.bf16.mxu0 %v1389_v8  ;;  %v1515_v10 = vpop.permute.xlu0 %1514  ;;  %v1382_v13 = vmul.f32 %v5689_v9, %v6613_v55  ;;  %v1876_v55 = vpop.permute.xlu1 %1875 }
 0x489   : > { %5106 = vmatpush3.bf16.xpose.msra.mxu0 %v1590_v19  ;;  %v1390_v20 = vpack.c.bf16 %v1382_v13, %v1381_v12 }
 0x48b   : > { %5088 = vmatmul.mubr.bf16.gmra.mrb[28].mxu0 %v1390_v20  ;;  %v1517_v21 = vpop.permute.xlu0 %1516  ;;  %v1880_v15 = vpop.permute.xlu1 %1879 }
 0x48c   : > { %5107 = vmatprep.mubr.msk.bf16.mxu0 %vm1055_vm3, %v1513_v50 }
 0x48f   : > { %v1519_v42 = vpop.permute.xlu0 %1518  ;;  %v1886_v11 = vpop.permute.xlu1 %1885 }
 0x493   : > { %5108 = vmatmul.mubr.msk.bf16.vlgmr.msra.gmra.mrb[32].mxu0 %vm1055_vm3, %v1515_v10  ;;  %v1523_v47 = vpop.permute.xlu0 %1522 }
 0x494   : > { %5111 = vmatprep.mubr.msk.bf16.mxu0 %vm1055_vm3, %v1517_v21 }
 0x497   : > { %v1527_v58 = vpop.permute.xlu0 %1526 }
 0x49b   : > { %5112 = vmatmul.mubr.msk.bf16.gmra.mrb[36].mxu0 %vm1055_vm3, %v1519_v42  ;;  %v1874_v40 = vpop.permute.xlu0 %1873 }
 0x49c   : > { %5115 = vmatprep.mubr.msk.bf16.mxu0 %vm1055_vm3, %v1521_v26  ;;  %5123 = vmatprep.subr.bf16.mxu1 %v1874_v40 }
 0x49d   : > { %5124 = vmatpush3.bf16.msra.mxu1 %v1874_v40 }
 0x49e   : > { %5125 = vmatprep.subr.bf16.mxu1 %v1876_v55 }
 0x49f   : > { %v1878_v59 = vpop.permute.xlu0 %1877 }
 0x4a1   : > { %5126 = vmatpush3.bf16.msra.mxu1 %v1876_v55 }
 0x4a2   : > { %5127 = vmatprep.subr.bf16.mxu1 %v1878_v59 }
 0x4a3   : > { %5116 = vmatmul.mubr.msk.bf16.gmra.mrb[40].mxu0 %vm1055_vm3, %v1523_v47  ;;  %v1882_v60 = vpop.permute.xlu0 %1881 }
 0x4a4   : > { %5119 = vmatprep.mubr.msk.bf16.mxu0 %vm1055_vm3, %v1525_v56 }
 0x4a5   : > { %5128 = vmatpush3.bf16.msra.mxu1 %v1878_v59 }
 0x4a6   : > { %5129 = vmatprep.subr.bf16.mxu1 %v1880_v15 }
 0x4a7   : > { %v1884_v61 = vpop.permute.xlu0 %1883 }
 0x4a9   : > { %5130 = vmatpush3.bf16.msra.mxu1 %v1880_v15 }
 0x4aa   : > { %5131 = vmatprep.subr.bf16.mxu1 %v1882_v60 }
 0x4ab   : > { %5120 = vmatmul.mubr.msk.bf16.gmra.mrb[44].mxu0 %vm1055_vm3, %v1527_v58  ;;  %v1888_v62 = vpop.permute.xlu0 %1887 }
 0x4ad   : > { %5132 = vmatpush3.bf16.msra.mxu1 %v1882_v60 }
 0x4ae   : > { %5133 = vmatprep.subr.bf16.mxu1 %v1884_v61 }
 0x4b1   : > { %5134 = vmatpush3.bf16.msra.mxu1 %v1884_v61 }
 0x4b2   : > { %5135 = vmatprep.subr.bf16.mxu1 %v1886_v11 }
 0x4b5   : > { %5136 = vmatpush3.bf16.msra.mxu1 %v1886_v11 }
 0x4b6   : > { %5137 = vmatprep.subr.bf16.mxu1 %v1888_v62 }
 0x4b9   : > { %5138 = vmatpush3.bf16.msra.mxu1 %v1888_v62 }
 0x4da   : > { %v6688_v24 = vpop.f32.mrb[16].mxu0 }
 0x4db   : > { %8345 = vst [vmem:[#allocation22_spill] sm:$0xff] %v6688_v24  ;;  %v6690_v22 = vpop.f32.mrb[17].mxu0 }
 0x4dc   : > { %8346 = vst [vmem:[#allocation23_spill] sm:$0xff] %v6690_v22  ;;  %v6692_v27 = vpop.f32.mrb[18].mxu0 }
 0x4dd   : > { %v6694_v28 = vpop.f32.mrb[19].mxu0 }
 0x4de   : > { %8347 = vst [vmem:[#allocation24_spill] sm:$0xff] %v6694_v28 }
 0x50f   : > { %v6696_v30 = vpop.f32.mrb[20].mxu0 }
 0x510   : > { %8348 = vst [vmem:[#allocation25_spill] sm:$0xff] %v6696_v30  ;;  %v6698_v23 = vpop.f32.mrb[21].mxu0 }
 0x511   : > { %8349 = vst [vmem:[#allocation26_spill] sm:$0xff] %v6698_v23  ;;  %v6700_v31 = vpop.f32.mrb[22].mxu0 }
 0x512   : > { %8350 = vst [vmem:[#allocation27_spill] sm:$0xff] %v6700_v31  ;;  %v6702_v25 = vpop.f32.mrb[23].mxu0 }
 0x513   : > { %8351 = vst [vmem:[#allocation28_spill] sm:$0xff] %v6702_v25 }
 0x553   : > { %v6704_v32 = vpop.f32.mrb[24].mxu0 }
 0x554   : > { %8352 = vst [vmem:[#allocation29_spill] sm:$0xff] %v6704_v32  ;;  %v6706_v34 = vpop.f32.mrb[25].mxu0 }
 0x555   : > { %8353 = vst [vmem:[#allocation30_spill] sm:$0xff] %v6706_v34  ;;  %v6708_v36 = vpop.f32.mrb[26].mxu0 }
 0x556   : > { %8354 = vst [vmem:[#allocation31_spill] sm:$0xff] %v6708_v36  ;;  %v6710_v38 = vpop.f32.mrb[27].mxu0 }
 0x557   : > { %8355 = vst [vmem:[#allocation32_spill] sm:$0xff] %v6710_v38 }
 0x55e   : > { %v6712_v41 = vpop.f32.mrb[28].mxu0 }
 0x55f   : > { %8356 = vst [vmem:[#allocation33_spill] sm:$0xff] %v6712_v41  ;;  %v6714_v17 = vpop.f32.mrb[29].mxu0 }
 0x560   : > { %8357 = vst [vmem:[#allocation34_spill] sm:$0xff] %v6714_v17  ;;  %v6716_v44 = vpop.f32.mrb[30].mxu0 }
 0x561   : > { %8358 = vst [vmem:[#allocation35_spill] sm:$0xff] %v6716_v44  ;;  %v6718_v16 = vpop.f32.mrb[31].mxu0 }
 0x562   : > { %8359 = vst [vmem:[#allocation36_spill] sm:$0xff] %v6718_v16 }
 0x566   : > { %v5109_v18 = vpop.f32.mrb[32].mxu0 }
 0x567   : > { %v1691_v14 = vmul.f32 0.35355338, %v5109_v18  ;;  %v1626_v45 = vpop.f32.mrb[33].mxu0 }
 0x568   : > { %v1689_v46 = vmul.f32 0.35355338, %v1626_v45  ;;  %v5110_v29 = vpop.f32.mrb[34].mxu0 }
 0x569   : > { %v1629_v43 = vpop.f32.mrb[35].mxu0  ;;  %v6721_v48 = vadd.f32 %v6466_v52, %v1691_v14  ;;  %v1692_v49 = vmul.f32 0.35355338, %v5110_v29  ;;  %v6785_v14 = vld [vmem:[#allocation3 + $0x10] sm:$0xff] }
 0x56a   : > { %v6724_v35 = vadd.f32 %v6466_v52, %v1689_v46  ;;  %v1690_v33 = vmul.f32 0.35355338, %v1629_v43 }
 0x56b   : > { %1725 = vmax.xlane.f32.xlu0 %v6721_v48  ;;  %v6729_v37 = vadd.f32 %v6466_v52, %v1692_v49 }
 0x56c   : > { %1721 = vmax.xlane.f32.xlu1 %v6724_v35  ;;  %v6737_v8 = vadd.f32 %v6466_v52, %v1690_v33 }
 0x56e   : > { %v5113_v39 = vpop.f32.mrb[36].mxu0 }
 0x56f   : > { %v1642_v53 = vpop.f32.mrb[37].mxu0  ;;  %v1695_v7 = vmul.f32 0.35355338, %v5113_v39 }
 0x570   : > { %1727 = vmax.xlane.f32.xlu1 %v6729_v37  ;;  %v5114_v57 = vpop.f32.mrb[38].mxu0  ;;  %v1693_v10 = vmul.f32 0.35355338, %v1642_v53 }
 0x571   : > { %v1645_v0 = vpop.f32.mrb[39].mxu0  ;;  %v1696_v9 = vmul.f32 0.35355338, %v5114_v57  ;;  %v6741_v12 = vadd.f32 %v6466_v52, %v1695_v7 }
 0x572   : > { %v1694_v13 = vmul.f32 0.35355338, %v1645_v0 }
 0x573   : > { %v6744_v19 = vadd.f32 %v6466_v52, %v1696_v9 }
 0x574   : > { %v6750_v21 = vadd.f32 %v6466_v52, %v1694_v13 }
 0x576   : > { %v5117_v1 = vpop.f32.mrb[40].mxu0 }
 0x577   : > { %v1658_v2 = vpop.f32.mrb[41].mxu0 }
 0x578   : > { %v5118_v3 = vpop.f32.mrb[42].mxu0  ;;  %v1697_v42 = vmul.f32 0.35355338, %v1658_v2 }
 0x579   : > { %v1661_v4 = vpop.f32.mrb[43].mxu0  ;;  %v1700_v20 = vmul.f32 0.35355338, %v5118_v3 }
 0x57a   : > { %v1698_v47 = vmul.f32 0.35355338, %v1661_v4  ;;  %v6762_v58 = vadd.f32 %v6466_v52, %v1697_v42 }
 0x57b   : > { %v6757_v56 = vadd.f32 %v6466_v52, %v1700_v20 }
 0x57c   : > { %v6765_v59 = vadd.f32 %v6466_v52, %v1698_v47 }
 0x57e   : > { %v5121_v6 = vpop.f32.mrb[44].mxu0 }
 0x57f   : > { %v1674_v51 = vpop.f32.mrb[45].mxu0  ;;  %v1703_v40 = vmul.f32 0.35355338, %v5121_v6 }
 0x580   : > { %v5122_v50 = vpop.f32.mrb[46].mxu0  ;;  %v1701_v60 = vmul.f32 0.35355338, %v1674_v51 }
 0x581   : > { %2012 = vrot.lane.b32.xlu0 %v6395_v5, %s6081_s18  ;;  %2010 = vrot.lane.b32.xlu1 %v6388_v63, %s6081_s18  ;;  %v1677_v54 = vpop.f32.mrb[47].mxu0  ;;  %v1699_v63 = vmul.f32 0.35355338, %v5117_v1  ;;  %v1709_v5 = vadd.f32 %v6466_v52, %v1693_v10  ;;  %v1704_v55 = vmul.f32 0.35355338, %v5122_v50  ;;  %v6770_v15 = vadd.f32 %v6466_v52, %v1703_v40 }
 0x582   : > { %v1702_v61 = vmul.f32 0.35355338, %v1677_v54  ;;  %v6778_v62 = vadd.f32 %v6466_v52, %v1701_v60 }
 0x583   : > { %v6754_v26 = vadd.f32 %v6466_v52, %v1699_v63  ;;  %v6773_v11 = vadd.f32 %v6466_v52, %v1704_v55 }
 0x584   : > { %v6781_v18 = vadd.f32 %v6466_v52, %v1702_v61 }
 0x5a0   : > { %1723 = vmax.xlane.f32.xlu0 %v6737_v8 }
 0x5a4   : > { %1733 = vmax.xlane.f32.xlu0 %v6741_v12 }
 0x5a5   : > { %1735 = vmax.xlane.f32.xlu1 %v6744_v19 }
 0x5a8   : > { %1729 = vmax.xlane.f32.xlu0 %v1709_v5 }
 0x5a9   : > { %1731 = vmax.xlane.f32.xlu1 %v6750_v21 }
 0x5ac   : > { %1741 = vmax.xlane.f32.xlu0 %v6754_v26 }
 0x5ad   : > { %1743 = vmax.xlane.f32.xlu1 %v6757_v56 }
 0x5b0   : > { %1737 = vmax.xlane.f32.xlu0 %v6762_v58 }
 0x5b1   : > { %1739 = vmax.xlane.f32.xlu1 %v6765_v59 }
 0x5b4   : > { %1749 = vmax.xlane.f32.xlu0 %v6770_v15 }
 0x5b5   : > { %1751 = vmax.xlane.f32.xlu1 %v6773_v11 }
 0x5b8   : > { %1745 = vmax.xlane.f32.xlu0 %v6778_v62 }
 0x5b9   : > { %1747 = vmax.xlane.f32.xlu1 %v6781_v18 }
 0x5ce   : > { %2014 = vrot.lane.b32.xlu0 %v6785_v14, %s6081_s18 }
 0x5f8   : > { %v1726_v45 = vpop.xlane.xlu0 %1725 }
 0x5f9   : > { %v1755_v46 = vsub.f32 %v6721_v48, %v1726_v45  ;;  %v1722_v29 = vpop.xlane.xlu1 %1721 }
 0x5fa   : > { %v1753_v43 = vsub.f32 %v6724_v35, %v1722_v29 }
 0x5fb   : > { %v1773_v49 = vmul.f32 1.442695, %v1755_v46 }
 0x5fc   : > { %v1769_v39 = vmul.f32 1.442695, %v1753_v43  ;;  %v6809_v2 = vpop.permute.xlu0 %2012 }
 0x5fd   : > { %5690 = vpow2.f32 %v1773_v49  ;;  %v1728_v52 = vpop.xlane.xlu1 %1727 }
 0x5fe   : > { %v1756_v53 = vsub.f32 %v6729_v37, %v1728_v52  ;;  %5692 = vpow2.f32 %v1769_v39  ;;  %v6805_v37 = vld [vmem:[#allocation3 + $0x18] sm:$0xff] }
 0x600   : > { %v1775_v57 = vmul.f32 1.442695, %v1756_v53 }
 0x601   : > { %v6792_v0 = vpop.permute.xlu1 %2010 }
 0x602   : > { %5393 = vmatprep.subr.msk.bf16.mxu1 %vm1055_vm3, %v6792_v0  ;;  %5694 = vpow2.f32 %v1775_v57 }
 0x607   : > { %v6796_v1 = vpop.eup %5690 }
 0x608   : > { %1805 = vadd.xlane.f32.xlu1 %v6796_v1  ;;  %v6799_v48 = vpop.eup %5692 }
 0x60c   : > { %1801 = vadd.xlane.f32.xlu1 %v6799_v48  ;;  %v6802_v35 = vpop.eup %5694 }
 0x610   : > { %1807 = vadd.xlane.f32.xlu1 %v6802_v35 }
 0x621   : > { %2016 = vrot.lane.b32.xlu1 %v6805_v37, %s6081_s18 }
 0x62d   : > { %v1724_v3 = vpop.xlane.xlu0 %1723 }
 0x62e   : > { %v1754_v4 = vsub.f32 %v6737_v8, %v1724_v3 }
 0x630   : > { %v1771_v6 = vmul.f32 1.442695, %v1754_v4 }
 0x631   : > { %v1734_v51 = vpop.xlane.xlu0 %1733 }
 0x632   : > { %5696 = vpow2.f32 %v1771_v6  ;;  %v1736_v50 = vpop.xlane.xlu1 %1735  ;;  %v1759_v3 = vsub.f32 %v6741_v12, %v1734_v51 }
 0x633   : > { %v1760_v33 = vsub.f32 %v6744_v19, %v1736_v50 }
 0x634   : > { %v1781_v6 = vmul.f32 1.442695, %v1759_v3 }
 0x635   : > { %v1730_v54 = vpop.xlane.xlu0 %1729  ;;  %v1783_v63 = vmul.f32 1.442695, %v1760_v33 }
 0x636   : > { %v1757_v7 = vsub.f32 %v1709_v5, %v1730_v54  ;;  %v1732_v9 = vpop.xlane.xlu1 %1731 }
 0x637   : > { %v1758_v50 = vsub.f32 %v6750_v21, %v1732_v9  ;;  %v6858_v21 = vld [vmem:[#allocation3] sm:$0xff] }
 0x638   : > { %v1777_v10 = vmul.f32 1.442695, %v1757_v7 }
 0x639   : > { %v1742_v13 = vpop.xlane.xlu0 %1741  ;;  %v1779_v54 = vmul.f32 1.442695, %v1758_v50 }
 0x63a   : > { %5698 = vpow2.f32 %v1777_v10  ;;  %v1763_v20 = vsub.f32 %v6754_v26, %v1742_v13  ;;  %v1744_v42 = vpop.xlane.xlu1 %1743 }
 0x63b   : > { %5700 = vpow2.f32 %v1783_v63  ;;  %v1764_v19 = vsub.f32 %v6757_v56, %v1744_v42  ;;  %v6850_v63 = vld [vmem:[#allocation3 + $0x28] sm:$0xff]  ;;  %v6871_v42 = vld [vmem:[#allocation3 + $0x30] sm:$0xff] }
 0x63c   : > { %v6814_v47 = vpop.eup %5696  ;;  %v1789_v40 = vmul.f32 1.442695, %v1763_v20 }
 0x63d   : > { %1803 = vadd.xlane.f32.xlu0 %v6814_v47  ;;  %v1738_v8 = vpop.xlane.xlu0 %1737  ;;  %v1791_v26 = vmul.f32 1.442695, %v1764_v19 }
 0x63e   : > { %v1761_v55 = vsub.f32 %v6762_v58, %v1738_v8  ;;  %v1740_v60 = vpop.xlane.xlu1 %1739  ;;  %5702 = vpow2.f32 %v1789_v40  ;;  %v6877_v40 = vld [vmem:[#allocation3 + $0x8] sm:$0xff] }
 0x63f   : > { %v1762_v46 = vsub.f32 %v6765_v59, %v1740_v60  ;;  %v6833_v59 = vld [vmem:[#allocation3 + $0x20] sm:$0xff] }
 0x640   : > { %v1785_v5 = vmul.f32 1.442695, %v1761_v55  ;;  %v6885_v55 = vld [vmem:[#allocation3 + $0x38] sm:$0xff] }
 0x641   : > { %v1787_v58 = vmul.f32 1.442695, %v1762_v46  ;;  %v1750_v4 = vpop.xlane.xlu0 %1749 }
 0x642   : > { %v1752_v61 = vpop.xlane.xlu1 %1751  ;;  %5704 = vpow2.f32 %v1785_v5  ;;  %v1767_v33 = vsub.f32 %v6770_v15, %v1750_v4 }
 0x643   : > { %5706 = vpow2.f32 %v1791_v26  ;;  %v1768_v12 = vsub.f32 %v6773_v11, %v1752_v61 }
 0x644   : > { %v6819_v45 = vpop.eup %5698  ;;  %5708 = vpow2.f32 %v1787_v58  ;;  %v1797_v10 = vmul.f32 1.442695, %v1767_v33 }
 0x645   : > { %1809 = vadd.xlane.f32.xlu1 %v6819_v45  ;;  %v6823_v43 = vpop.eup %5700  ;;  %v1746_v7 = vpop.xlane.xlu0 %1745  ;;  %v1799_v15 = vmul.f32 1.442695, %v1768_v12 }
 0x646   : > { %v1748_v29 = vpop.xlane.xlu1 %1747  ;;  %v1765_v13 = vsub.f32 %v6778_v62, %v1746_v7 }
 0x647   : > { %v1766_v49 = vsub.f32 %v6781_v18, %v1748_v29 }
 0x648   : > { %v6827_v56 = vpop.eup %5702  ;;  %v1793_v51 = vmul.f32 1.442695, %v1765_v13  ;;  %v2051_v13 = vsel %vm1055_vm3, %v6792_v0, 0 }
 0x649   : > { %1815 = vadd.xlane.f32.xlu1 %v6823_v43  ;;  %v1795_v39 = vmul.f32 1.442695, %v1766_v49  ;;  %v2015_v61 = vpop.permute.xlu0 %2014 }
 0x64b   : > { %5710 = vpow2.f32 %v1795_v39 }
 0x64c   : > { %v6830_v52 = vpop.eup %5704  ;;  %5712 = vpow2.f32 %v1781_v6 }
 0x64d   : > { %1821 = vadd.xlane.f32.xlu1 %v6827_v56  ;;  %v6837_v53 = vpop.eup %5706  ;;  %5714 = vpow2.f32 %v1779_v54 }
 0x64e   : > { %v6840_v18 = vpop.eup %5708  ;;  %5716 = vpow2.f32 %v1797_v10 }
 0x64f   : > { %5718 = vpow2.f32 %v1793_v51 }
 0x650   : > { %5720 = vpow2.f32 %v1799_v15 }
 0x651   : > { %1817 = vadd.xlane.f32.xlu1 %v6830_v52 }
 0x653   : > { %2018 = vrot.lane.b32.xlu0 %v6833_v59, %s6081_s18 }
 0x655   : > { %1823 = vadd.xlane.f32.xlu1 %v6837_v53  ;;  %v6843_v57 = vpop.eup %5710 }
 0x656   : > { %v6855_v20 = vpop.eup %5712 }
 0x657   : > { %v6861_v62 = vpop.eup %5714 }
 0x658   : > { %v6865_v11 = vpop.eup %5716 }
 0x659   : > { %1819 = vadd.xlane.f32.xlu1 %v6840_v18  ;;  %v6869_v9 = vpop.eup %5718 }
 0x65a   : > { %v6875_v8 = vpop.eup %5720 }
 0x65d   : > { %1827 = vadd.xlane.f32.xlu1 %v6843_v57 }
 0x66e   : > { %2020 = vrot.lane.b32.xlu1 %v6850_v63, %s6081_s18 }
 0x672   : > { %1813 = vadd.xlane.f32.xlu0 %v6855_v20  ;;  %1994 = vrot.lane.b32.xlu1 %v6858_v21, %s6082_s19 }
 0x676   : > { %1811 = vadd.xlane.f32.xlu0 %v6861_v62  ;;  %1998 = vrot.lane.b32.xlu1 %v6785_v14, %s6082_s19 }
 0x67a   : > { %2002 = vrot.lane.b32.xlu1 %v6833_v59, %s6082_s19  ;;  %1829 = vadd.xlane.f32.xlu0 %v6865_v11 }
 0x67e   : > { %2006 = vrot.lane.b32.xlu1 %v6871_v42, %s6082_s19  ;;  %1825 = vadd.xlane.f32.xlu0 %v6869_v9 }
 0x682   : > { %2357 = vrot.lane.b32.xlu1 %v6877_v40, %s6083_s27  ;;  %1831 = vadd.xlane.f32.xlu0 %v6875_v8 }
 0x686   : > { %2361 = vrot.lane.b32.xlu1 %v6805_v37, %s6083_s27 }
 0x68a   : > { %2367 = vrot.lane.b32.xlu1 %v6871_v42, %s6083_s27 }
 0x695   : > { %v1806_v60 = vpop.xlane.xlu1 %1805 }
 0x698   : > { %2022 = vrot.lane.b32.xlu0 %v6871_v42, %s6081_s18 }
 0x699   : > { %v1802_v19 = vpop.xlane.xlu1 %1801 }
 0x69c   : > { %2024 = vrot.lane.b32.xlu0 %v6885_v55, %s6081_s18 }
 0x69d   : > { %v1808_v5 = vpop.xlane.xlu1 %1807 }
 0x69e   : > { %5722 = vrcp.f32 %v1808_v5 }
 0x69f   : > { %5724 = vrcp.f32 %v1802_v19 }
 0x6a0   : > { %1996 = vrot.lane.b32.xlu0 %v6877_v40, %s6082_s19  ;;  %5726 = vrcp.f32 %v1806_v60 }
 0x6a1   : > { %v2017_v46 = vpop.permute.xlu1 %2016 }
 0x6a2   : > { %v2060_v0 = vsel %vm1055_vm3, %v2017_v46, 0 }
 0x6a4   : > { %2000 = vrot.lane.b32.xlu0 %v6805_v37, %s6082_s19 }
 0x6a8   : > { %2004 = vrot.lane.b32.xlu0 %v6850_v63, %s6082_s19  ;;  %v5723_v29 = vpop.eup %5722 }
 0x6a9   : > { %v5725_v49 = vpop.eup %5724  ;;  %v1852_v4 = vmul.f32 %v5723_v29, %v6802_v35 }
 0x6aa   : > { %v5727_v39 = vpop.eup %5726  ;;  %v1849_v6 = vmul.f32 %v5725_v49, %v6799_v48  ;;  %v2054_v48 = vsel %vm1055_vm3, %v6809_v2, 0 }
 0x6ab   : > { %v1851_v54 = vmul.f32 %v5727_v39, %v6796_v1 }
 0x6ac   : > { %2008 = vrot.lane.b32.xlu0 %v6885_v55, %s6082_s19  ;;  %s8392_s19 = scalar_lea.vmem %s8282_s5, %s6277_s22 }
 0x6ad   : > { %v1866_v10 = vpack.c.bf16 %v1852_v4, %v1851_v54 }
 0x6b0   : > { %2355 = vrot.lane.b32.xlu0 %v6858_v21, %s6083_s27 }
 0x6b4   : > { %2359 = vrot.lane.b32.xlu0 %v6785_v14, %s6083_s27 }
 0x6b8   : > { %2363 = vrot.lane.b32.xlu0 %v6833_v59, %s6083_s27 }
 0x6bc   : > { %2365 = vrot.lane.b32.xlu0 %v6850_v63, %s6083_s27 }
 0x6c0   : > { %2369 = vrot.lane.b32.xlu0 %v6885_v55, %s6083_s27 }
 0x6ca   : > { %v1804_v26 = vpop.xlane.xlu0 %1803 }
 0x6cb   : > { %5728 = vrcp.f32 %v1804_v26 }
 0x6ce   : > { %v2019_v15 = vpop.permute.xlu0 %2018 }
 0x6d2   : > { %v1810_v58 = vpop.xlane.xlu1 %1809 }
 0x6d3   : > { %5730 = vrcp.f32 %v1810_v58 }
 0x6d5   : > { %v5729_v3 = vpop.eup %5728 }
 0x6d6   : > { %v1850_v50 = vmul.f32 %v5729_v3, %v6814_v47  ;;  %v1816_v33 = vpop.xlane.xlu1 %1815  ;;  %v2057_v47 = vsel %vm1055_vm3, %v2015_v61, 0 }
 0x6d7   : > { %5732 = vrcp.f32 %v1816_v33 }
 0x6d8   : > { %v1865_v7 = vpack.c.bf16 %v1850_v50, %v1849_v6 }
 0x6da   : > { %5139 = vmatprep.mubr.bf16.mxu1 %v1865_v7  ;;  %v1822_v12 = vpop.xlane.xlu1 %1821 }
 0x6db   : > { %5140 = vmatmul.mubr.bf16.vlgmr.msra.gmra.mrb[16].mxu1 %v1866_v10 }
 0x6dc   : > { %5156 = vmatpush3.bf16.xpose.msra.mxu1 %v2051_v13 }
 0x6dd   : > { %5394 = vmatprep.subr.msk.bf16.mxu1 %vm1055_vm3, %v6809_v2  ;;  %v2063_v2 = vsel %vm1055_vm3, %v2019_v15, 0  ;;  %v5731_v29 = vpop.eup %5730 }
 0x6de   : > { %v1818_v35 = vpop.xlane.xlu1 %1817  ;;  %v1853_v33 = vmul.f32 %v5731_v29, %v6819_v45 }
 0x6e1   : > { %v5733_v49 = vpop.eup %5732 }
 0x6e2   : > { %v1824_v1 = vpop.xlane.xlu1 %1823  ;;  %v1856_v13 = vmul.f32 %v5733_v49, %v6823_v43 }
 0x6e4   : > { %5158 = vmatpush3.bf16.xpose.msra.mxu1 %v2054_v48 }
 0x6e5   : > { %5395 = vmatprep.subr.msk.bf16.mxu1 %vm1055_vm3, %v2015_v61 }
 0x6e6   : > { %v1820_v51 = vpop.xlane.xlu1 %1819 }
 0x6ea   : > { %v1828_v60 = vpop.xlane.xlu1 %1827 }
 0x6ec   : > { %5160 = vmatpush3.bf16.xpose.msra.mxu1 %v2057_v47 }
 0x6ed   : > { %5396 = vmatprep.subr.msk.bf16.mxu1 %vm1055_vm3, %v2017_v46 }
 0x6ee   : > { %v2021_v19 = vpop.permute.xlu1 %2020 }
 0x6ef   : > { %v2066_v61 = vsel %vm1055_vm3, %v2021_v19, 0 }
 0x6f4   : > { %5162 = vmatpush3.bf16.xpose.msra.mxu1 %v2060_v0 }
 0x6f5   : > { %5397 = vmatprep.subr.msk.bf16.mxu1 %vm1055_vm3, %v2019_v15 }
 0x6fc   : > { %5164 = vmatpush3.bf16.xpose.msra.mxu1 %v2063_v2 }
 0x6fd   : > { %5398 = vmatprep.subr.msk.bf16.mxu1 %vm1055_vm3, %v2021_v19 }
 0x6ff   : > { %v1814_v5 = vpop.xlane.xlu0 %1813 }
 0x700   : > { %5734 = vrcp.f32 %v1814_v5 }
 0x701   : > { %5736 = vrcp.f32 %v1820_v51 }
 0x702   : > { %5738 = vrcp.f32 %v1818_v35 }
 0x703   : > { %v1812_v26 = vpop.xlane.xlu0 %1811 }
 0x704   : > { %5166 = vmatpush3.bf16.xpose.msra.mxu1 %v2066_v61  ;;  %5740 = vrcp.f32 %v1812_v26 }
 0x705   : > { %5742 = vrcp.f32 %v1824_v1 }
 0x706   : > { %5744 = vrcp.f32 %v1822_v12 }
 0x707   : > { %v1830_v46 = vpop.xlane.xlu0 %1829  ;;  %5746 = vrcp.f32 %v1828_v60 }
 0x70a   : > { %v5735_v39 = vpop.eup %5734 }
 0x70b   : > { %v1826_v3 = vpop.xlane.xlu0 %1825  ;;  %v5737_v4 = vpop.eup %5736  ;;  %v1855_v50 = vmul.f32 %v5735_v39, %v6855_v20 }
 0x70c   : > { %5748 = vrcp.f32 %v1826_v3  ;;  %v5739_v58 = vpop.eup %5738  ;;  %v1858_v10 = vmul.f32 %v5737_v4, %v6840_v18  ;;  %v1995_v18 = vpop.permute.xlu1 %1994 }
 0x70d   : > { %v1857_v48 = vmul.f32 %v5739_v58, %v6830_v52  ;;  %v1868_v35 = vpack.c.bf16 %v1856_v13, %v1855_v50 }
 0x70e   : > { %v5741_v6 = vpop.eup %5740 }
 0x70f   : > { %v1832_v54 = vpop.xlane.xlu0 %1831  ;;  %v1854_v7 = vmul.f32 %v5741_v6, %v6861_v62  ;;  %v5743_v1 = vpop.eup %5742  ;;  %v1869_v51 = vpack.c.bf16 %v1858_v10, %v1857_v48 }
 0x710   : > { %5750 = vrcp.f32 %v1832_v54  ;;  %v5745_v20 = vpop.eup %5744  ;;  %v1860_v0 = vmul.f32 %v5743_v1, %v6837_v53  ;;  %v1999_v61 = vpop.permute.xlu1 %1998 }
 0x711   : > { %v1867_v12 = vpack.c.bf16 %v1854_v7, %v1853_v33  ;;  %5752 = vrcp.f32 %v1830_v46  ;;  %v5747_v62 = vpop.eup %5746  ;;  %v1859_v60 = vmul.f32 %v5745_v20, %v6827_v56 }
 0x712   : > { %v1862_v2 = vmul.f32 %v5747_v62, %v6843_v57 }
 0x713   : > { %5143 = vmatprep.mubr.bf16.mxu1 %v1867_v12  ;;  %v2023_v47 = vpop.permute.xlu0 %2022  ;;  %v1870_v19 = vpack.c.bf16 %v1860_v0, %v1859_v60 }
 0x714   : > { %5144 = vmatmul.mubr.bf16.gmra.mrb[20].mxu1 %v1868_v35  ;;  %5399 = vmatprep.subr.msk.bf16.mxu1 %vm1055_vm3, %v2023_v47  ;;  %v2069_v45 = vsel %vm1055_vm3, %v2023_v47, 0  ;;  %v2003_v3 = vpop.permute.xlu1 %2002 }
 0x715   : > { %5147 = vmatprep.mubr.bf16.mxu1 %v1869_v51  ;;  %5168 = vmatpush3.bf16.xpose.msra.mxu1 %v2069_v45 }
 0x716   : > { %v5749_v43 = vpop.eup %5748 }
 0x717   : > { %v2025_v52 = vpop.permute.xlu0 %2024  ;;  %v1861_v15 = vmul.f32 %v5749_v43, %v6869_v9 }
 0x718   : > { %5400 = vmatprep.subr.msk.bf16.mxu1 %vm1055_vm3, %v2025_v52  ;;  %v2072_v29 = vsel %vm1055_vm3, %v2025_v52, 0  ;;  %v2007_v57 = vpop.permute.xlu1 %2006 }
 0x719   : > { %v1871_v46 = vpack.c.bf16 %v1862_v2, %v1861_v15 }
 0x71a   : > { %v5751_v5 = vpop.eup %5750 }
 0x71b   : > { %v1997_v26 = vpop.permute.xlu0 %1996  ;;  %v5753_v49 = vpop.eup %5752  ;;  %v1864_v53 = vmul.f32 %v5751_v5, %v6875_v8 }
 0x71c   : > { %5148 = vmatmul.mubr.bf16.gmra.mrb[24].mxu1 %v1870_v19  ;;  %v1863_v39 = vmul.f32 %v5753_v49, %v6865_v11  ;;  %v2358_v50 = vpop.permute.xlu1 %2357 }
 0x71d   : > { %5151 = vmatprep.mubr.bf16.mxu1 %v1871_v46  ;;  %5170 = vmatpush3.bf16.xpose.msra.mxu1 %v2072_v29 }
 0x71e   : > { %v1872_v56 = vpack.c.bf16 %v1864_v53, %v1863_v39 }
 0x71f   : > { %v2001_v9 = vpop.permute.xlu0 %2000 }
 0x720   : > { %v2362_v11 = vpop.permute.xlu1 %2361 }
 0x723   : > { %v2005_v4 = vpop.permute.xlu0 %2004 }
 0x724   : > { %5152 = vmatmul.mubr.bf16.gmra.mrb[28].mxu1 %v1872_v56  ;;  %v2368_v7 = vpop.permute.xlu1 %2367 }
 0x725   : > { %5171 = vmatprep.mubr.msk.bf16.mxu1 %vm1055_vm3, %v1995_v18 }
 0x727   : > { %v2009_v58 = vpop.permute.xlu0 %2008 }
 0x72b   : > { %v2356_v6 = vpop.permute.xlu0 %2355 }
 0x72c   : > { %5172 = vmatmul.mubr.msk.bf16.vlgmr.msra.gmra.mrb[32].mxu1 %vm1055_vm3, %v1997_v26  ;;  %5187 = vmatprep.subr.bf16.mxu0 %v2356_v6 }
 0x72d   : > { %5175 = vmatprep.mubr.msk.bf16.mxu1 %vm1055_vm3, %v1999_v61  ;;  %5188 = vmatpush3.bf16.msra.mxu0 %v2356_v6 }
 0x72e   : > { %5189 = vmatprep.subr.bf16.mxu0 %v2358_v50 }
 0x72f   : > { %v2360_v8 = vpop.permute.xlu0 %2359 }
 0x731   : > { %5190 = vmatpush3.bf16.msra.mxu0 %v2358_v50 }
 0x732   : > { %5191 = vmatprep.subr.bf16.mxu0 %v2360_v8 }
 0x733   : > { %v2364_v54 = vpop.permute.xlu0 %2363 }
 0x734   : > { %5176 = vmatmul.mubr.msk.bf16.gmra.mrb[36].mxu1 %vm1055_vm3, %v2001_v9 }
 0x735   : > { %5179 = vmatprep.mubr.msk.bf16.mxu1 %vm1055_vm3, %v2003_v3  ;;  %5192 = vmatpush3.bf16.msra.mxu0 %v2360_v8 }
 0x736   : > { %5193 = vmatprep.subr.bf16.mxu0 %v2362_v11 }
 0x737   : > { %v2366_v33 = vpop.permute.xlu0 %2365 }
 0x739   : > { %5194 = vmatpush3.bf16.msra.mxu0 %v2362_v11 }
 0x73a   : > { %5195 = vmatprep.subr.bf16.mxu0 %v2364_v54 }
 0x73b   : > { %v2370_v10 = vpop.permute.xlu0 %2369 }
 0x73c   : > { %5180 = vmatmul.mubr.msk.bf16.gmra.mrb[40].mxu1 %vm1055_vm3, %v2005_v4  ;;  %v6989_v4 = vld [vmem:[%s8344_s24] ss:$0 sm:$0xff]  ;;  %s6088_s24 = smov 16  }
 0x73d   : > { %5183 = vmatprep.mubr.msk.bf16.mxu1 %vm1055_vm3, %v2007_v57  ;;  %5196 = vmatpush3.bf16.msra.mxu0 %v2364_v54 }
 0x73e   : > { %5197 = vmatprep.subr.bf16.mxu0 %v2366_v33 }
 0x741   : > { %5198 = vmatpush3.bf16.msra.mxu0 %v2366_v33 }
 0x742   : > { %5199 = vmatprep.subr.bf16.mxu0 %v2368_v7 }
 0x744   : > { %5184 = vmatmul.mubr.msk.bf16.gmra.mrb[44].mxu1 %vm1055_vm3, %v2009_v58 }
 0x745   : > { %5200 = vmatpush3.bf16.msra.mxu0 %v2368_v7 }
 0x746   : > { %5201 = vmatprep.subr.bf16.mxu0 %v2370_v10 }
 0x749   : > { %5202 = vmatpush3.bf16.msra.mxu0 %v2370_v10 }
 0x7ae   : > { %v6940_v13 = vpop.f32.mrb[16].mxu1 }
 0x7af   : > { %v6942_v12 = vpop.f32.mrb[17].mxu1 }
 0x7b0   : > { %v6944_v48 = vpop.f32.mrb[18].mxu1 }
 0x7b1   : > { %v6948_v1 = vpop.f32.mrb[19].mxu1 }
 0x7e7   : > { %v6952_v51 = vpop.f32.mrb[20].mxu1 }
 0x7e8   : > { %v6954_v20 = vpop.f32.mrb[21].mxu1 }
 0x7e9   : > { %v6956_v45 = vpop.f32.mrb[22].mxu1 }
 0x7ea   : > { %v6960_v18 = vpop.f32.mrb[23].mxu1 }
 0x7ef   : > { %v6964_v0 = vpop.f32.mrb[24].mxu1 }
 0x7f0   : > { %v6966_v52 = vpop.f32.mrb[25].mxu1 }
 0x7f1   : > { %v6968_v15 = vpop.f32.mrb[26].mxu1 }
 0x7f2   : > { %v6972_v2 = vpop.f32.mrb[27].mxu1 }
 0x7f7   : > { %v6976_v5 = vpop.f32.mrb[28].mxu1 }
 0x7f8   : > { %v6978_v61 = vpop.f32.mrb[29].mxu1 }
 0x7f9   : > { %v6980_v26 = vpop.f32.mrb[30].mxu1 }
 0x7fa   : > { %v6984_v29 = vpop.f32.mrb[31].mxu1 }
 0x7ff   : > { %v5173_v53 = vpop.f32.mrb[32].mxu1 }
 0x800   : > { %v2173_v9 = vmul.f32 0.35355338, %v5173_v53  ;;  %v2108_v39 = vpop.f32.mrb[33].mxu1 }
 0x801   : > { %v2171_v3 = vmul.f32 0.35355338, %v2108_v39  ;;  %v5174_v56 = vpop.f32.mrb[34].mxu1 }
 0x802   : > { %v6992_v57 = vadd.f32 %v6989_v4, %v2173_v9  ;;  %v2111_v58 = vpop.f32.mrb[35].mxu1  ;;  %v2174_v50 = vmul.f32 0.35355338, %v5174_v56 }
 0x803   : > { %v6995_v6 = vadd.f32 %v6989_v4, %v2171_v3  ;;  %v2172_v46 = vmul.f32 0.35355338, %v2111_v58 }
 0x804   : > { %2207 = vmax.xlane.f32.xlu0 %v6992_v57  ;;  %v7000_v8 = vadd.f32 %v6989_v4, %v2174_v50 }
 0x805   : > { %2203 = vmax.xlane.f32.xlu1 %v6995_v6  ;;  %v7008_v60 = vadd.f32 %v6989_v4, %v2172_v46 }
 0x807   : > { %v5177_v11 = vpop.f32.mrb[36].mxu1 }
 0x808   : > { %v2124_v54 = vpop.f32.mrb[37].mxu1  ;;  %v2177_v62 = vmul.f32 0.35355338, %v5177_v11 }
 0x809   : > { %2209 = vmax.xlane.f32.xlu1 %v7000_v8  ;;  %v5178_v33 = vpop.f32.mrb[38].mxu1  ;;  %v2175_v43 = vmul.f32 0.35355338, %v2124_v54 }
 0x80a   : > { %v2127_v7 = vpop.f32.mrb[39].mxu1  ;;  %v2178_v47 = vmul.f32 0.35355338, %v5178_v33  ;;  %v7012_v19 = vadd.f32 %v6989_v4, %v2177_v62 }
 0x80b   : > { %v2176_v17 = vmul.f32 0.35355338, %v2127_v7  ;;  %v2191_v58 = vadd.f32 %v6989_v4, %v2175_v43 }
 0x80c   : > { %v7015_v35 = vadd.f32 %v6989_v4, %v2178_v47 }
 0x80d   : > { %v7021_v11 = vadd.f32 %v6989_v4, %v2176_v17 }
 0x80f   : > { %v5181_v10 = vpop.f32.mrb[40].mxu1 }
 0x810   : > { %v2140_v53 = vpop.f32.mrb[41].mxu1  ;;  %v2181_v46 = vmul.f32 0.35355338, %v5181_v10 }
 0x811   : > { %v5182_v9 = vpop.f32.mrb[42].mxu1  ;;  %v2179_v47 = vmul.f32 0.35355338, %v2140_v53 }
 0x812   : > { %v2143_v39 = vpop.f32.mrb[43].mxu1  ;;  %v2182_v33 = vmul.f32 0.35355338, %v5182_v9  ;;  %v7025_v62 = vadd.f32 %v6989_v4, %v2181_v46 }
 0x813   : > { %v2180_v7 = vmul.f32 0.35355338, %v2143_v39  ;;  %v7033_v43 = vadd.f32 %v6989_v4, %v2179_v47 }
 0x814   : > { %v7028_v54 = vadd.f32 %v6989_v4, %v2182_v33 }
 0x815   : > { %v7036_v10 = vadd.f32 %v6989_v4, %v2180_v7 }
 0x817   : > { %v5185_v3 = vpop.f32.mrb[44].mxu1 }
 0x818   : > { %v2156_v49 = vpop.f32.mrb[45].mxu1  ;;  %v2185_v17 = vmul.f32 0.35355338, %v5185_v3 }
 0x819   : > { %v5186_v56 = vpop.f32.mrb[46].mxu1  ;;  %v2183_v39 = vmul.f32 0.35355338, %v2156_v49 }
 0x81a   : > { %2494 = vrot.lane.b32.xlu0 %v6877_v40, %s6084_s26  ;;  %2492 = vrot.lane.b32.xlu1 %v6858_v21, %s6084_s26  ;;  %v2159_v50 = vpop.f32.mrb[47].mxu1  ;;  %v2186_v9 = vmul.f32 0.35355338, %v5186_v56  ;;  %v7041_v53 = vadd.f32 %v6989_v4, %v2185_v17 }
 0x81b   : > { %v2184_v33 = vmul.f32 0.35355338, %v2159_v50  ;;  %v7049_v3 = vadd.f32 %v6989_v4, %v2183_v39 }
 0x81c   : > { %v7044_v46 = vadd.f32 %v6989_v4, %v2186_v9 }
 0x81d   : > { %v7052_v56 = vadd.f32 %v6989_v4, %v2184_v33 }
 0x839   : > { %2205 = vmax.xlane.f32.xlu0 %v7008_v60 }
 0x83d   : > { %2215 = vmax.xlane.f32.xlu0 %v7012_v19 }
 0x83e   : > { %2217 = vmax.xlane.f32.xlu1 %v7015_v35 }
 0x841   : > { %2211 = vmax.xlane.f32.xlu0 %v2191_v58 }
 0x842   : > { %2213 = vmax.xlane.f32.xlu1 %v7021_v11 }
 0x845   : > { %2223 = vmax.xlane.f32.xlu0 %v7025_v62 }
 0x846   : > { %2225 = vmax.xlane.f32.xlu1 %v7028_v54 }
 0x849   : > { %2219 = vmax.xlane.f32.xlu0 %v7033_v43 }
 0x84a   : > { %2221 = vmax.xlane.f32.xlu1 %v7036_v10 }
 0x84d   : > { %2231 = vmax.xlane.f32.xlu0 %v7041_v53 }
 0x84e   : > { %2233 = vmax.xlane.f32.xlu1 %v7044_v46 }
 0x851   : > { %2227 = vmax.xlane.f32.xlu0 %v7049_v3 }
 0x852   : > { %2229 = vmax.xlane.f32.xlu1 %v7052_v56 }
 0x867   : > { %2496 = vrot.lane.b32.xlu0 %v6785_v14, %s6084_s26 }
 0x891   : > { %v2208_v49 = vpop.xlane.xlu0 %2207 }
 0x892   : > { %v2237_v50 = vsub.f32 %v6992_v57, %v2208_v49  ;;  %v2204_v47 = vpop.xlane.xlu1 %2203 }
 0x893   : > { %v2235_v7 = vsub.f32 %v6995_v6, %v2204_v47 }
 0x894   : > { %v2255_v17 = vmul.f32 1.442695, %v2237_v50 }
 0x895   : > { %v2251_v9 = vmul.f32 1.442695, %v2235_v7 }
 0x896   : > { %5754 = vpow2.f32 %v2255_v17  ;;  %v2210_v39 = vpop.xlane.xlu1 %2209 }
 0x897   : > { %v2238_v33 = vsub.f32 %v7000_v8, %v2210_v39  ;;  %5756 = vpow2.f32 %v2251_v9  ;;  %v7076_v8 = vpop.permute.xlu0 %2494 }
 0x899   : > { %v2257_v16 = vmul.f32 1.442695, %v2238_v33 }
 0x89a   : > { %v7061_v41 = vpop.permute.xlu1 %2492 }
 0x89b   : > { %5401 = vmatprep.subr.msk.bf16.mxu0 %vm1055_vm3, %v7061_v41  ;;  %5758 = vpow2.f32 %v2257_v16 }
 0x8a0   : > { %v7065_v44 = vpop.eup %5754 }
 0x8a1   : > { %2287 = vadd.xlane.f32.xlu1 %v7065_v44  ;;  %v7068_v57 = vpop.eup %5756 }
 0x8a5   : > { %2283 = vadd.xlane.f32.xlu1 %v7068_v57  ;;  %v7071_v6 = vpop.eup %5758 }
 0x8a9   : > { %2289 = vadd.xlane.f32.xlu1 %v7071_v6 }
 0x8ba   : > { %2498 = vrot.lane.b32.xlu1 %v6805_v37, %s6084_s26 }
 0x8c6   : > { %v2206_v49 = vpop.xlane.xlu0 %2205 }
 0x8c7   : > { %v2236_v16 = vsub.f32 %v7008_v60, %v2206_v49 }
 0x8c9   : > { %v2253_v50 = vmul.f32 1.442695, %v2236_v16 }
 0x8ca   : > { %v2216_v47 = vpop.xlane.xlu0 %2215 }
 0x8cb   : > { %5760 = vpow2.f32 %v2253_v50  ;;  %v2218_v7 = vpop.xlane.xlu1 %2217 }
 0x8cc   : > { %v2242_v9 = vsub.f32 %v7015_v35, %v2218_v7 }
 0x8ce   : > { %v2212_v17 = vpop.xlane.xlu0 %2211  ;;  %v2265_v34 = vmul.f32 1.442695, %v2242_v9 }
 0x8cf   : > { %v2239_v39 = vsub.f32 %v2191_v58, %v2212_v17  ;;  %v2214_v33 = vpop.xlane.xlu1 %2213 }
 0x8d1   : > { %v2259_v32 = vmul.f32 1.442695, %v2239_v39 }
 0x8d2   : > { %v2224_v36 = vpop.xlane.xlu0 %2223 }
 0x8d3   : > { %5762 = vpow2.f32 %v2259_v32  ;;  %v2245_v38 = vsub.f32 %v7025_v62, %v2224_v36  ;;  %v2226_v30 = vpop.xlane.xlu1 %2225 }
 0x8d4   : > { %5764 = vpow2.f32 %v2265_v34  ;;  %v2246_v35 = vsub.f32 %v7028_v54, %v2226_v30 }
 0x8d5   : > { %v7081_v31 = vpop.eup %5760  ;;  %v2271_v49 = vmul.f32 1.442695, %v2245_v38 }
 0x8d6   : > { %2285 = vadd.xlane.f32.xlu0 %v7081_v31  ;;  %v2220_v60 = vpop.xlane.xlu0 %2219  ;;  %v2273_v32 = vmul.f32 1.442695, %v2246_v35 }
 0x8d7   : > { %v2243_v16 = vsub.f32 %v7033_v43, %v2220_v60  ;;  %v2222_v50 = vpop.xlane.xlu1 %2221  ;;  %5766 = vpow2.f32 %v2271_v49  ;;  %v2241_v60 = vsub.f32 %v7012_v19, %v2216_v47 }
 0x8d8   : > { %v2244_v36 = vsub.f32 %v7036_v10, %v2222_v50  ;;  %v2240_v50 = vsub.f32 %v7021_v11, %v2214_v33 }
 0x8d9   : > { %v2267_v58 = vmul.f32 1.442695, %v2243_v16  ;;  %v2263_v16 = vmul.f32 1.442695, %v2241_v60 }
 0x8da   : > { %v2269_v34 = vmul.f32 1.442695, %v2244_v36  ;;  %v2232_v49 = vpop.xlane.xlu0 %2231  ;;  %v2261_v35 = vmul.f32 1.442695, %v2240_v50 }
 0x8db   : > { %v2234_v7 = vpop.xlane.xlu1 %2233  ;;  %5768 = vpow2.f32 %v2267_v58  ;;  %v2249_v58 = vsub.f32 %v7041_v53, %v2232_v49 }
 0x8dc   : > { %5770 = vpow2.f32 %v2273_v32 }
 0x8dd   : > { %v7086_v17 = vpop.eup %5762  ;;  %5772 = vpow2.f32 %v2269_v34  ;;  %v2279_v36 = vmul.f32 1.442695, %v2249_v58  ;;  %v2250_v34 = vsub.f32 %v7044_v46, %v2234_v7 }
 0x8de   : > { %2291 = vadd.xlane.f32.xlu1 %v7086_v17  ;;  %v7090_v9 = vpop.eup %5764  ;;  %v2228_v32 = vpop.xlane.xlu0 %2227 }
 0x8df   : > { %v2230_v62 = vpop.xlane.xlu1 %2229  ;;  %v2281_v11 = vmul.f32 1.442695, %v2250_v34 }
 0x8e0   : > { %v2248_v38 = vsub.f32 %v7052_v56, %v2230_v62  ;;  %v2247_v62 = vsub.f32 %v7049_v3, %v2228_v32 }
 0x8e1   : > { %v7094_v30 = vpop.eup %5766 }
 0x8e2   : > { %2297 = vadd.xlane.f32.xlu1 %v7090_v9  ;;  %v2277_v54 = vmul.f32 1.442695, %v2248_v38  ;;  %v2275_v19 = vmul.f32 1.442695, %v2247_v62  ;;  %v2497_v38 = vpop.permute.xlu0 %2496 }
 0x8e4   : > { %5774 = vpow2.f32 %v2277_v54 }
 0x8e5   : > { %v7097_v43 = vpop.eup %5768  ;;  %5776 = vpow2.f32 %v2263_v16 }
 0x8e6   : > { %2303 = vadd.xlane.f32.xlu1 %v7094_v30  ;;  %v7102_v10 = vpop.eup %5770  ;;  %5778 = vpow2.f32 %v2261_v35 }
 0x8e7   : > { %v7105_v39 = vpop.eup %5772  ;;  %5780 = vpow2.f32 %v2279_v36  ;;  %v2533_v36 = vsel %vm1055_vm3, %v7061_v41, 0 }
 0x8e8   : > { %5782 = vpow2.f32 %v2275_v19 }
 0x8e9   : > { %5784 = vpow2.f32 %v2281_v11 }
 0x8ea   : > { %2299 = vadd.xlane.f32.xlu1 %v7097_v43 }
 0x8ec   : > { %2500 = vrot.lane.b32.xlu0 %v6833_v59, %s6084_s26 }
 0x8ee   : > { %2305 = vadd.xlane.f32.xlu1 %v7102_v10  ;;  %v7108_v56 = vpop.eup %5774 }
 0x8ef   : > { %v7118_v47 = vpop.eup %5776 }
 0x8f0   : > { %v7122_v53 = vpop.eup %5778 }
 0x8f1   : > { %v7126_v3 = vpop.eup %5780 }
 0x8f2   : > { %2301 = vadd.xlane.f32.xlu1 %v7105_v39  ;;  %v7130_v46 = vpop.eup %5782 }
 0x8f3   : > { %v7134_v33 = vpop.eup %5784 }
 0x8f6   : > { %2309 = vadd.xlane.f32.xlu1 %v7108_v56 }
 0x907   : > { %2502 = vrot.lane.b32.xlu1 %v6850_v63, %s6084_s26 }
 0x90b   : > { %2295 = vadd.xlane.f32.xlu0 %v7118_v47  ;;  %2476 = vrot.lane.b32.xlu1 %v6858_v21, %s6085_s15 }
 0x90f   : > { %2293 = vadd.xlane.f32.xlu0 %v7122_v53  ;;  %2480 = vrot.lane.b32.xlu1 %v6785_v14, %s6085_s15 }
 0x913   : > { %2484 = vrot.lane.b32.xlu1 %v6833_v59, %s6085_s15  ;;  %2311 = vadd.xlane.f32.xlu0 %v7126_v3 }
 0x917   : > { %2488 = vrot.lane.b32.xlu1 %v6871_v42, %s6085_s15  ;;  %2307 = vadd.xlane.f32.xlu0 %v7130_v46 }
 0x91b   : > { %2839 = vrot.lane.b32.xlu1 %v6877_v40, %s6086_s17  ;;  %2313 = vadd.xlane.f32.xlu0 %v7134_v33 }
 0x92e   : > { %v2288_v14 = vpop.xlane.xlu1 %2287 }
 0x931   : > { %2504 = vrot.lane.b32.xlu0 %v6871_v42, %s6084_s26 }
 0x932   : > { %v2284_v59 = vpop.xlane.xlu1 %2283 }
 0x935   : > { %2506 = vrot.lane.b32.xlu0 %v6885_v55, %s6084_s26  ;;  %s8393_s26 = scalar_lea.vmem %s8283_s6, %s6277_s22 }
 0x936   : > { %v2290_v7 = vpop.xlane.xlu1 %2289 }
 0x937   : > { %5786 = vrcp.f32 %v2290_v7 }
 0x938   : > { %5788 = vrcp.f32 %v2284_v59 }
 0x939   : > { %2478 = vrot.lane.b32.xlu0 %v6877_v40, %s6085_s15  ;;  %5790 = vrcp.f32 %v2288_v14 }
 0x93a   : > { %v2499_v54 = vpop.permute.xlu1 %2498 }
 0x93b   : > { %v2542_v41 = vsel %vm1055_vm3, %v2499_v54, 0 }
 0x93d   : > { %2482 = vrot.lane.b32.xlu0 %v6805_v37, %s6085_s15 }
 0x941   : > { %2486 = vrot.lane.b32.xlu0 %v6850_v63, %s6085_s15  ;;  %v5787_v40 = vpop.eup %5786 }
 0x942   : > { %v5789_v37 = vpop.eup %5788 }
 0x943   : > { %v5791_v49 = vpop.eup %5790  ;;  %v2331_v16 = vmul.f32 %v5789_v37, %v7068_v57  ;;  %v2536_v57 = vsel %vm1055_vm3, %v7076_v8, 0 }
 0x944   : > { %v2333_v50 = vmul.f32 %v5791_v49, %v7065_v44  ;;  %v2539_v44 = vsel %vm1055_vm3, %v2497_v38, 0 }
 0x945   : > { %2490 = vrot.lane.b32.xlu0 %v6885_v55, %s6085_s15  ;;  %v2334_v55 = vmul.f32 %v5787_v40, %v7071_v6  ;;  %s8397_s15 = sld [smem:[#allocation43_spill]] (!%p4819_p2) }
 0x947   : > { %v2348_v32 = vpack.c.bf16 %v2334_v55, %v2333_v50 }
 0x949   : > { %2837 = vrot.lane.b32.xlu0 %v6858_v21, %s6086_s17 }
 0x963   : > { %v2286_v42 = vpop.xlane.xlu0 %2285 }
 0x964   : > { %5792 = vrcp.f32 %v2286_v42 }
 0x967   : > { %v2501_v19 = vpop.permute.xlu0 %2500 }
 0x96b   : > { %v2292_v60 = vpop.xlane.xlu1 %2291 }
 0x96c   : > { %5794 = vrcp.f32 %v2292_v60 }
 0x96e   : > { %v5793_v63 = vpop.eup %5792 }
 0x96f   : > { %v2332_v21 = vmul.f32 %v5793_v63, %v7081_v31  ;;  %v2298_v35 = vpop.xlane.xlu1 %2297 }
 0x970   : > { %5796 = vrcp.f32 %v2298_v35 }
 0x971   : > { %v2347_v58 = vpack.c.bf16 %v2332_v21, %v2331_v16 }
 0x973   : > { %5203 = vmatprep.mubr.bf16.mxu0 %v2347_v58  ;;  %v2304_v62 = vpop.xlane.xlu1 %2303 }
 0x974   : > { %5204 = vmatmul.mubr.bf16.vlgmr.msra.gmra.mrb[48].mxu0 %v2348_v32 }
 0x975   : > { %5220 = vmatpush3.bf16.xpose.msra.mxu0 %v2533_v36 }
 0x976   : > { %5402 = vmatprep.subr.msk.bf16.mxu0 %vm1055_vm3, %v7076_v8  ;;  %v2545_v8 = vsel %vm1055_vm3, %v2501_v19, 0 }
 0x977   : > { %v2300_v6 = vpop.xlane.xlu1 %2299 }
 0x97b   : > { %v2306_v31 = vpop.xlane.xlu1 %2305 }
 0x97d   : > { %5222 = vmatpush3.bf16.xpose.msra.mxu0 %v2536_v57 }
 0x97e   : > { %5403 = vmatprep.subr.msk.bf16.mxu0 %vm1055_vm3, %v2497_v38 }
 0x97f   : > { %v2302_v34 = vpop.xlane.xlu1 %2301 }
 0x983   : > { %v2310_v11 = vpop.xlane.xlu1 %2309 }
 0x985   : > { %5224 = vmatpush3.bf16.xpose.msra.mxu0 %v2539_v44 }
 0x986   : > { %5404 = vmatprep.subr.msk.bf16.mxu0 %vm1055_vm3, %v2499_v54  ;;  %v5795_v54 = vpop.eup %5794 }
 0x987   : > { %v2503_v14 = vpop.permute.xlu1 %2502  ;;  %v5797_v40 = vpop.eup %5796  ;;  %v2335_v50 = vmul.f32 %v5795_v54, %v7086_v17 }
 0x988   : > { %v2548_v7 = vsel %vm1055_vm3, %v2503_v14, 0  ;;  %v2338_v32 = vmul.f32 %v5797_v40, %v7090_v9 }
 0x98d   : > { %5226 = vmatpush3.bf16.xpose.msra.mxu0 %v2542_v41 }
 0x98e   : > { %5405 = vmatprep.subr.msk.bf16.mxu0 %vm1055_vm3, %v2501_v19 }
 0x995   : > { %5228 = vmatpush3.bf16.xpose.msra.mxu0 %v2545_v8 }
 0x996   : > { %5406 = vmatprep.subr.msk.bf16.mxu0 %vm1055_vm3, %v2503_v14 }
 0x998   : > { %v2296_v59 = vpop.xlane.xlu0 %2295 }
 0x999   : > { %5798 = vrcp.f32 %v2296_v59 }
 0x99a   : > { %5800 = vrcp.f32 %v2302_v34 }
 0x99b   : > { %5802 = vrcp.f32 %v2300_v6 }
 0x99c   : > { %v2294_v38 = vpop.xlane.xlu0 %2293 }
 0x99d   : > { %5230 = vmatpush3.bf16.xpose.msra.mxu0 %v2548_v7  ;;  %5804 = vrcp.f32 %v2294_v38 }
 0x99e   : > { %5806 = vrcp.f32 %v2306_v31 }
 0x99f   : > { %5808 = vrcp.f32 %v2304_v62 }
 0x9a0   : > { %v2312_v42 = vpop.xlane.xlu0 %2311  ;;  %5810 = vrcp.f32 %v2310_v11 }
 0x9a3   : > { %v5799_v37 = vpop.eup %5798 }
 0x9a4   : > { %v2308_v49 = vpop.xlane.xlu0 %2307  ;;  %v5801_v63 = vpop.eup %5800  ;;  %v2337_v16 = vmul.f32 %v5799_v37, %v7118_v47 }
 0x9a5   : > { %5812 = vrcp.f32 %v2308_v49  ;;  %v5803_v60 = vpop.eup %5802  ;;  %v2340_v58 = vmul.f32 %v5801_v63, %v7105_v39  ;;  %v2477_v39 = vpop.permute.xlu1 %2476 }
 0x9a6   : > { %v2339_v62 = vmul.f32 %v5803_v60, %v7097_v43  ;;  %v2350_v57 = vpack.c.bf16 %v2338_v32, %v2337_v16 }
 0x9a7   : > { %v5805_v55 = vpop.eup %5804 }
 0x9a8   : > { %v2314_v21 = vpop.xlane.xlu0 %2313  ;;  %v2336_v35 = vmul.f32 %v5805_v55, %v7122_v53  ;;  %v5807_v6 = vpop.eup %5806  ;;  %v2351_v44 = vpack.c.bf16 %v2340_v58, %v2339_v62  ;;  %v5957_v62 = vld [vmem:[#allocation3 + $0x18] sm:$0xff] }
 0x9a9   : > { %5814 = vrcp.f32 %v2314_v21  ;;  %v5809_v47 = vpop.eup %5808  ;;  %v2342_v34 = vmul.f32 %v5807_v6, %v7102_v10  ;;  %v2481_v38 = vpop.permute.xlu1 %2480 }
 0x9aa   : > { %v2349_v36 = vpack.c.bf16 %v2336_v35, %v2335_v50  ;;  %5816 = vrcp.f32 %v2312_v42  ;;  %v5811_v53 = vpop.eup %5810  ;;  %v2341_v19 = vmul.f32 %v5809_v47, %v7094_v30 }
 0x9ab   : > { %v2344_v11 = vmul.f32 %v5811_v53, %v7108_v56 }
 0x9ac   : > { %5207 = vmatprep.mubr.bf16.mxu0 %v2349_v36  ;;  %v2505_v31 = vpop.permute.xlu0 %2504  ;;  %v2352_v8 = vpack.c.bf16 %v2342_v34, %v2341_v19 }
 0x9ad   : > { %5208 = vmatmul.mubr.bf16.gmra.mrb[52].mxu0 %v2350_v57  ;;  %5407 = vmatprep.subr.msk.bf16.mxu0 %vm1055_vm3, %v2505_v31  ;;  %v2551_v17 = vsel %vm1055_vm3, %v2505_v31, 0  ;;  %v2485_v37 = vpop.permute.xlu1 %2484 }
 0x9ae   : > { %5211 = vmatprep.mubr.bf16.mxu0 %v2351_v44  ;;  %5232 = vmatpush3.bf16.xpose.msra.mxu0 %v2551_v17 }
 0x9af   : > { %v5813_v9 = vpop.eup %5812 }
 0x9b0   : > { %v2507_v43 = vpop.permute.xlu0 %2506  ;;  %v2343_v41 = vmul.f32 %v5813_v9, %v7130_v46 }
 0x9b1   : > { %5408 = vmatprep.subr.msk.bf16.mxu0 %vm1055_vm3, %v2507_v43  ;;  %v2554_v42 = vsel %vm1055_vm3, %v2507_v43, 0  ;;  %v2489_v63 = vpop.permute.xlu1 %2488 }
 0x9b2   : > { %v2353_v7 = vpack.c.bf16 %v2344_v11, %v2343_v41 }
 0x9b3   : > { %v5815_v14 = vpop.eup %5814 }
 0x9b4   : > { %v2479_v59 = vpop.permute.xlu0 %2478  ;;  %v5817_v54 = vpop.eup %5816  ;;  %v2346_v10 = vmul.f32 %v5815_v14, %v7134_v33 }
 0x9b5   : > { %5212 = vmatmul.mubr.bf16.gmra.mrb[56].mxu0 %v2352_v8  ;;  %v2345_v40 = vmul.f32 %v5817_v54, %v7126_v3  ;;  %v2840_v55 = vpop.permute.xlu1 %2839 }
 0x9b6   : > { %5215 = vmatprep.mubr.bf16.mxu0 %v2353_v7  ;;  %5234 = vmatpush3.bf16.xpose.msra.mxu0 %v2554_v42 }
 0x9b7   : > { %v2354_v30 = vpack.c.bf16 %v2346_v10, %v2345_v40 }
 0x9b8   : > { %v2483_v46 = vpop.permute.xlu0 %2482 }
 0x9bc   : > { %v2487_v49 = vpop.permute.xlu0 %2486 }
 0x9bd   : > { %5216 = vmatmul.mubr.bf16.gmra.mrb[60].mxu0 %v2354_v30 }
 0x9be   : > { %5235 = vmatprep.mubr.msk.bf16.mxu0 %vm1055_vm3, %v2477_v39 }
 0x9c0   : > { %v2491_v56 = vpop.permute.xlu0 %2490 }
 0x9c4   : > { %v2838_v60 = vpop.permute.xlu0 %2837 }
 0x9c5   : > { %5236 = vmatmul.mubr.msk.bf16.vlgmr.msra.gmra.mrb[64].mxu0 %vm1055_vm3, %v2479_v59  ;;  %5251 = vmatprep.subr.bf16.mxu0 %v2838_v60 }
 0x9c6   : > { %5361 = vmatprep.subr.bf16.mxu1 %v2838_v60  ;;  %5239 = vmatprep.mubr.msk.bf16.mxu0 %vm1055_vm3, %v2481_v38 }
 0x9c7   : > { %5252 = vmatpush3.bf16.msra.mxu0 %v2838_v60  ;;  %5369 = vmatpush3.bf16.msra.mxu1 %v2838_v60 }
 0x9c8   : > { %5253 = vmatprep.subr.bf16.mxu0 %v2840_v55  ;;  %5362 = vmatprep.subr.bf16.mxu1 %v2840_v55 }
 0x9cb   : > { %5254 = vmatpush3.bf16.msra.mxu0 %v2840_v55  ;;  %5370 = vmatpush3.bf16.msra.mxu1 %v2840_v55 }
 0x9cd   : > { %5240 = vmatmul.mubr.msk.bf16.gmra.mrb[68].mxu0 %vm1055_vm3, %v2483_v46 }
 0x9ce   : > { %5243 = vmatprep.mubr.msk.bf16.mxu0 %vm1055_vm3, %v2485_v37 }
 0x9d5   : > { %5244 = vmatmul.mubr.msk.bf16.gmra.mrb[72].mxu0 %vm1055_vm3, %v2487_v49 }
 0x9d6   : > { %5247 = vmatprep.mubr.msk.bf16.mxu0 %vm1055_vm3, %v2489_v63 }
 0x9dd   : > { %5248 = vmatmul.mubr.msk.bf16.gmra.mrb[76].mxu0 %vm1055_vm3, %v2491_v56 }
 0xa47   : > { %v7191_v3 = vpop.f32.mrb[48].mxu0 }
 0xa48   : > { %v7193_v33 = vpop.f32.mrb[49].mxu0 }
 0xa49   : > { %v7195_v16 = vpop.f32.mrb[50].mxu0 }
 0xa4a   : > { %v7199_v50 = vpop.f32.mrb[51].mxu0 }
 0xa80   : > { %v7203_v58 = vpop.f32.mrb[52].mxu0 }
 0xa81   : > { %v7205_v32 = vpop.f32.mrb[53].mxu0 }
 0xa82   : > { %v7207_v36 = vpop.f32.mrb[54].mxu0 }
 0xa83   : > { %v7211_v57 = vpop.f32.mrb[55].mxu0 }
 0xa88   : > { %v7215_v31 = vpop.f32.mrb[56].mxu0 }
 0xa89   : > { %v7217_v44 = vpop.f32.mrb[57].mxu0 }
 0xa8a   : > { %v7219_v47 = vpop.f32.mrb[58].mxu0 }
 0xa8b   : > { %v7223_v53 = vpop.f32.mrb[59].mxu0 }
 0xa90   : > { %v7227_v39 = vpop.f32.mrb[60].mxu0 }
 0xa91   : > { %v7229_v34 = vpop.f32.mrb[61].mxu0 }
 0xa92   : > { %v7231_v43 = vpop.f32.mrb[62].mxu0 }
 0xa93   : > { %v7235_v19 = vpop.f32.mrb[63].mxu0 }
 0xa98   : > { %v5237_v8 = vpop.f32.mrb[64].mxu0 }
 0xa99   : > { %v2655_v14 = vmul.f32 0.35355338, %v5237_v8  ;;  %v2590_v59 = vpop.f32.mrb[65].mxu0 }
 0xa9a   : > { %v2653_v7 = vmul.f32 0.35355338, %v2590_v59  ;;  %v5238_v38 = vpop.f32.mrb[66].mxu0 }
 0xa9b   : > { %v7240_v42 = vadd.f32 %v6989_v4, %v2655_v14  ;;  %v2593_v54 = vpop.f32.mrb[67].mxu0  ;;  %v2656_v46 = vmul.f32 0.35355338, %v5238_v38 }
 0xa9c   : > { %v7243_v10 = vadd.f32 %v6989_v4, %v2653_v7  ;;  %v2654_v40 = vmul.f32 0.35355338, %v2593_v54 }
 0xa9d   : > { %2689 = vmax.xlane.f32.xlu0 %v7240_v42  ;;  %v7251_v30 = vadd.f32 %v6989_v4, %v2656_v46 }
 0xa9e   : > { %v7247_v37 = vadd.f32 %v6989_v4, %v2654_v40  ;;  %2685 = vmax.xlane.f32.xlu1 %v7243_v10 }
 0xaa0   : > { %v5241_v49 = vpop.f32.mrb[68].mxu0 }
 0xaa1   : > { %v2659_v56 = vmul.f32 0.35355338, %v5241_v49  ;;  %2687 = vmax.xlane.f32.xlu0 %v7247_v37  ;;  %v2606_v63 = vpop.f32.mrb[69].mxu0 }
 0xaa2   : > { %2691 = vmax.xlane.f32.xlu1 %v7251_v30  ;;  %v5242_v60 = vpop.f32.mrb[70].mxu0  ;;  %v2657_v8 = vmul.f32 0.35355338, %v2606_v63 }
 0xaa3   : > { %v7256_v55 = vadd.f32 %v6989_v4, %v2659_v56  ;;  %v2660_v14 = vmul.f32 0.35355338, %v5242_v60  ;;  %v2609_v59 = vpop.f32.mrb[71].mxu0 }
 0xaa4   : > { %v2658_v38 = vmul.f32 0.35355338, %v2609_v59  ;;  %v7263_v54 = vadd.f32 %v6989_v4, %v2657_v8 }
 0xaa5   : > { %v7259_v7 = vadd.f32 %v6989_v4, %v2660_v14  ;;  %2697 = vmax.xlane.f32.xlu0 %v7256_v55 }
 0xaa6   : > { %v7267_v40 = vadd.f32 %v6989_v4, %v2658_v38 }
 0xaa7   : > { %2699 = vmax.xlane.f32.xlu1 %v7259_v7 }
 0xaa8   : > { %v5245_v46 = vpop.f32.mrb[72].mxu0 }
 0xaa9   : > { %v2663_v49 = vmul.f32 0.35355338, %v5245_v46  ;;  %2693 = vmax.xlane.f32.xlu0 %v7263_v54  ;;  %v2622_v56 = vpop.f32.mrb[73].mxu0 }
 0xaaa   : > { %v5246_v63 = vpop.f32.mrb[74].mxu0  ;;  %v2661_v14 = vmul.f32 0.35355338, %v2622_v56 }
 0xaab   : > { %v7271_v60 = vadd.f32 %v6989_v4, %v2663_v49  ;;  %v2664_v59 = vmul.f32 0.35355338, %v5246_v63  ;;  %2695 = vmax.xlane.f32.xlu1 %v7267_v40  ;;  %v2625_v8 = vpop.f32.mrb[75].mxu0 }
 0xaac   : > { %v2662_v41 = vmul.f32 0.35355338, %v2625_v8  ;;  %v7279_v38 = vadd.f32 %v6989_v4, %v2661_v14 }
 0xaad   : > { %v7275_v11 = vadd.f32 %v6989_v4, %v2664_v59  ;;  %2705 = vmax.xlane.f32.xlu0 %v7271_v60 }
 0xaae   : > { %v7283_v49 = vadd.f32 %v6989_v4, %v2662_v41  ;;  %v5955_v41 = vld [vmem:[#allocation3 + $0x20] sm:$0xff] }
 0xaaf   : > { %2707 = vmax.xlane.f32.xlu1 %v7275_v11 }
 0xab0   : > { %v5249_v46 = vpop.f32.mrb[76].mxu0 }
 0xab1   : > { %v2667_v56 = vmul.f32 0.35355338, %v5249_v46  ;;  %2701 = vmax.xlane.f32.xlu0 %v7279_v38  ;;  %v2638_v63 = vpop.f32.mrb[77].mxu0  ;;  %v5956_v46 = vld [vmem:[#allocation3 + $0x10] sm:$0xff] }
 0xab2   : > { %v5250_v9 = vpop.f32.mrb[78].mxu0  ;;  %v2665_v8 = vmul.f32 0.35355338, %v2638_v63 }
 0xab3   : > { %v7287_v59 = vadd.f32 %v6989_v4, %v2667_v56  ;;  %2703 = vmax.xlane.f32.xlu1 %v7283_v49  ;;  %v2641_v17 = vpop.f32.mrb[79].mxu0  ;;  %v5958_v56 = vld [vmem:[#allocation3 + $0x30] sm:$0xff]  ;;  %v2668_v63 = vmul.f32 0.35355338, %v5250_v9 }
 0xab4   : > { %v7292_v14 = vadd.f32 %v6989_v4, %v2665_v8  ;;  %v2666_v8 = vmul.f32 0.35355338, %v2641_v17 }
 0xab5   : > { %2713 = vmax.xlane.f32.xlu0 %v7287_v59  ;;  %v7300_v21 = vadd.f32 %v6989_v4, %v2668_v63 }
 0xab6   : > { %v7304_v6 = vadd.f32 %v6989_v4, %v2666_v8 }
 0xab9   : > { %2709 = vmax.xlane.f32.xlu0 %v7292_v14 }
 0xac4   : > { %2845 = vrot.lane.b32.xlu1 %v5955_v41, %s6086_s17  ;;  %v5959_v41 = vld [vmem:[#allocation3 + $0x28] sm:$0xff] }
 0xacf   : > { %2841 = vrot.lane.b32.xlu0 %v5956_v46, %s6086_s17 }
 0xad3   : > { %2843 = vrot.lane.b32.xlu0 %v5957_v62, %s6086_s17 }
 0xad7   : > { %2849 = vrot.lane.b32.xlu0 %v5958_v56, %s6086_s17 }
 0xae8   : > { %2715 = vmax.xlane.f32.xlu1 %v7300_v21 }
 0xaec   : > { %2711 = vmax.xlane.f32.xlu1 %v7304_v6 }
 0xafd   : > { %2847 = vrot.lane.b32.xlu1 %v5959_v41, %s6086_s17 }
 0xb2a   : > { %v2690_v46 = vpop.xlane.xlu0 %2689 }
 0xb2b   : > { %v2719_v62 = vsub.f32 %v7240_v42, %v2690_v46  ;;  %v2686_v35 = vpop.xlane.xlu1 %2685 }
 0xb2c   : > { %v2717_v9 = vsub.f32 %v7243_v10, %v2686_v35 }
 0xb2d   : > { %v2737_v56 = vmul.f32 1.442695, %v2719_v62 }
 0xb2e   : > { %v2688_v63 = vpop.xlane.xlu0 %2687  ;;  %v2733_v17 = vmul.f32 1.442695, %v2717_v9 }
 0xb2f   : > { %5818 = vpow2.f32 %v2737_v56  ;;  %v2692_v25 = vpop.xlane.xlu1 %2691  ;;  %v2718_v4 = vsub.f32 %v7247_v37, %v2688_v63 }
 0xb30   : > { %v2720_v23 = vsub.f32 %v7251_v30, %v2692_v25  ;;  %5820 = vpow2.f32 %v2733_v17 }
 0xb31   : > { %v2735_v42 = vmul.f32 1.442695, %v2718_v4 }
 0xb32   : > { %v2739_v8 = vmul.f32 1.442695, %v2720_v23  ;;  %v2698_v22 = vpop.xlane.xlu0 %2697 }
 0xb33   : > { %v2723_v41 = vsub.f32 %v7256_v55, %v2698_v22 }
 0xb34   : > { %v2700_v28 = vpop.xlane.xlu1 %2699  ;;  %5822 = vpow2.f32 %v2739_v8 }
 0xb35   : > { %v2745_v24 = vmul.f32 1.442695, %v2723_v41  ;;  %v2724_v35 = vsub.f32 %v7259_v7, %v2700_v28 }
 0xb36   : > { %v2694_v10 = vpop.xlane.xlu0 %2693 }
 0xb37   : > { %5824 = vpow2.f32 %v2745_v24  ;;  %v2721_v46 = vsub.f32 %v7263_v54, %v2694_v10  ;;  %v2747_v37 = vmul.f32 1.442695, %v2724_v35 }
 0xb38   : > { %v2696_v62 = vpop.xlane.xlu1 %2695  ;;  %5826 = vpow2.f32 %v2735_v42 }
 0xb39   : > { %v7315_v9 = vpop.eup %5818  ;;  %v2741_v25 = vmul.f32 1.442695, %v2721_v46  ;;  %v2722_v23 = vsub.f32 %v7267_v40, %v2696_v62 }
 0xb3a   : > { %2769 = vadd.xlane.f32.xlu1 %v7315_v9  ;;  %v2706_v22 = vpop.xlane.xlu0 %2705  ;;  %v7320_v7 = vpop.eup %5820 }
 0xb3b   : > { %5828 = vpow2.f32 %v2741_v25  ;;  %v2743_v30 = vmul.f32 1.442695, %v2722_v23  ;;  %v2727_v55 = vsub.f32 %v7271_v60, %v2706_v22 }
 0xb3c   : > { %v2708_v28 = vpop.xlane.xlu1 %2707  ;;  %5830 = vpow2.f32 %v2747_v37 }
 0xb3d   : > { %5832 = vpow2.f32 %v2743_v30  ;;  %v2753_v54 = vmul.f32 1.442695, %v2727_v55  ;;  %v2728_v60 = vsub.f32 %v7275_v11, %v2708_v28 }
 0xb3e   : > { %2765 = vadd.xlane.f32.xlu1 %v7320_v7  ;;  %v2702_v24 = vpop.xlane.xlu0 %2701  ;;  %v7324_v56 = vpop.eup %5822 }
 0xb3f   : > { %v2725_v40 = vsub.f32 %v7279_v38, %v2702_v24  ;;  %5834 = vpow2.f32 %v2753_v54 }
 0xb40   : > { %v2704_v63 = vpop.xlane.xlu1 %2703 }
 0xb41   : > { %v7326_v17 = vpop.eup %5824  ;;  %v2726_v4 = vsub.f32 %v7283_v49, %v2704_v63  ;;  %v2749_v41 = vmul.f32 1.442695, %v2725_v40  ;;  %v2755_v49 = vmul.f32 1.442695, %v2728_v60  ;;  %v5960_v63 = vld [vmem:[#allocation3 + $0x38] sm:$0xff]  ;;  %v8361_v60 = vpack.i.bf16 %v7199_v50, %v7193_v33 }
 0xb42   : > { %2771 = vadd.xlane.f32.xlu1 %v7324_v56  ;;  %2777 = vadd.xlane.f32.xlu0 %v7326_v17  ;;  %v2714_v8 = vpop.xlane.xlu0 %2713  ;;  %v7333_v38 = vpop.eup %5826  ;;  %v8364_v33 = vpack.i.bf16 %v6972_v2, %v6966_v52  ;;  %v8365_v52 = vpack.i.bf16 %v6948_v1, %v6942_v12  ;;  %v8366_v2 = vpack.i.bf16 %v7195_v16, %v7191_v3 }
 0xb43   : > { %v2751_v42 = vmul.f32 1.442695, %v2726_v4  ;;  %v2731_v35 = vsub.f32 %v7287_v59, %v2714_v8  ;;  %v8360_v4 = vpack.i.bf16 %v6944_v48, %v6940_v13  ;;  %v8369_v12 = vpack.i.bf16 %v6968_v15, %v6964_v0 }
 0xb44   : > { %v2846_v55 = vpop.permute.xlu1 %2845 }
 0xb45   : > { %v7335_v10 = vpop.eup %5828  ;;  %5836 = vpow2.f32 %v2751_v42  ;;  %v2761_v46 = vmul.f32 1.442695, %v2731_v35  ;;  %v8363_v35 = vpack.i.bf16 %v7211_v57, %v7205_v32  ;;  %v8367_v32 = vpack.i.bf16 %v6956_v45, %v6952_v51 }
 0xb46   : > { %2767 = vadd.xlane.f32.xlu1 %v7333_v38  ;;  %2773 = vadd.xlane.f32.xlu0 %v7335_v10  ;;  %v2710_v11 = vpop.xlane.xlu0 %2709  ;;  %5838 = vpow2.f32 %v2749_v41  ;;  %v7340_v25 = vpop.eup %5830  ;;  %v8362_v41 = vpack.i.bf16 %v6960_v18, %v6954_v20  ;;  %v8368_v57 = vpack.i.bf16 %v7207_v36, %v7203_v58 }
 0xb47   : > { %v2729_v62 = vsub.f32 %v7292_v14, %v2710_v11  ;;  %v7342_v23 = vpop.eup %5832  ;;  %5840 = vpow2.f32 %v2761_v46 }
 0xb48   : > { %5842 = vpow2.f32 %v2755_v49 }
 0xb49   : > { %v2757_v59 = vmul.f32 1.442695, %v2729_v62  ;;  %v7346_v22 = vpop.eup %5834 }
 0xb4a   : > { %2775 = vadd.xlane.f32.xlu1 %v7342_v23  ;;  %2779 = vadd.xlane.f32.xlu0 %v7340_v25  ;;  %v2842_v37 = vpop.permute.xlu0 %2841 }
 0xb4b   : > { %5255 = vmatprep.subr.bf16.mxu0 %v2842_v37  ;;  %5363 = vmatprep.subr.bf16.mxu1 %v2842_v37  ;;  %5844 = vpow2.f32 %v2757_v59 }
 0xb4c   : > { %5256 = vmatpush3.bf16.msra.mxu0 %v2842_v37  ;;  %5371 = vmatpush3.bf16.msra.mxu1 %v2842_v37 }
 0xb4e   : > { %2785 = vadd.xlane.f32.xlu0 %v7346_v22  ;;  %v2844_v14 = vpop.permute.xlu0 %2843 }
 0xb4f   : > { %v7349_v30 = vpop.eup %5836  ;;  %5257 = vmatprep.subr.bf16.mxu0 %v2844_v14  ;;  %5364 = vmatprep.subr.bf16.mxu1 %v2844_v14 }
 0xb50   : > { %2783 = vadd.xlane.f32.xlu1 %v7349_v30  ;;  %5258 = vmatpush3.bf16.msra.mxu0 %v2844_v14  ;;  %v7352_v28 = vpop.eup %5838 }
 0xb51   : > { %5372 = vmatpush3.bf16.msra.mxu1 %v2844_v14  ;;  %5259 = vmatprep.subr.bf16.mxu0 %v2846_v55  ;;  %v7355_v24 = vpop.eup %5840 }
 0xb52   : > { %5365 = vmatprep.subr.bf16.mxu1 %v2846_v55  ;;  %2781 = vadd.xlane.f32.xlu0 %v7352_v28  ;;  %v7358_v54 = vpop.eup %5842  ;;  %v2850_v20 = vpop.permute.xlu0 %2849 }
 0xb54   : > { %2793 = vadd.xlane.f32.xlu1 %v7355_v24  ;;  %5260 = vmatpush3.bf16.msra.mxu0 %v2846_v55 }
 0xb55   : > { %5373 = vmatpush3.bf16.msra.mxu1 %v2846_v55  ;;  %v7361_v40 = vpop.eup %5844 }
 0xb56   : > { %2787 = vadd.xlane.f32.xlu0 %v7358_v54 }
 0xb58   : > { %2789 = vadd.xlane.f32.xlu1 %v7361_v40 }
 0xb69   : > { %2851 = vrot.lane.b32.xlu1 %v5960_v63, %s6086_s17 }
 0xb6d   : > { %5502 = vrot.lane.b32.xlu1 %v8360_v4, %s6087_s14 }
 0xb71   : > { %5507 = vrot.lane.b32.xlu1 %v8361_v60, %s6088_s24 }
 0xb75   : > { %v2716_v8 = vpop.xlane.xlu1 %2715  ;;  %5517 = vrot.lane.b32.xlu1 %v8362_v41, %s6087_s14 }
 0xb76   : > { %v2732_v13 = vsub.f32 %v7300_v21, %v2716_v8 }
 0xb78   : > { %v2763_v50 = vmul.f32 1.442695, %v2732_v13 }
 0xb79   : > { %v2712_v42 = vpop.xlane.xlu1 %2711  ;;  %5527 = vrot.lane.b32.xlu1 %v8363_v35, %s6088_s24 }
 0xb7a   : > { %v2730_v48 = vsub.f32 %v7304_v6, %v2712_v42 }
 0xb7c   : > { %v2759_v46 = vmul.f32 1.442695, %v2730_v48 }
 0xb7d   : > { %v2848_v11 = vpop.permute.xlu1 %2847  ;;  %5537 = vrot.lane.b32.xlu1 %v8364_v33, %s6087_s14 }
 0xb7e   : > { %5846 = vpow2.f32 %v2759_v46  ;;  %5261 = vmatprep.subr.bf16.mxu0 %v2848_v11  ;;  %5366 = vmatprep.subr.bf16.mxu1 %v2848_v11 }
 0xb7f   : > { %5262 = vmatpush3.bf16.msra.mxu0 %v2848_v11  ;;  %5374 = vmatpush3.bf16.msra.mxu1 %v2848_v11  ;;  %5848 = vpow2.f32 %v2763_v50 }
 0xb80   : > { %5263 = vmatprep.subr.bf16.mxu0 %v2850_v20  ;;  %5367 = vmatprep.subr.bf16.mxu1 %v2850_v20 }
 0xb83   : > { %5264 = vmatpush3.bf16.msra.mxu0 %v2850_v20  ;;  %5375 = vmatpush3.bf16.msra.mxu1 %v2850_v20 }
 0xb88   : > { %v7387_v18 = vpop.eup %5846 }
 0xb89   : > { %2791 = vadd.xlane.f32.xlu0 %v7387_v18  ;;  %v7390_v21 = vpop.eup %5848 }
 0xb8d   : > { %2795 = vadd.xlane.f32.xlu0 %v7390_v21 }
 0xba3   : > { %5497 = vrot.lane.b32.xlu0 %v8365_v52, %s6087_s14 }
 0xba7   : > { %5512 = vrot.lane.b32.xlu0 %v8366_v2, %s6088_s24 }
 0xbab   : > { %5522 = vrot.lane.b32.xlu0 %v8367_v32, %s6087_s14 }
 0xbaf   : > { %5532 = vrot.lane.b32.xlu0 %v8368_v57, %s6088_s24 }
 0xbb3   : > { %5542 = vrot.lane.b32.xlu0 %v8369_v12, %s6087_s14 }
 0xbc7   : > { %v2770_v1 = vpop.xlane.xlu1 %2769 }
 0xbcb   : > { %v2766_v6 = vpop.xlane.xlu1 %2765 }
 0xbcc   : > { %5850 = vrcp.f32 %v2766_v6 }
 0xbcf   : > { %v2772_v49 = vpop.xlane.xlu1 %2771  ;;  %v2778_v3 = vpop.xlane.xlu0 %2777 }
 0xbd3   : > { %v2768_v16 = vpop.xlane.xlu1 %2767  ;;  %v2774_v62 = vpop.xlane.xlu0 %2773 }
 0xbd4   : > { %5852 = vrcp.f32 %v2768_v16 }
 0xbd5   : > { %5854 = vrcp.f32 %v2774_v62 }
 0xbd6   : > { %v5851_v36 = vpop.eup %5850 }
 0xbd7   : > { %v2776_v51 = vpop.xlane.xlu1 %2775  ;;  %v2780_v45 = vpop.xlane.xlu0 %2779  ;;  %v2813_v37 = vmul.f32 %v5851_v36, %v7320_v7 }
 0xbd8   : > { %5856 = vrcp.f32 %v2776_v51 }
 0xbd9   : > { %5858 = vrcp.f32 %v2772_v49 }
 0xbda   : > { %5860 = vrcp.f32 %v2780_v45 }
 0xbdb   : > { %v2786_v58 = vpop.xlane.xlu0 %2785  ;;  %5862 = vrcp.f32 %v2770_v1 }
 0xbdc   : > { %5864 = vrcp.f32 %v2778_v3 }
 0xbdd   : > { %v2784_v0 = vpop.xlane.xlu1 %2783 }
 0xbde   : > { %v5853_v15 = vpop.eup %5852  ;;  %5866 = vrcp.f32 %v2784_v0  ;;  %v5618_v0 = vld [vmem:[%s8370_s23] sm:$0xff]  }
 0xbdf   : > { %v2782_v59 = vpop.xlane.xlu0 %2781  ;;  %v2814_v14 = vmul.f32 %v5853_v15, %v7333_v38  ;;  %v5855_v55 = vpop.eup %5854 }
 0xbe0   : > { %5868 = vrcp.f32 %v2782_v59  ;;  %v2817_v41 = vmul.f32 %v5855_v55, %v7335_v10  ;;  %v5619_v55 = vld [vmem:[%s8370_s23 + $0x8] sm:$0xff]  }
 0xbe1   : > { %v2794_v63 = vpop.xlane.xlu1 %2793  ;;  %v2829_v4 = vpack.c.bf16 %v2814_v14, %v2813_v37 }
 0xbe2   : > { %v5857_v60 = vpop.eup %5856 }
 0xbe3   : > { %5267 = vmatprep.mubr.bf16.mxu0 %v2829_v4  ;;  %v2788_v8 = vpop.xlane.xlu0 %2787  ;;  %v2818_v42 = vmul.f32 %v5857_v60, %v7342_v23  ;;  %v5859_v35 = vpop.eup %5858 }
 0xbe4   : > { %5870 = vrcp.f32 %v2788_v8  ;;  %v5861_v13 = vpop.eup %5860  ;;  %v2816_v33 = vmul.f32 %v5859_v35, %v7324_v56 }
 0xbe5   : > { %5872 = vrcp.f32 %v2786_v58  ;;  %v2790_v48 = vpop.xlane.xlu1 %2789  ;;  %v2831_v46 = vpack.c.bf16 %v2818_v42, %v2817_v41  ;;  %v5863_v7 = vpop.eup %5862  ;;  %v2820_v50 = vmul.f32 %v5861_v13, %v7340_v25  ;;  %v8371_v42 = vpack.i.bf16 %v7219_v47, %v7215_v31 }
 0xbe6   : > { %v5865_v11 = vpop.eup %5864  ;;  %v2815_v10 = vmul.f32 %v5863_v7, %v7315_v9  ;;  %5874 = vrcp.f32 %v2790_v48  ;;  %v8372_v13 = vpack.i.bf16 %v7223_v53, %v7217_v44  ;;  %v8374_v31 = vpack.i.bf16 %v6984_v29, %v6978_v61 }
 0xbe7   : > { %5271 = vmatprep.mubr.bf16.mxu1 %v2831_v46  ;;  %v2819_v23 = vmul.f32 %v5865_v11, %v7326_v17  ;;  %v8375_v44 = vpack.i.bf16 %v7231_v43, %v7227_v39  ;;  %v8376_v47 = vpack.i.bf16 %v7235_v19, %v7229_v34 }
 0xbe8   : > { %v5867_v38 = vpop.eup %5866  ;;  %v2830_v57 = vpack.c.bf16 %v2816_v33, %v2815_v10 }
 0xbe9   : > { %v2852_v20 = vpop.permute.xlu1 %2851  ;;  %v2822_v32 = vmul.f32 %v5867_v38, %v7349_v30  ;;  %v2832_v12 = vpack.c.bf16 %v2820_v50, %v2819_v23  ;;  %v8373_v38 = vpack.i.bf16 %v6980_v26, %v6976_v5 }
 0xbea   : > { %v5869_v52 = vpop.eup %5868  ;;  %5265 = vmatprep.subr.bf16.mxu0 %v2852_v20  ;;  %5368 = vmatprep.subr.bf16.mxu1 %v2852_v20 }
 0xbeb   : > { %5266 = vmatpush3.bf16.msra.mxu0 %v2852_v20  ;;  %5376 = vmatpush3.bf16.msra.mxu1 %v2852_v20  ;;  %v2821_v2 = vmul.f32 %v5869_v52, %v7352_v28 }
 0xbec   : > { %5283 = vmatprep.subr.bf16.mxu1 %v5618_v0 }
 0xbed   : > { %v2833_v1 = vpack.c.bf16 %v2822_v32, %v2821_v2  ;;  %v5503_v29 = vpop.permute.xlu1 %5502 }
 0xbee   : > { %v5871_v56 = vpop.eup %5870  ;;  %5268 = vmatmul.mubr.bf16.vlgmr.msra.gmra.mrb[80].mxu0 %v2830_v57  ;;  %5272 = vmatmul.mubr.bf16.vlgmr.msra.gmra.mrb[48].mxu1 %v2832_v12  ;;  %v5505_v32 = vunpack.i.h.bf16 %v5503_v29  ;;  %v5504_v57 = vunpack.i.l.bf16 %v5503_v29 }
 0xbef   : > { %v5873_v25 = vpop.eup %5872  ;;  %5275 = vmatprep.mubr.bf16.mxu1 %v2833_v1  ;;  %v2824_v9 = vmul.f32 %v5871_v56, %v7358_v54  ;;  %5284 = vmatpush3.bf16.msra.mxu1 %v5618_v0 }
 0xbf0   : > { %v2823_v17 = vmul.f32 %v5873_v25, %v7346_v22  ;;  %v5875_v28 = vpop.eup %5874  ;;  %5285 = vmatprep.subr.bf16.mxu1 %v5619_v55 }
 0xbf1   : > { %v2825_v16 = vmul.f32 %v5875_v28, %v7361_v40  ;;  %v5508_v10 = vpop.permute.xlu1 %5507  ;;  %v8378_v28 = vld [vmem:[#allocation24_spill] sm:$0xff] }
 0xbf2   : > { %v2834_v6 = vpack.c.bf16 %v2824_v9, %v2823_v17  ;;  %v3153_v9 = vsel %vm1055_vm3, %v6692_v27, %v5505_v32  ;;  %v8377_v17 = vld [vmem:[#allocation22_spill] sm:$0xff] }
 0xbf3   : > { %5286 = vmatpush3.bf16.msra.mxu1 %v5619_v55 }
 0xbf5   : > { %v5518_v39 = vpop.permute.xlu1 %5517 }
 0xbf6   : > { %5276 = vmatmul.mubr.bf16.gmra.mrb[52].mxu1 %v2834_v6  ;;  %v3152_v6 = vsel %vm1055_vm3, %v8377_v17, %v5504_v57 }
 0xbf9   : > { %v5528_v2 = vpop.permute.xlu1 %5527 }
 0xbfa   : > { %v5529_v55 = vunpack.i.l.bf16 %v5528_v2 }
 0xbfd   : > { %v7457_v1 = vpop.permute.xlu1 %5537 }
 0xbfe   : > { %v5539_v32 = vunpack.i.l.bf16 %v7457_v1 }
 0xc16   : > { %v2792_v49 = vpop.xlane.xlu0 %2791 }
 0xc17   : > { %5876 = vrcp.f32 %v2792_v49  ;;  %v5510_v49 = vunpack.i.h.bf16 %v5508_v10 }
 0xc18   : > { %5878 = vrcp.f32 %v2794_v63 }
 0xc1a   : > { %v2796_v30 = vpop.xlane.xlu0 %2795 }
 0xc1b   : > { %5880 = vrcp.f32 %v2796_v30  ;;  %v5509_v30 = vunpack.i.l.bf16 %v5508_v10 }
 0xc1e   : > { %v5498_v61 = vpop.permute.xlu0 %5497 }
 0xc1f   : > { %v5500_v34 = vunpack.i.h.bf16 %v5498_v61  ;;  %v5499_v19 = vunpack.i.l.bf16 %v5498_v61 }
 0xc21   : > { %v5877_v3 = vpop.eup %5876 }
 0xc22   : > { %v2826_v62 = vmul.f32 %v5877_v3, %v7387_v18  ;;  %v5879_v51 = vpop.eup %5878  ;;  %v5513_v52 = vpop.permute.xlu0 %5512  ;;  %v3151_v3 = vsel %vm1055_vm3, %v8378_v28, %v5500_v34 }
 0xc23   : > { %v2827_v22 = vmul.f32 %v5879_v51, %v7355_v24  ;;  %v5515_v56 = vunpack.i.h.bf16 %v5513_v52  ;;  %v5514_v25 = vunpack.i.l.bf16 %v5513_v52 }
 0xc24   : > { %v2835_v45 = vpack.c.bf16 %v2826_v62, %v2825_v16  ;;  %v8379_v16 = vld [vmem:[#allocation23_spill] sm:$0xff] }
 0xc25   : > { %v5881_v54 = vpop.eup %5880  ;;  %v3150_v62 = vsel %vm1055_vm3, %v8379_v16, %v5499_v19  ;;  %v3170_v27 = vsel %vm3166_vm4, %v3153_v9, %v5515_v56  ;;  %v3169_v0 = vsel %vm3166_vm4, %v3152_v6, %v5514_v25 }
 0xc26   : > { %5279 = vmatprep.mubr.bf16.mxu1 %v2835_v45  ;;  %v2828_v58 = vmul.f32 %v5881_v54, %v7390_v21  ;;  %v5523_v23 = vpop.permute.xlu0 %5522  ;;  %v5520_v45 = vunpack.i.h.bf16 %v5518_v39  ;;  %v5519_v54 = vunpack.i.l.bf16 %v5518_v39  ;;  %v5540_v39 = vunpack.i.h.bf16 %v7457_v1 }
 0xc28   : > { %v2836_v36 = vpack.c.bf16 %v2828_v58, %v2827_v22 }
 0xc2a   : > { %5280 = vmatmul.mubr.bf16.gmra.mrb[56].mxu1 %v2836_v36  ;;  %v5533_v43 = vpop.permute.xlu0 %5532 }
 0xc2e   : > { %v7455_v12 = vpop.permute.xlu0 %5542 }
 0xc2f   : > { %v5545_v25 = vunpack.i.h.bf16 %v7455_v12  ;;  %v5544_v9 = vunpack.i.l.bf16 %v7455_v12 }
 0xcc1   : > { %v5269_v15 = vpop.f32.mrb[80].mxu0  ;;  %v5273_v59 = vpop.f32.mrb[48].mxu1 }
 0xcc2   : > { %v2895_v37 = vpop.f32.mrb[81].mxu0  ;;  %v2911_v14 = vpop.f32.mrb[49].mxu1 }
 0xcc3   : > { %v5270_v40 = vpop.f32.mrb[82].mxu0  ;;  %v5274_v18 = vpop.f32.mrb[50].mxu1 }
 0xcc4   : > { %v5546_v63 = vpack.i.bf16 %v5270_v40, %v5269_v15  ;;  %v5566_v4 = vpack.i.bf16 %v5274_v18, %v5273_v59  ;;  %v2898_v60 = vpop.f32.mrb[83].mxu0  ;;  %v2914_v8 = vpop.f32.mrb[51].mxu1  ;;  %v3167_v40 = vsel %vm3166_vm4, %v3150_v62, %v5509_v30  ;;  %v3168_v18 = vsel %vm3166_vm4, %v3151_v3, %v5510_v49  ;;  %v8384_v62 = vld [vmem:[#allocation32_spill] sm:$0xff] }
 0xcc5   : > { %v5551_v41 = vpack.i.bf16 %v2898_v60, %v2895_v37  ;;  %v5571_v24 = vpack.i.bf16 %v2914_v8, %v2911_v14 }
 0xcc6   : > { %5547 = vrot.lane.b32.xlu0 %v5546_v63, %s6089_s1 }
 0xcc7   : > { %5552 = vrot.lane.b32.xlu1 %v5551_v41, %s6089_s1  ;;  %v5525_v41 = vunpack.i.h.bf16 %v5523_v23 }
 0xcc9   : > { %v5277_v21 = vpop.f32.mrb[52].mxu1 }
 0xcca   : > { %5562 = vrot.lane.b32.xlu0 %v8371_v42, %s6088_s24  ;;  %v2927_v35 = vpop.f32.mrb[53].mxu1 }
 0xccb   : > { %5557 = vrot.lane.b32.xlu1 %v8372_v13, %s6088_s24  ;;  %v5278_v48 = vpop.f32.mrb[54].mxu1  ;;  %v5534_v13 = vunpack.i.l.bf16 %v5533_v43 }
 0xccc   : > { %v5586_v46 = vpack.i.bf16 %v5278_v48, %v5277_v21  ;;  %v2930_v7 = vpop.f32.mrb[55].mxu1  ;;  %v8380_v48 = vld [vmem:[#allocation26_spill] sm:$0xff] }
 0xccd   : > { %v5591_v11 = vpack.i.bf16 %v2930_v7, %v2927_v35  ;;  %v5535_v35 = vunpack.i.h.bf16 %v5533_v43  ;;  %v5530_v7 = vunpack.i.h.bf16 %v5528_v2 }
 0xcce   : > { %5567 = vrot.lane.b32.xlu0 %v5566_v4, %s6089_s1 }
 0xccf   : > { %5572 = vrot.lane.b32.xlu1 %v5571_v24, %s6089_s1  ;;  %v5524_v24 = vunpack.i.l.bf16 %v5523_v23 }
 0xcd2   : > { %5582 = vrot.lane.b32.xlu0 %v8373_v38, %s6087_s14 }
 0xcd3   : > { %5577 = vrot.lane.b32.xlu1 %v8374_v31, %s6087_s14  ;;  %s8394_s14 = scalar_lea.vmem %s8284_s7, %s6277_s22 }
 0xcd6   : > { %5587 = vrot.lane.b32.xlu0 %v5586_v46, %s6089_s1  ;;  %v3154_v46 = vsel %vm1055_vm3, %v8380_v48, %v5519_v54 }
 0xcd7   : > { %5592 = vrot.lane.b32.xlu1 %v5591_v11, %s6089_s1  ;;  %v8381_v11 = vld [vmem:[#allocation28_spill] sm:$0xff]  ;;  %v3171_v31 = vsel %vm3166_vm4, %v3154_v46, %v5529_v55 }
 0xcd8   : > { %v3155_v38 = vsel %vm1055_vm3, %v8381_v11, %v5520_v45  ;;  %v8385_v45 = vld [vmem:[#allocation30_spill] sm:$0xff] }
 0xcd9   : > { %v3172_v23 = vsel %vm3166_vm4, %v3155_v38, %v5530_v7  ;;  %v3158_v12 = vsel %vm1055_vm3, %v8385_v45, %v5539_v32 }
 0xcda   : > { %5602 = vrot.lane.b32.xlu0 %v8375_v44, %s6088_s24 }
 0xcdb   : > { %5597 = vrot.lane.b32.xlu1 %v8376_v47, %s6088_s24  ;;  %v8382_v47 = vld [vmem:[#allocation27_spill] sm:$0xff]  ;;  %s8398_s24 = sld [smem:[#allocation42_spill]] (!%p4819_p2) }
 0xcfd   : > { %v5281_v53 = vpop.f32.mrb[56].mxu1 }
 0xcfe   : > { %v2943_v5 = vpop.f32.mrb[57].mxu1 }
 0xcff   : > { %v5282_v26 = vpop.f32.mrb[58].mxu1 }
 0xd00   : > { %v5611_v33 = vpack.i.bf16 %v5282_v26, %v5281_v53  ;;  %v2946_v50 = vpop.f32.mrb[59].mxu1  ;;  %v3157_v53 = vsel %vm1055_vm3, %v8382_v47, %v5525_v41 }
 0xd01   : > { %v5606_v20 = vpack.i.bf16 %v2946_v50, %v2943_v5  ;;  %v8383_v5 = vld [vmem:[#allocation25_spill] sm:$0xff]  ;;  %v3174_v29 = vsel %vm3166_vm4, %v3157_v53, %v5535_v35 }
 0xd02   : > { %5612 = vrot.lane.b32.xlu0 %v5611_v33, %s6089_s1  ;;  %v3156_v26 = vsel %vm1055_vm3, %v8383_v5, %v5524_v24 }
 0xd03   : > { %5607 = vrot.lane.b32.xlu1 %v5606_v20, %s6089_s1  ;;  %v3173_v61 = vsel %vm3166_vm4, %v3156_v26, %v5534_v13 }
 0xd38   : > { %v5548_v51 = vpop.permute.xlu0 %5547 }
 0xd39   : > { %v5550_v22 = vunpack.i.h.bf16 %v5548_v51  ;;  %v5549_v58 = vunpack.i.l.bf16 %v5548_v51  ;;  %v5553_v36 = vpop.permute.xlu1 %5552  ;;  %v3159_v51 = vsel %vm1055_vm3, %v8384_v62, %v5540_v39  ;;  %v7548_v62 = vld [vmem:[%s8392_s19] ss:$0 sm:$0xff] }
 0xd3a   : > { %v5555_v15 = vunpack.i.h.bf16 %v5553_v36  ;;  %v5554_v59 = vunpack.i.l.bf16 %v5553_v36  ;;  %v8387_v36 = vld [vmem:[#allocation29_spill] sm:$0xff] }
 0xd3b   : > { %v3186_v37 = vsel %vm3183_vm5, %v3169_v0, %v5549_v58  ;;  %v3187_v14 = vsel %vm3183_vm5, %v3170_v27, %v5550_v22  ;;  %v8386_v22 = vld [vmem:[#allocation31_spill] sm:$0xff]  ;;  %v3160_v27 = vsel %vm1055_vm3, %v8387_v36, %v5544_v9 }
 0xd3c   : > { %v3201_v63 = vpack.c.bf16 %v3187_v14, %v3186_v37  ;;  %v3184_v4 = vsel %vm3183_vm5, %v3167_v40, %v5554_v59  ;;  %v3185_v60 = vsel %vm3183_vm5, %v3168_v18, %v5555_v15  ;;  %v5563_v8 = vpop.permute.xlu0 %5562  ;;  %v3161_v58 = vsel %vm1055_vm3, %v8386_v22, %v5545_v25 }
 0xd3d   : > { %v3200_v21 = vpack.c.bf16 %v3185_v60, %v3184_v4  ;;  %v5558_v42 = vpop.permute.xlu1 %5557  ;;  %v5565_v49 = vunpack.i.h.bf16 %v5563_v8  ;;  %v5564_v30 = vunpack.i.l.bf16 %v5563_v8 }
 0xd3e   : > { %3209 = vst.msk [vmem:[#allocation4 + $0x8] sm:$0xff] %vm883_vm1, %v3201_v63  ;;  %v5560_v3 = vunpack.i.h.bf16 %v5558_v42  ;;  %v5559_v16 = vunpack.i.l.bf16 %v5558_v42 }
 0xd3f   : > { %3208 = vst.msk [vmem:[#allocation4] sm:$0xff] %vm883_vm1, %v3200_v21  ;;  %v3177_v37 = vsel %vm3166_vm4, %v3160_v27, %v5564_v30  ;;  %v3178_v14 = vsel %vm3166_vm4, %v3161_v58, %v5565_v49  ;;  %v5961_v27 = vld [vmem:[#allocation2] sm:$0xff] }
 0xd40   : > { %v5568_v44 = vpop.permute.xlu0 %5567  ;;  %v3176_v55 = vsel %vm3166_vm4, %v3159_v51, %v5560_v3  ;;  %v3175_v63 = vsel %vm3166_vm4, %v3158_v12, %v5559_v16 }
 0xd41   : > { %v5570_v33 = vunpack.i.h.bf16 %v5568_v44  ;;  %v5569_v50 = vunpack.i.l.bf16 %v5568_v44  ;;  %v5573_v20 = vpop.permute.xlu1 %5572 }
 0xd42   : > { %v5575_v52 = vunpack.i.h.bf16 %v5573_v20  ;;  %v5574_v10 = vunpack.i.l.bf16 %v5573_v20  ;;  %v8389_v20 = vld [vmem:[#allocation33_spill] sm:$0xff] }
 0xd43   : > { %v3190_v43 = vsel %vm3183_vm5, %v3173_v61, %v5569_v50  ;;  %v3191_v2 = vsel %vm3183_vm5, %v3174_v29, %v5570_v33  ;;  %v8388_v33 = vld [vmem:[#allocation35_spill] sm:$0xff] }
 0xd44   : > { %v3203_v57 = vpack.c.bf16 %v3191_v2, %v3190_v43  ;;  %v3189_v34 = vsel %vm3183_vm5, %v3172_v23, %v5575_v52  ;;  %v3188_v19 = vsel %vm3183_vm5, %v3171_v31, %v5574_v10  ;;  %v5583_v56 = vpop.permute.xlu0 %5582  ;;  %v8390_v52 = vld [vmem:[#allocation36_spill] sm:$0xff]  ;;  %v8391_v23 = vld [vmem:[#allocation34_spill] sm:$0xff] }
 0xd45   : > { %v3202_v17 = vpack.c.bf16 %v3189_v34, %v3188_v19  ;;  %v5578_v6 = vpop.permute.xlu1 %5577  ;;  %v3217_v1 = vld [vmem:[#allocation4 + $0x8] sm:$0xff]  ;;  %v5585_v7 = vunpack.i.h.bf16 %v5583_v56  ;;  %v5584_v11 = vunpack.i.l.bf16 %v5583_v56 }
 0xd46   : > { %3211 = vst.msk [vmem:[#allocation4 + $0x18] sm:$0xff] %vm883_vm1, %v3203_v57  ;;  %v3216_v28 = vld [vmem:[#allocation4] sm:$0xff]  ;;  %v5580_v31 = vunpack.i.h.bf16 %v5578_v6  ;;  %v5579_v44 = vunpack.i.l.bf16 %v5578_v6 }
 0xd47   : > { %3210 = vst.msk [vmem:[#allocation4 + $0x10] sm:$0xff] %vm883_vm1, %v3202_v17  ;;  %5287 = vmatprep.mubr.msk.bf16.mxu1 %vm883_vm1, %v3216_v28  ;;  %v3165_v50 = vsel %vm1055_vm3, %v8388_v33, %v5585_v7  ;;  %v3164_v61 = vsel %vm1055_vm3, %v8389_v20, %v5584_v11 }
 0xd48   : > { %v5588_v54 = vpop.permute.xlu0 %5587  ;;  %5288 = vmatmul.mubr.msk.bf16.vlgmr.msra.gmra.mrb[60].mxu1 %vm883_vm1, %v3217_v1  ;;  %v3163_v10 = vsel %vm1055_vm3, %v8390_v52, %v5580_v31  ;;  %v3162_v39 = vsel %vm1055_vm3, %v8391_v23, %v5579_v44  ;;  %v5967_v44 = vld [vmem:[#allocation2 + $0x30] sm:$0xff] }
 0xd49   : > { %v5590_v0 = vunpack.i.h.bf16 %v5588_v54  ;;  %v5589_v15 = vunpack.i.l.bf16 %v5588_v54  ;;  %v5593_v59 = vpop.permute.xlu1 %5592 }
 0xd4a   : > { %v5595_v40 = vunpack.i.h.bf16 %v5593_v59  ;;  %v5594_v18 = vunpack.i.l.bf16 %v5593_v59  ;;  %v5962_v59 = vld [vmem:[#allocation2 + $0x18] sm:$0xff] }
 0xd4b   : > { %v3194_v4 = vsel %vm3183_vm5, %v3177_v37, %v5589_v15  ;;  %v3195_v60 = vsel %vm3183_vm5, %v3178_v14, %v5590_v0  ;;  %v5963_v14 = vld [vmem:[#allocation2 + $0x8] sm:$0xff] }
 0xd4c   : > { %v3205_v8 = vpack.c.bf16 %v3195_v60, %v3194_v4  ;;  %v3193_v41 = vsel %vm3183_vm5, %v3176_v55, %v5595_v40  ;;  %v3192_v24 = vsel %vm3183_vm5, %v3175_v63, %v5594_v18  ;;  %v5603_v46 = vpop.permute.xlu0 %5602  ;;  %v5964_v55 = vld [vmem:[#allocation2 + $0x10] sm:$0xff] }
 0xd4d   : > { %v3204_v21 = vpack.c.bf16 %v3193_v41, %v3192_v24  ;;  %v3219_v35 = vld [vmem:[#allocation4 + $0x18] sm:$0xff]  ;;  %v5598_v38 = vpop.permute.xlu1 %5597  ;;  %v5605_v47 = vunpack.i.h.bf16 %v5603_v46  ;;  %v5604_v53 = vunpack.i.l.bf16 %v5603_v46 }
 0xd4e   : > { %3213 = vst.msk [vmem:[#allocation4 + $0x28] sm:$0xff] %vm883_vm1, %v3205_v8  ;;  %v3218_v42 = vld [vmem:[#allocation4 + $0x10] sm:$0xff]  ;;  %v5600_v5 = vunpack.i.h.bf16 %v5598_v38  ;;  %v5599_v26 = vunpack.i.l.bf16 %v5598_v38  ;;  %v5966_v38 = vld [vmem:[#allocation2 + $0x28] sm:$0xff] }
 0xd4f   : > { %3212 = vst.msk [vmem:[#allocation4 + $0x20] sm:$0xff] %vm883_vm1, %v3204_v21  ;;  %5291 = vmatprep.mubr.msk.bf16.mxu1 %vm883_vm1, %v3218_v42  ;;  %v3181_v57 = vsel %vm3166_vm4, %v3164_v61, %v5604_v53  ;;  %v3182_v34 = vsel %vm3166_vm4, %v3165_v50, %v5605_v47  ;;  %v5968_v53 = vld [vmem:[#allocation2 + $0x38] sm:$0xff] }
 0xd50   : > { %5292 = vmatmul.mubr.msk.bf16.gmra.mrb[64].mxu1 %vm883_vm1, %v3219_v35  ;;  %v3180_v25 = vsel %vm3166_vm4, %v3163_v10, %v5600_v5  ;;  %v3179_v9 = vsel %vm3166_vm4, %v3162_v39, %v5599_v26 }
 0xd55   : > { %v3221_v48 = vld [vmem:[#allocation4 + $0x28] sm:$0xff] }
 0xd56   : > { %v3220_v13 = vld [vmem:[#allocation4 + $0x20] sm:$0xff] }
 0xd57   : > { %5295 = vmatprep.mubr.msk.bf16.mxu1 %vm883_vm1, %v3220_v13 }
 0xd58   : > { %5296 = vmatmul.mubr.msk.bf16.gmra.mrb[68].mxu1 %vm883_vm1, %v3221_v48  ;;  %v5965_v48 = vld [vmem:[#allocation2 + $0x20] sm:$0xff] }
 0xd74   : > { %v5613_v29 = vpop.permute.xlu0 %5612 }
 0xd75   : > { %v5615_v43 = vunpack.i.h.bf16 %v5613_v29  ;;  %v5614_v2 = vunpack.i.l.bf16 %v5613_v29  ;;  %v5608_v32 = vpop.permute.xlu1 %5607 }
 0xd76   : > { %v5610_v19 = vunpack.i.h.bf16 %v5608_v32  ;;  %v5609_v56 = vunpack.i.l.bf16 %v5608_v32 }
 0xd77   : > { %v3198_v17 = vsel %vm3183_vm5, %v3181_v57, %v5614_v2  ;;  %v3199_v6 = vsel %vm3183_vm5, %v3182_v34, %v5615_v43  ;;  %v5969_v43 = vld [vmem:[#allocation2 + $0x40] sm:$0xff]  ;;  %v5970_v34 = vld [vmem:[#allocation2 + $0x48] sm:$0xff] }
 0xd78   : > { %v3207_v49 = vpack.c.bf16 %v3199_v6, %v3198_v17  ;;  %v3197_v30 = vsel %vm3183_vm5, %v3180_v25, %v5610_v19  ;;  %v3196_v28 = vsel %vm3183_vm5, %v3179_v9, %v5609_v56  ;;  %v5971_v56 = vld [vmem:[#allocation2 + $0x50] sm:$0xff]  ;;  %v5972_v9 = vld [vmem:[#allocation2 + $0x58] sm:$0xff] }
 0xd79   : > { %v3206_v3 = vpack.c.bf16 %v3197_v30, %v3196_v28 }
 0xd7a   : > { %3215 = vst.msk [vmem:[#allocation4 + $0x38] sm:$0xff] %vm883_vm1, %v3207_v49 }
 0xd7b   : > { %3214 = vst.msk [vmem:[#allocation4 + $0x30] sm:$0xff] %vm883_vm1, %v3206_v3 }
 0xd81   : > { %v3223_v1 = vld [vmem:[#allocation4 + $0x38] sm:$0xff] }
 0xd82   : > { %v3222_v16 = vld [vmem:[#allocation4 + $0x30] sm:$0xff] }
 0xd83   : > { %5299 = vmatprep.mubr.msk.bf16.mxu1 %vm883_vm1, %v3222_v16 }
 0xd84   : > { %5300 = vmatmul.mubr.msk.bf16.gmra.mrb[72].mxu1 %vm883_vm1, %v3223_v1 }
 0xe1b   : > { %v5289_v51 = vpop.f32.mrb[60].mxu1 }
 0xe1c   : > { %v3300_v45 = vpop.f32.mrb[61].mxu1  ;;  %v3309_v36 = vadd.f32 %v5289_v51, %v7548_v62 }
 0xe1d   : > { %v3301_v12 = vadd.f32 %v7548_v62, %v3300_v45  ;;  %v5290_v54 = vpop.f32.mrb[62].mxu1 }
 0xe1e   : > { %v3312_v22 = vadd.f32 %v5290_v54, %v7548_v62  ;;  %v3303_v58 = vpop.f32.mrb[63].mxu1  ;;  %v7562_v63 = vadd.f32 %v5964_v55, %v3309_v36  ;;  %v5976_v55 = vld [vmem:[#allocation2 + $0x78] sm:$0xff] }
 0xe1f   : > { %v7553_v0 = vadd.f32 %v5961_v27, %v3301_v12  ;;  %v3304_v15 = vadd.f32 %v7548_v62, %v3303_v58  ;;  %v5974_v27 = vld [vmem:[#allocation2 + $0x70] sm:$0xff] }
 0xe20   : > { %v7556_v37 = vadd.f32 %v5962_v59, %v3312_v22  ;;  %v3385_v11 = vsel %vm883_vm1, %v7562_v63, 0.0  ;;  %v5973_v22 = vld [vmem:[#allocation2 + $0x60] sm:$0xff]  ;;  %v5975_v59 = vld [vmem:[#allocation2 + $0x68] sm:$0xff] }
 0xe21   : > { %v7558_v40 = vadd.f32 %v5963_v14, %v3304_v15  ;;  %v3379_v18 = vsel %vm883_vm1, %v7553_v0, 0.0 }
 0xe22   : > { %3380 = vadd.xlane.f32.xlu1 %v3379_v18  ;;  %v3388_v21 = vsel %vm883_vm1, %v7556_v37, 0.0 }
 0xe23   : > { %v5293_v4 = vpop.f32.mrb[64].mxu1  ;;  %v3382_v60 = vsel %vm883_vm1, %v7558_v40, 0.0 }
 0xe24   : > { %v3316_v8 = vpop.f32.mrb[65].mxu1  ;;  %3383 = vadd.xlane.f32.xlu0 %v3382_v60  ;;  %v3325_v42 = vadd.f32 %v5293_v4, %v7548_v62 }
 0xe25   : > { %v3317_v41 = vadd.f32 %v7548_v62, %v3316_v8  ;;  %v5294_v24 = vpop.f32.mrb[66].mxu1 }
 0xe26   : > { %v3328_v35 = vadd.f32 %v5294_v24, %v7548_v62  ;;  %v3319_v13 = vpop.f32.mrb[67].mxu1  ;;  %3389 = vadd.xlane.f32.xlu1 %v3388_v21  ;;  %v7578_v47 = vadd.f32 %v5967_v44, %v3325_v42 }
 0xe27   : > { %v7571_v46 = vadd.f32 %v5965_v48, %v3317_v41  ;;  %v3320_v7 = vadd.f32 %v7548_v62, %v3319_v13 }
 0xe28   : > { %3386 = vadd.xlane.f32.xlu0 %v3385_v11  ;;  %v7580_v5 = vadd.f32 %v5968_v53, %v3328_v35  ;;  %v3397_v10 = vsel %vm883_vm1, %v7578_v47, 0.0 }
 0xe29   : > { %v7576_v31 = vadd.f32 %v5966_v38, %v3320_v7  ;;  %v3391_v33 = vsel %vm883_vm1, %v7571_v46, 0.0 }
 0xe2a   : > { %v3400_v23 = vsel %vm883_vm1, %v7580_v5, 0.0 }
 0xe2b   : > { %v5297_v26 = vpop.f32.mrb[68].mxu1  ;;  %v3394_v50 = vsel %vm883_vm1, %v7576_v31, 0.0 }
 0xe2c   : > { %v3332_v20 = vpop.f32.mrb[69].mxu1  ;;  %3392 = vadd.xlane.f32.xlu0 %v3391_v33  ;;  %3395 = vadd.xlane.f32.xlu1 %v3394_v50  ;;  %v3341_v39 = vadd.f32 %v5297_v26, %v7548_v62 }
 0xe2d   : > { %v3333_v61 = vadd.f32 %v7548_v62, %v3332_v20  ;;  %v5298_v29 = vpop.f32.mrb[70].mxu1 }
 0xe2e   : > { %v3335_v52 = vpop.f32.mrb[71].mxu1  ;;  %v3344_v32 = vadd.f32 %v5298_v29, %v7548_v62  ;;  %v7598_v25 = vadd.f32 %v5971_v56, %v3341_v39 }
 0xe2f   : > { %v7592_v2 = vadd.f32 %v5969_v43, %v3333_v61  ;;  %v3336_v57 = vadd.f32 %v7548_v62, %v3335_v52 }
 0xe30   : > { %3398 = vadd.xlane.f32.xlu0 %v3397_v10  ;;  %3401 = vadd.xlane.f32.xlu1 %v3400_v23  ;;  %v7600_v17 = vadd.f32 %v5972_v9, %v3344_v32  ;;  %v3409_v30 = vsel %vm883_vm1, %v7598_v25, 0.0 }
 0xe31   : > { %v7596_v19 = vadd.f32 %v5970_v34, %v3336_v57  ;;  %v3403_v6 = vsel %vm883_vm1, %v7592_v2, 0.0 }
 0xe32   : > { %v3412_v28 = vsel %vm883_vm1, %v7600_v17, 0.0 }
 0xe33   : > { %v3406_v49 = vsel %vm883_vm1, %v7596_v19, 0.0 }
 0xe34   : > { %3404 = vadd.xlane.f32.xlu0 %v3403_v6  ;;  %3407 = vadd.xlane.f32.xlu1 %v3406_v49 }
 0xe38   : > { %3410 = vadd.xlane.f32.xlu0 %v3409_v30  ;;  %3413 = vadd.xlane.f32.xlu1 %v3412_v28 }
 0xe57   : > { %v5301_v3 = vpop.f32.mrb[72].mxu1 }
 0xe58   : > { %v3357_v16 = vadd.f32 %v5301_v3, %v7548_v62  ;;  %v3348_v1 = vpop.f32.mrb[73].mxu1 }
 0xe59   : > { %v3349_v51 = vadd.f32 %v7548_v62, %v3348_v1  ;;  %v5302_v45 = vpop.f32.mrb[74].mxu1 }
 0xe5a   : > { %v3360_v12 = vadd.f32 %v5302_v45, %v7548_v62  ;;  %v3351_v54 = vpop.f32.mrb[75].mxu1  ;;  %v7616_v15 = vadd.f32 %v5974_v27, %v3357_v16 }
 0xe5b   : > { %v7613_v58 = vadd.f32 %v5973_v22, %v3349_v51  ;;  %v3352_v36 = vadd.f32 %v7548_v62, %v3351_v54 }
 0xe5c   : > { %v7622_v4 = vadd.f32 %v5976_v55, %v3360_v12  ;;  %v3421_v62 = vsel %vm883_vm1, %v7616_v15, 0.0 }
 0xe5d   : > { %v7618_v14 = vadd.f32 %v5975_v59, %v3352_v36  ;;  %v3415_v18 = vsel %vm883_vm1, %v7613_v58, 0.0 }
 0xe5e   : > { %3416 = vadd.xlane.f32.xlu0 %v3415_v18  ;;  %v3424_v8 = vsel %vm883_vm1, %v7622_v4, 0.0 }
 0xe5f   : > { %v3418_v60 = vsel %vm883_vm1, %v7618_v14, 0.0 }
 0xe60   : > { %3419 = vadd.xlane.f32.xlu1 %v3418_v60 }
 0xe62   : > { %3422 = vadd.xlane.f32.xlu0 %v3421_v62 }
 0xe64   : > { %3425 = vadd.xlane.f32.xlu1 %v3424_v8 }
 0xeaf   : > { %v3381_v41 = vpop.xlane.xlu1 %3380 }
 0xeb0   : > { %v3428_v24 = vmul.f32 0.03125, %v3381_v41 }
 0xeb1   : > { %v3384_v21 = vpop.xlane.xlu0 %3383 }
 0xeb2   : > { %v7631_v42 = vsub.f32 %v7553_v0, %v3428_v24  ;;  %v3429_v35 = vmul.f32 0.03125, %v3384_v21  ;;  %v5621_v24 = vld [vmem:[%s6309_s25 + $0x8] sm:$0xff]  }
 0xeb3   : > { %v3390_v13 = vpop.xlane.xlu1 %3389 }
 0xeb4   : > { %v7634_v48 = vsub.f32 %v7558_v40, %v3429_v35  ;;  %v3431_v7 = vmul.f32 0.03125, %v3390_v13  ;;  %v3460_v11 = vmul.f32 %v7631_v42, %v7631_v42 }
 0xeb5   : > { %v3387_v38 = vpop.xlane.xlu0 %3386 }
 0xeb6   : > { %v7639_v44 = vsub.f32 %v7556_v37, %v3431_v7  ;;  %v3430_v53 = vmul.f32 0.03125, %v3387_v38  ;;  %v3476_v26 = vsel %vm883_vm1, %v3460_v11, 0.0  ;;  %v3461_v0 = vmul.f32 %v7634_v48, %v7634_v48 }
 0xeb7   : > { %3477 = vadd.xlane.f32.xlu0 %v3476_v26 }
 0xeb8   : > { %v7645_v33 = vsub.f32 %v7562_v63, %v3430_v53  ;;  %v3479_v40 = vsel %vm883_vm1, %v3461_v0, 0.0  ;;  %v3463_v50 = vmul.f32 %v7639_v44, %v7639_v44 }
 0xeb9   : > { %v3393_v20 = vpop.xlane.xlu0 %3392  ;;  %3480 = vadd.xlane.f32.xlu1 %v3479_v40  ;;  %v3396_v61 = vpop.xlane.xlu1 %3395 }
 0xeba   : > { %v3432_v37 = vmul.f32 0.03125, %v3393_v20  ;;  %v3433_v29 = vmul.f32 0.03125, %v3396_v61  ;;  %v3462_v52 = vmul.f32 %v7645_v33, %v7645_v33  ;;  %v3485_v39 = vsel %vm883_vm1, %v3463_v50, 0.0 }
 0xebc   : > { %v7653_v10 = vsub.f32 %v7571_v46, %v3432_v37  ;;  %v7656_v23 = vsub.f32 %v7576_v31, %v3433_v29  ;;  %v3482_v63 = vsel %vm883_vm1, %v3462_v52, 0.0 }
 0xebd   : > { %v3399_v43 = vpop.xlane.xlu0 %3398  ;;  %3483 = vadd.xlane.f32.xlu0 %v3482_v63  ;;  %3486 = vadd.xlane.f32.xlu1 %v3485_v39  ;;  %v3402_v32 = vpop.xlane.xlu1 %3401  ;;  %v5622_v39 = vld [vmem:[%s6319_s16] sm:$0xff]  }
 0xebe   : > { %v3434_v57 = vmul.f32 0.03125, %v3399_v43  ;;  %v3435_v34 = vmul.f32 0.03125, %v3402_v32  ;;  %v3464_v56 = vmul.f32 %v7653_v10, %v7653_v10  ;;  %v3465_v46 = vmul.f32 %v7656_v23, %v7656_v23  ;;  %v5623_v43 = vld [vmem:[%s6319_s16 + $0x8] sm:$0xff]   ;;  %5323 = vmatprep.subr.bf16.mxu1 %v5622_v39 }
 0xebf   : > { %5324 = vmatpush3.bf16.msra.mxu1 %v5622_v39 }
 0xec0   : > { %v7665_v9 = vsub.f32 %v7578_v47, %v3434_v57  ;;  %v7668_v31 = vsub.f32 %v7580_v5, %v3435_v34  ;;  %v3488_v6 = vsel %vm883_vm1, %v3464_v56, 0.0  ;;  %v3491_v49 = vsel %vm883_vm1, %v3465_v46, 0.0  ;;  %5325 = vmatprep.subr.bf16.mxu1 %v5623_v43 }
 0xec1   : > { %v3405_v30 = vpop.xlane.xlu0 %3404  ;;  %3489 = vadd.xlane.f32.xlu0 %v3488_v6  ;;  %3492 = vadd.xlane.f32.xlu1 %v3491_v49  ;;  %v3408_v28 = vpop.xlane.xlu1 %3407 }
 0xec2   : > { %v3436_v3 = vmul.f32 0.03125, %v3405_v30  ;;  %v3437_v16 = vmul.f32 0.03125, %v3408_v28  ;;  %v3466_v1 = vmul.f32 %v7665_v9, %v7665_v9  ;;  %v3467_v47 = vmul.f32 %v7668_v31, %v7668_v31 }
 0xec3   : > { %5326 = vmatpush3.bf16.msra.mxu1 %v5623_v43 }
 0xec4   : > { %v7677_v51 = vsub.f32 %v7592_v2, %v3436_v3  ;;  %v7680_v5 = vsub.f32 %v7596_v19, %v3437_v16  ;;  %v3494_v45 = vsel %vm883_vm1, %v3466_v1, 0.0  ;;  %v3497_v12 = vsel %vm883_vm1, %v3467_v47, 0.0 }
 0xec5   : > { %v3411_v54 = vpop.xlane.xlu0 %3410  ;;  %3495 = vadd.xlane.f32.xlu0 %v3494_v45  ;;  %3498 = vadd.xlane.f32.xlu1 %v3497_v12  ;;  %v3414_v22 = vpop.xlane.xlu1 %3413 }
 0xec6   : > { %v3438_v36 = vmul.f32 0.03125, %v3411_v54  ;;  %v3439_v27 = vmul.f32 0.03125, %v3414_v22  ;;  %v3468_v59 = vmul.f32 %v7677_v51, %v7677_v51  ;;  %v3469_v2 = vmul.f32 %v7680_v5, %v7680_v5 }
 0xec8   : > { %v7689_v19 = vsub.f32 %v7598_v25, %v3438_v36  ;;  %v7692_v18 = vsub.f32 %v7600_v17, %v3439_v27  ;;  %v3500_v55 = vsel %vm883_vm1, %v3468_v59, 0.0  ;;  %v3503_v60 = vsel %vm883_vm1, %v3469_v2, 0.0  ;;  %v5620_v17 = vld [vmem:[%s6309_s25] sm:$0xff]  }
 0xec9   : > { %3501 = vadd.xlane.f32.xlu0 %v3500_v55  ;;  %3504 = vadd.xlane.f32.xlu1 %v3503_v60  ;;  %v7735_v2 = vld [vmem:[%s8393_s26] ss:$0 sm:$0xff] }
 0xeca   : > { %v3470_v62 = vmul.f32 %v7689_v19, %v7689_v19  ;;  %v3471_v8 = vmul.f32 %v7692_v18, %v7692_v18  ;;  %5303 = vmatprep.subr.bf16.mxu0 %v5620_v17 }
 0xecb   : > { %5304 = vmatpush3.bf16.msra.mxu0 %v5620_v17 }
 0xecc   : > { %v3506_v41 = vsel %vm883_vm1, %v3470_v62, 0.0  ;;  %v3509_v25 = vsel %vm883_vm1, %v3471_v8, 0.0  ;;  %5305 = vmatprep.subr.bf16.mxu0 %v5621_v24 }
 0xecd   : > { %3507 = vadd.xlane.f32.xlu0 %v3506_v41  ;;  %3510 = vadd.xlane.f32.xlu1 %v3509_v25 }
 0xecf   : > { %5306 = vmatpush3.bf16.msra.mxu0 %v5621_v24 }
 0xeeb   : > { %v3417_v21 = vpop.xlane.xlu0 %3416 }
 0xeec   : > { %v3440_v35 = vmul.f32 0.03125, %v3417_v21 }
 0xeed   : > { %v3420_v13 = vpop.xlane.xlu1 %3419 }
 0xeee   : > { %v7705_v7 = vsub.f32 %v7613_v58, %v3440_v35  ;;  %v3441_v11 = vmul.f32 0.03125, %v3420_v13 }
 0xeef   : > { %v3423_v38 = vpop.xlane.xlu0 %3422 }
 0xef0   : > { %v7708_v53 = vsub.f32 %v7618_v14, %v3441_v11  ;;  %v3442_v26 = vmul.f32 0.03125, %v3423_v38  ;;  %v3472_v0 = vmul.f32 %v7705_v7, %v7705_v7  ;;  %v7745_v38 = vld [vmem:[%s8394_s14] ss:$0 sm:$0xff] }
 0xef1   : > { %v3426_v40 = vpop.xlane.xlu1 %3425 }
 0xef2   : > { %v7713_v50 = vsub.f32 %v7616_v15, %v3442_v26  ;;  %v3443_v20 = vmul.f32 0.03125, %v3426_v40  ;;  %v3512_v61 = vsel %vm883_vm1, %v3472_v0, 0.0  ;;  %v3473_v58 = vmul.f32 %v7708_v53, %v7708_v53 }
 0xef3   : > { %3513 = vadd.xlane.f32.xlu0 %v3512_v61 }
 0xef4   : > { %v7719_v14 = vsub.f32 %v7622_v4, %v3443_v20  ;;  %v3515_v37 = vsel %vm883_vm1, %v3473_v58, 0.0  ;;  %v3474_v29 = vmul.f32 %v7713_v50, %v7713_v50 }
 0xef5   : > { %3516 = vadd.xlane.f32.xlu1 %v3515_v37 }
 0xef6   : > { %v3518_v52 = vsel %vm883_vm1, %v3474_v29, 0.0  ;;  %v3475_v15 = vmul.f32 %v7719_v14, %v7719_v14 }
 0xef7   : > { %3519 = vadd.xlane.f32.xlu0 %v3518_v52 }
 0xef8   : > { %v3521_v63 = vsel %vm883_vm1, %v3475_v15, 0.0 }
 0xef9   : > { %3522 = vadd.xlane.f32.xlu1 %v3521_v63 }
 0xf44   : > { %v3478_v4 = vpop.xlane.xlu0 %3477 }
 0xf45   : > { %v3524_v32 = vmul.f32 0.03125, %v3478_v4 }
 0xf46   : > { %v3481_v57 = vpop.xlane.xlu1 %3480 }
 0xf47   : > { %v3540_v34 = vadd.f32 1e-05, %v3524_v32  ;;  %v3525_v56 = vmul.f32 0.03125, %v3481_v57 }
 0xf49   : > { %5882 = vrsqrt.f32 %v3540_v34  ;;  %v3541_v46 = vadd.f32 1e-05, %v3525_v56 }
 0xf4a   : > { %v3484_v6 = vpop.xlane.xlu0 %3483  ;;  %v3487_v49 = vpop.xlane.xlu1 %3486 }
 0xf4b   : > { %5884 = vrsqrt.f32 %v3541_v46  ;;  %v3526_v30 = vmul.f32 0.03125, %v3484_v6  ;;  %v3527_v28 = vmul.f32 0.03125, %v3487_v49 }
 0xf4d   : > { %v3542_v3 = vadd.f32 1e-05, %v3526_v30  ;;  %v3543_v16 = vadd.f32 1e-05, %v3527_v28 }
 0xf4e   : > { %v3490_v1 = vpop.xlane.xlu0 %3489  ;;  %v3493_v47 = vpop.xlane.xlu1 %3492 }
 0xf4f   : > { %5886 = vrsqrt.f32 %v3542_v3  ;;  %v3528_v45 = vmul.f32 0.03125, %v3490_v1  ;;  %v3529_v12 = vmul.f32 0.03125, %v3493_v47 }
 0xf50   : > { %5888 = vrsqrt.f32 %v3543_v16 }
 0xf51   : > { %v3544_v54 = vadd.f32 1e-05, %v3528_v45  ;;  %v3545_v22 = vadd.f32 1e-05, %v3529_v12 }
 0xf52   : > { %v3496_v36 = vpop.xlane.xlu0 %3495  ;;  %v3499_v27 = vpop.xlane.xlu1 %3498 }
 0xf53   : > { %v5883_v59 = vpop.eup %5882  ;;  %5890 = vrsqrt.f32 %v3544_v54  ;;  %v3530_v55 = vmul.f32 0.03125, %v3496_v36  ;;  %v3531_v60 = vmul.f32 0.03125, %v3499_v27 }
 0xf54   : > { %v3572_v62 = vmul.f32 %v5883_v59, %v7631_v42  ;;  %5892 = vrsqrt.f32 %v3545_v22 }
 0xf55   : > { %v5885_v8 = vpop.eup %5884  ;;  %v3546_v41 = vadd.f32 1e-05, %v3530_v55  ;;  %v3547_v25 = vadd.f32 1e-05, %v3531_v60 }
 0xf56   : > { %v3573_v17 = vmul.f32 %v5885_v8, %v7634_v48  ;;  %v3502_v24 = vpop.xlane.xlu0 %3501  ;;  %v3505_v21 = vpop.xlane.xlu1 %3504  ;;  %v3595_v35 = vmul.f32 %v7735_v2, %v3572_v62 }
 0xf57   : > { %5894 = vrsqrt.f32 %v3546_v41  ;;  %v3532_v13 = vmul.f32 0.03125, %v3502_v24  ;;  %v3533_v11 = vmul.f32 0.03125, %v3505_v21 }
 0xf58   : > { %5896 = vrsqrt.f32 %v3547_v25  ;;  %v3596_v42 = vmul.f32 %v7735_v2, %v3573_v17  ;;  %v7750_v37 = vadd.f32 %v7745_v38, %v3595_v35 }
 0xf59   : > { %v5887_v26 = vpop.eup %5886  ;;  %v3548_v0 = vadd.f32 1e-05, %v3532_v13  ;;  %v3549_v40 = vadd.f32 1e-05, %v3533_v11 }
 0xf5a   : > { %v5889_v48 = vpop.eup %5888  ;;  %v3574_v20 = vmul.f32 %v5887_v26, %v7645_v33  ;;  %v3508_v61 = vpop.xlane.xlu0 %3507  ;;  %v7753_v29 = vadd.f32 %v7745_v38, %v3596_v42 }
 0xf5b   : > { %v3511_v58 = vpop.xlane.xlu1 %3510  ;;  %v3575_v52 = vmul.f32 %v5889_v48, %v7639_v44  ;;  %5898 = vrsqrt.f32 %v3548_v0  ;;  %v3534_v15 = vmul.f32 0.03125, %v3508_v61 }
 0xf5c   : > { %v3535_v63 = vmul.f32 0.03125, %v3511_v58  ;;  %v3597_v39 = vmul.f32 %v7735_v2, %v3574_v20  ;;  %5900 = vrsqrt.f32 %v3549_v40  ;;  %v3634_v43 = vpack.c.bf16 %v7753_v29, %v7750_v37 }
 0xf5d   : > { %v5891_v33 = vpop.eup %5890  ;;  %v3598_v4 = vmul.f32 %v7735_v2, %v3575_v52  ;;  %v3550_v32 = vadd.f32 1e-05, %v3534_v15 }
 0xf5e   : > { %v3551_v57 = vadd.f32 1e-05, %v3535_v63  ;;  %v5893_v34 = vpop.eup %5892  ;;  %v3576_v56 = vmul.f32 %v5891_v33, %v7653_v10  ;;  %5307 = vmatprep.mubr.msk.bf16.mxu0 %vm883_vm1, %v3634_v43  ;;  %v7763_v44 = vadd.f32 %v7745_v38, %v3597_v39 }
 0xf5f   : > { %v3577_v46 = vmul.f32 %v5893_v34, %v7656_v23  ;;  %5902 = vrsqrt.f32 %v3550_v32  ;;  %v7767_v6 = vadd.f32 %v7745_v38, %v3598_v4 }
 0xf60   : > { %5904 = vrsqrt.f32 %v3551_v57  ;;  %v3599_v49 = vmul.f32 %v7735_v2, %v3576_v56 }
 0xf61   : > { %v5895_v30 = vpop.eup %5894  ;;  %v3635_v28 = vpack.c.bf16 %v7767_v6, %v7763_v44  ;;  %v3600_v10 = vmul.f32 %v7735_v2, %v3577_v46 }
 0xf62   : > { %v5897_v3 = vpop.eup %5896  ;;  %v3578_v16 = vmul.f32 %v5895_v30, %v7665_v9  ;;  %v7775_v1 = vadd.f32 %v7745_v38, %v3599_v49 }
 0xf63   : > { %v3579_v23 = vmul.f32 %v5897_v3, %v7668_v31  ;;  %5308 = vmatmul.mubr.msk.bf16.vlgmr.msra.gmra.mrb[84].mxu0 %vm883_vm1, %v3635_v28  ;;  %v7780_v47 = vadd.f32 %v7745_v38, %v3600_v10 }
 0xf64   : > { %v3601_v45 = vmul.f32 %v7735_v2, %v3578_v16  ;;  %v5624_v16 = vld [vmem:[%s6319_s16 + $0x10] sm:$0xff]  }
 0xf65   : > { %v5899_v12 = vpop.eup %5898  ;;  %v3636_v54 = vpack.c.bf16 %v7780_v47, %v7775_v1  ;;  %v3602_v22 = vmul.f32 %v7735_v2, %v3579_v23  ;;  %5327 = vmatprep.subr.bf16.mxu1 %v5624_v16  ;;  %v5625_v23 = vld [vmem:[%s6319_s16 + $0x18] sm:$0xff]   ;;  %s8399_s16 = sld [smem:[#allocation44_spill]] (!%p4819_p2) }
 0xf66   : > { %v5901_v36 = vpop.eup %5900  ;;  %v3580_v9 = vmul.f32 %v5899_v12, %v7677_v51  ;;  %v7788_v27 = vadd.f32 %v7745_v38, %v3601_v45  ;;  %5328 = vmatpush3.bf16.msra.mxu1 %v5624_v16 }
 0xf67   : > { %v3581_v31 = vmul.f32 %v5901_v36, %v7680_v5  ;;  %5311 = vmatprep.mubr.msk.bf16.mxu0 %vm883_vm1, %v3636_v54  ;;  %v7793_v59 = vadd.f32 %v7745_v38, %v3602_v22  ;;  %5329 = vmatprep.subr.bf16.mxu1 %v5625_v23 }
 0xf68   : > { %v3603_v55 = vmul.f32 %v7735_v2, %v3580_v9 }
 0xf69   : > { %v5903_v60 = vpop.eup %5902  ;;  %v3637_v62 = vpack.c.bf16 %v7793_v59, %v7788_v27  ;;  %v3604_v8 = vmul.f32 %v7735_v2, %v3581_v31 }
 0xf6a   : > { %v5905_v41 = vpop.eup %5904  ;;  %v3582_v51 = vmul.f32 %v5903_v60, %v7689_v19  ;;  %v7801_v25 = vadd.f32 %v7745_v38, %v3603_v55  ;;  %5330 = vmatpush3.bf16.msra.mxu1 %v5625_v23 }
 0xf6b   : > { %v3583_v5 = vmul.f32 %v5905_v41, %v7692_v18  ;;  %5312 = vmatmul.mubr.msk.bf16.gmra.mrb[88].mxu0 %vm883_vm1, %v3637_v62  ;;  %v7806_v17 = vadd.f32 %v7745_v38, %v3604_v8 }
 0xf6c   : > { %v3605_v24 = vmul.f32 %v7735_v2, %v3582_v51 }
 0xf6d   : > { %v3638_v21 = vpack.c.bf16 %v7806_v17, %v7801_v25  ;;  %v3606_v35 = vmul.f32 %v7735_v2, %v3583_v5 }
 0xf6e   : > { %v7813_v13 = vadd.f32 %v7745_v38, %v3605_v24 }
 0xf6f   : > { %5315 = vmatprep.mubr.msk.bf16.mxu0 %vm883_vm1, %v3638_v21  ;;  %v7817_v19 = vadd.f32 %v7745_v38, %v3606_v35 }
 0xf71   : > { %v3639_v18 = vpack.c.bf16 %v7817_v19, %v7813_v13 }
 0xf73   : > { %5316 = vmatmul.mubr.msk.bf16.gmra.mrb[92].mxu0 %vm883_vm1, %v3639_v18 }
 0xf80   : > { %v3514_v11 = vpop.xlane.xlu0 %3513 }
 0xf81   : > { %v3536_v42 = vmul.f32 0.03125, %v3514_v11 }
 0xf82   : > { %v3517_v26 = vpop.xlane.xlu1 %3516 }
 0xf83   : > { %v3552_v0 = vadd.f32 1e-05, %v3536_v42  ;;  %v3537_v40 = vmul.f32 0.03125, %v3517_v26 }
 0xf84   : > { %v3520_v48 = vpop.xlane.xlu0 %3519 }
 0xf85   : > { %5906 = vrsqrt.f32 %v3552_v0  ;;  %v3553_v20 = vadd.f32 1e-05, %v3537_v40  ;;  %v3538_v61 = vmul.f32 0.03125, %v3520_v48 }
 0xf86   : > { %v3523_v58 = vpop.xlane.xlu1 %3522 }
 0xf87   : > { %5908 = vrsqrt.f32 %v3553_v20  ;;  %v3554_v52 = vadd.f32 1e-05, %v3538_v61  ;;  %v3539_v15 = vmul.f32 0.03125, %v3523_v58 }
 0xf89   : > { %5910 = vrsqrt.f32 %v3554_v52  ;;  %v3555_v63 = vadd.f32 1e-05, %v3539_v15 }
 0xf8b   : > { %5912 = vrsqrt.f32 %v3555_v63 }
 0xf8f   : > { %v5907_v39 = vpop.eup %5906 }
 0xf90   : > { %v3584_v43 = vmul.f32 %v5907_v39, %v7705_v7 }
 0xf91   : > { %v5909_v33 = vpop.eup %5908 }
 0xf92   : > { %v3585_v4 = vmul.f32 %v5909_v33, %v7708_v53  ;;  %v3607_v32 = vmul.f32 %v7735_v2, %v3584_v43 }
 0xf93   : > { %v5911_v57 = vpop.eup %5910 }
 0xf94   : > { %v3586_v34 = vmul.f32 %v5911_v57, %v7713_v50  ;;  %v3608_v56 = vmul.f32 %v7735_v2, %v3585_v4  ;;  %v7829_v30 = vadd.f32 %v7745_v38, %v3607_v32 }
 0xf95   : > { %v5913_v46 = vpop.eup %5912 }
 0xf96   : > { %v3587_v49 = vmul.f32 %v5913_v46, %v7719_v14  ;;  %v7832_v7 = vadd.f32 %v7745_v38, %v3608_v56  ;;  %v3609_v53 = vmul.f32 %v7735_v2, %v3586_v34 }
 0xf98   : > { %v3640_v28 = vpack.c.bf16 %v7832_v7, %v7829_v30  ;;  %v3610_v50 = vmul.f32 %v7735_v2, %v3587_v49  ;;  %v7839_v10 = vadd.f32 %v7745_v38, %v3609_v53  ;;  %v4793_v2 = vld [vmem:[%s778_s4] ss:$0 sm:$0xff] }
 0xf9a   : > { %5319 = vmatprep.mubr.msk.bf16.mxu0 %vm883_vm1, %v3640_v28  ;;  %v7843_v14 = vadd.f32 %v7745_v38, %v3610_v50 }
 0xf9c   : > { %v3641_v3 = vpack.c.bf16 %v7843_v14, %v7839_v10 }
 0xf9e   : > { %5320 = vmatmul.mubr.msk.bf16.gmra.mrb[96].mxu0 %vm883_vm1, %v3641_v3 }
0x1036   : > { %v5309_v45 = vpop.f32.mrb[84].mxu0 }
0x1037   : > { %v3732_v12 = vadd.f32 %v5309_v45, %v4793_v2  ;;  %v3723_v38 = vpop.f32.mrb[85].mxu0 }
0x1038   : > { %v3724_v54 = vadd.f32 %v4793_v2, %v3723_v38  ;;  %v5310_v22 = vpop.f32.mrb[86].mxu0 }
0x1039   : > { %v3735_v36 = vadd.f32 %v5310_v22, %v4793_v2  ;;  %v3726_v9 = vpop.f32.mrb[87].mxu0  ;;  %v3788_v55 = vmax.f32 %v3732_v12, 0.0 }
0x103a   : > { %v3727_v31 = vadd.f32 %v4793_v2, %v3726_v9  ;;  %v3786_v62 = vmax.f32 %v3724_v54, 0.0 }
0x103b   : > { %v3789_v60 = vmax.f32 %v3735_v36, 0.0 }
0x103c   : > { %v3787_v8 = vmax.f32 %v3727_v31, 0.0 }
0x103d   : > { %v3803_v41 = vpack.c.bf16 %v3789_v60, %v3788_v55  ;;  %v7868_v60 = vld [vmem:[%s786_s2] ss:$0 sm:$0xff] }
0x103e   : > { %v3802_v51 = vpack.c.bf16 %v3787_v8, %v3786_v62  ;;  %v5313_v5 = vpop.f32.mrb[88].mxu0 }
0x103f   : > { %v3748_v24 = vadd.f32 %v5313_v5, %v4793_v2  ;;  %v3739_v21 = vpop.f32.mrb[89].mxu0 }
0x1040   : > { %v3740_v35 = vadd.f32 %v4793_v2, %v3739_v21  ;;  %v5314_v18 = vpop.f32.mrb[90].mxu0  ;;  %5331 = vmatprep.mubr.msk.bf16.mxu1 %vm3849_vm6, %v3802_v51 }
0x1041   : > { %v3751_v11 = vadd.f32 %v5314_v18, %v4793_v2  ;;  %v3742_v42 = vpop.f32.mrb[91].mxu0  ;;  %5332 = vmatmul.mubr.msk.bf16.vlgmr.msra.gmra.mrb[76].mxu1 %vm3849_vm6, %v3803_v41  ;;  %v3792_v0 = vmax.f32 %v3748_v24, 0.0 }
0x1042   : > { %v3743_v26 = vadd.f32 %v4793_v2, %v3742_v42  ;;  %v3790_v48 = vmax.f32 %v3740_v35, 0.0 }
0x1043   : > { %v3793_v40 = vmax.f32 %v3751_v11, 0.0 }
0x1044   : > { %v3791_v20 = vmax.f32 %v3743_v26, 0.0 }
0x1045   : > { %v3805_v61 = vpack.c.bf16 %v3793_v40, %v3792_v0 }
0x1046   : > { %v3804_v58 = vpack.c.bf16 %v3791_v20, %v3790_v48  ;;  %v5317_v52 = vpop.f32.mrb[92].mxu0 }
0x1047   : > { %v3764_v15 = vadd.f32 %v5317_v52, %v4793_v2  ;;  %v3755_v63 = vpop.f32.mrb[93].mxu0 }
0x1048   : > { %v3756_v39 = vadd.f32 %v4793_v2, %v3755_v63  ;;  %v5318_v43 = vpop.f32.mrb[94].mxu0  ;;  %5335 = vmatprep.mubr.msk.bf16.mxu1 %vm3849_vm6, %v3804_v58 }
0x1049   : > { %v3767_v33 = vadd.f32 %v5318_v43, %v4793_v2  ;;  %v3758_v4 = vpop.f32.mrb[95].mxu0  ;;  %5336 = vmatmul.mubr.msk.bf16.gmra.mrb[80].mxu1 %vm3849_vm6, %v3805_v61  ;;  %v3796_v57 = vmax.f32 %v3764_v15, 0.0 }
0x104a   : > { %v3759_v32 = vadd.f32 %v4793_v2, %v3758_v4  ;;  %v3794_v56 = vmax.f32 %v3756_v39, 0.0 }
0x104b   : > { %v3797_v34 = vmax.f32 %v3767_v33, 0.0 }
0x104c   : > { %v3795_v46 = vmax.f32 %v3759_v32, 0.0 }
0x104d   : > { %v3807_v49 = vpack.c.bf16 %v3797_v34, %v3796_v57 }
0x104e   : > { %v3806_v53 = vpack.c.bf16 %v3795_v46, %v3794_v56 }
0x1050   : > { %5339 = vmatprep.mubr.msk.bf16.mxu1 %vm3849_vm6, %v3806_v53 }
0x1051   : > { %5340 = vmatmul.mubr.msk.bf16.gmra.mrb[84].mxu1 %vm3849_vm6, %v3807_v49 }
0x1071   : > { %v5321_v28 = vpop.f32.mrb[96].mxu0 }
0x1072   : > { %v3780_v50 = vadd.f32 %v5321_v28, %v4793_v2  ;;  %v3771_v3 = vpop.f32.mrb[97].mxu0 }
0x1073   : > { %v3772_v16 = vadd.f32 %v4793_v2, %v3771_v3  ;;  %v5322_v23 = vpop.f32.mrb[98].mxu0 }
0x1074   : > { %v3783_v45 = vadd.f32 %v5322_v23, %v4793_v2  ;;  %v3774_v12 = vpop.f32.mrb[99].mxu0  ;;  %v3800_v54 = vmax.f32 %v3780_v50, 0.0 }
0x1075   : > { %v3775_v38 = vadd.f32 %v4793_v2, %v3774_v12  ;;  %v3798_v36 = vmax.f32 %v3772_v16, 0.0 }
0x1076   : > { %v3801_v22 = vmax.f32 %v3783_v45, 0.0 }
0x1077   : > { %v3799_v9 = vmax.f32 %v3775_v38, 0.0 }
0x1078   : > { %v3809_v31 = vpack.c.bf16 %v3801_v22, %v3800_v54 }
0x1079   : > { %v3808_v55 = vpack.c.bf16 %v3799_v9, %v3798_v36 }
0x107b   : > { %5343 = vmatprep.mubr.msk.bf16.mxu1 %vm3849_vm6, %v3808_v55 }
0x107c   : > { %5344 = vmatmul.mubr.msk.bf16.gmra.mrb[88].mxu1 %vm3849_vm6, %v3809_v31 }
0x1114   : > { %v5333_v62 = vpop.f32.mrb[76].mxu1 }
0x1115   : > { %v3917_v8 = vadd.f32 %v5333_v62, %v7868_v60  ;;  %v3908_v2 = vpop.f32.mrb[77].mxu1 }
0x1116   : > { %v3909_v41 = vadd.f32 %v7868_v60, %v3908_v2  ;;  %v5334_v51 = vpop.f32.mrb[78].mxu1 }
0x1117   : > { %v7873_v5 = vadd.f32 %v3917_v8, %v7763_v44  ;;  %v3920_v24 = vadd.f32 %v5334_v51, %v7868_v60  ;;  %v3911_v21 = vpop.f32.mrb[79].mxu1 }
0x1118   : > { %v3912_v35 = vadd.f32 %v7868_v60, %v3911_v21  ;;  %v7878_v18 = vadd.f32 %v3909_v41, %v7750_v37 }
0x1119   : > { %v7881_v11 = vadd.f32 %v3920_v24, %v7767_v6  ;;  %v3993_v42 = vsel %vm883_vm1, %v7873_v5, 0.0 }
0x111a   : > { %3994 = vadd.xlane.f32.xlu0 %v3993_v42  ;;  %v7886_v26 = vadd.f32 %v3912_v35, %v7753_v29  ;;  %v3987_v37 = vsel %vm883_vm1, %v7878_v18, 0.0 }
0x111b   : > { %v3996_v44 = vsel %vm883_vm1, %v7881_v11, 0.0 }
0x111c   : > { %3997 = vadd.xlane.f32.xlu1 %v3996_v44  ;;  %v5337_v0 = vpop.f32.mrb[80].mxu1  ;;  %v3990_v52 = vsel %vm883_vm1, %v7886_v26, 0.0 }
0x111d   : > { %v3933_v40 = vadd.f32 %v5337_v0, %v7868_v60  ;;  %v3924_v48 = vpop.f32.mrb[81].mxu1 }
0x111e   : > { %v3925_v6 = vadd.f32 %v7868_v60, %v3924_v48  ;;  %3988 = vadd.xlane.f32.xlu0 %v3987_v37  ;;  %v5338_v20 = vpop.f32.mrb[82].mxu1 }
0x111f   : > { %v7895_v61 = vadd.f32 %v3933_v40, %v7788_v27  ;;  %v3936_v29 = vadd.f32 %v5338_v20, %v7868_v60  ;;  %v3927_v58 = vpop.f32.mrb[83].mxu1 }
0x1120   : > { %v3928_v15 = vadd.f32 %v7868_v60, %v3927_v58  ;;  %3991 = vadd.xlane.f32.xlu1 %v3990_v52  ;;  %v7902_v63 = vadd.f32 %v3925_v6, %v7775_v1 }
0x1121   : > { %v7905_v39 = vadd.f32 %v3936_v29, %v7793_v59  ;;  %v4005_v43 = vsel %vm883_vm1, %v7895_v61, 0.0 }
0x1122   : > { %4006 = vadd.xlane.f32.xlu0 %v4005_v43  ;;  %v7910_v27 = vadd.f32 %v3928_v15, %v7780_v47  ;;  %v3999_v1 = vsel %vm883_vm1, %v7902_v63, 0.0 }
0x1123   : > { %v4008_v33 = vsel %vm883_vm1, %v7905_v39, 0.0 }
0x1124   : > { %4009 = vadd.xlane.f32.xlu1 %v4008_v33  ;;  %v5341_v4 = vpop.f32.mrb[84].mxu1  ;;  %v4002_v49 = vsel %vm883_vm1, %v7910_v27, 0.0 }
0x1125   : > { %v3949_v32 = vadd.f32 %v5341_v4, %v7868_v60  ;;  %v3940_v57 = vpop.f32.mrb[85].mxu1 }
0x1126   : > { %v3941_v59 = vadd.f32 %v7868_v60, %v3940_v57  ;;  %4000 = vadd.xlane.f32.xlu0 %v3999_v1  ;;  %v5342_v34 = vpop.f32.mrb[86].mxu1 }
0x1127   : > { %v7919_v56 = vadd.f32 %v3949_v32, %v7813_v13  ;;  %v3952_v47 = vadd.f32 %v5342_v34, %v7868_v60  ;;  %v3943_v46 = vpop.f32.mrb[87].mxu1 }
0x1128   : > { %v3944_v53 = vadd.f32 %v7868_v60, %v3943_v46  ;;  %4003 = vadd.xlane.f32.xlu1 %v4002_v49  ;;  %v7926_v28 = vadd.f32 %v3941_v59, %v7801_v25 }
0x1129   : > { %v7929_v50 = vadd.f32 %v3952_v47, %v7817_v19  ;;  %v4017_v3 = vsel %vm883_vm1, %v7919_v56, 0.0 }
0x112a   : > { %4018 = vadd.xlane.f32.xlu0 %v4017_v3  ;;  %v7934_v13 = vadd.f32 %v3944_v53, %v7806_v17  ;;  %v4011_v23 = vsel %vm883_vm1, %v7926_v28, 0.0 }
0x112b   : > { %v4020_v16 = vsel %vm883_vm1, %v7929_v50, 0.0 }
0x112c   : > { %4021 = vadd.xlane.f32.xlu1 %v4020_v16  ;;  %v4014_v25 = vsel %vm883_vm1, %v7934_v13, 0.0 }
0x112e   : > { %4012 = vadd.xlane.f32.xlu0 %v4011_v23 }
0x1130   : > { %4015 = vadd.xlane.f32.xlu1 %v4014_v25 }
0x114f   : > { %v5345_v19 = vpop.f32.mrb[88].mxu1 }
0x1150   : > { %v3965_v45 = vadd.f32 %v5345_v19, %v7868_v60  ;;  %v3956_v12 = vpop.f32.mrb[89].mxu1 }
0x1151   : > { %v3957_v38 = vadd.f32 %v7868_v60, %v3956_v12  ;;  %v5346_v17 = vpop.f32.mrb[90].mxu1 }
0x1152   : > { %v3968_v54 = vadd.f32 %v5346_v17, %v7868_v60  ;;  %v3959_v22 = vpop.f32.mrb[91].mxu1  ;;  %v7950_v31 = vadd.f32 %v3965_v45, %v7839_v10 }
0x1153   : > { %v7946_v36 = vadd.f32 %v3957_v38, %v7829_v30  ;;  %v3960_v9 = vadd.f32 %v7868_v60, %v3959_v22 }
0x1154   : > { %v7958_v8 = vadd.f32 %v3968_v54, %v7843_v14  ;;  %v4029_v30 = vsel %vm883_vm1, %v7950_v31, 0.0 }
0x1155   : > { %v7953_v55 = vadd.f32 %v3960_v9, %v7832_v7  ;;  %v4023_v62 = vsel %vm883_vm1, %v7946_v36, 0.0 }
0x1156   : > { %4024 = vadd.xlane.f32.xlu0 %v4023_v62  ;;  %v4032_v10 = vsel %vm883_vm1, %v7958_v8, 0.0 }
0x1157   : > { %v4026_v2 = vsel %vm883_vm1, %v7953_v55, 0.0 }
0x1158   : > { %4027 = vadd.xlane.f32.xlu1 %v4026_v2 }
0x115a   : > { %4030 = vadd.xlane.f32.xlu0 %v4029_v30 }
0x115c   : > { %4033 = vadd.xlane.f32.xlu1 %v4032_v10 }
0x11a7   : > { %v3995_v7 = vpop.xlane.xlu0 %3994 }
0x11a8   : > { %v4037_v60 = vmul.f32 0.03125, %v3995_v7 }
0x11a9   : > { %v3998_v41 = vpop.xlane.xlu1 %3997 }
0x11aa   : > { %v7967_v51 = vsub.f32 %v7873_v5, %v4037_v60  ;;  %v4038_v14 = vmul.f32 0.03125, %v3998_v41 }
0x11ab   : > { %v3989_v24 = vpop.xlane.xlu0 %3988 }
0x11ac   : > { %v7970_v21 = vsub.f32 %v7881_v11, %v4038_v14  ;;  %v4035_v35 = vmul.f32 0.03125, %v3989_v24  ;;  %v4069_v42 = vmul.f32 %v7967_v51, %v7967_v51 }
0x11ad   : > { %v3992_v44 = vpop.xlane.xlu1 %3991 }
0x11ae   : > { %v7975_v0 = vsub.f32 %v7878_v18, %v4035_v35  ;;  %v4036_v40 = vmul.f32 0.03125, %v3992_v44  ;;  %v4089_v48 = vsel %vm883_vm1, %v4069_v42, 0.0  ;;  %v4070_v5 = vmul.f32 %v7970_v21, %v7970_v21 }
0x11af   : > { %v4007_v37 = vpop.xlane.xlu0 %4006  ;;  %4090 = vadd.xlane.f32.xlu0 %v4089_v48 }
0x11b0   : > { %v7981_v6 = vsub.f32 %v7886_v26, %v4036_v40  ;;  %v4041_v11 = vmul.f32 0.03125, %v4007_v37  ;;  %v4092_v20 = vsel %vm883_vm1, %v4070_v5, 0.0  ;;  %v4067_v29 = vmul.f32 %v7975_v0, %v7975_v0 }
0x11b1   : > { %4093 = vadd.xlane.f32.xlu1 %v4092_v20  ;;  %v4010_v18 = vpop.xlane.xlu1 %4009 }
0x11b2   : > { %v7987_v58 = vsub.f32 %v7895_v61, %v4041_v11  ;;  %v4042_v52 = vmul.f32 0.03125, %v4010_v18  ;;  %v4083_v15 = vsel %vm883_vm1, %v4067_v29, 0.0  ;;  %v4068_v43 = vmul.f32 %v7981_v6, %v7981_v6 }
0x11b3   : > { %v4001_v33 = vpop.xlane.xlu0 %4000  ;;  %4084 = vadd.xlane.f32.xlu0 %v4083_v15 }
0x11b4   : > { %v7993_v26 = vsub.f32 %v7905_v39, %v4042_v52  ;;  %v4039_v4 = vmul.f32 0.03125, %v4001_v33  ;;  %v4086_v32 = vsel %vm883_vm1, %v4068_v43, 0.0  ;;  %v4073_v57 = vmul.f32 %v7987_v58, %v7987_v58 }
0x11b5   : > { %4087 = vadd.xlane.f32.xlu1 %v4086_v32  ;;  %v4004_v61 = vpop.xlane.xlu1 %4003 }
0x11b6   : > { %v7999_v1 = vsub.f32 %v7902_v63, %v4039_v4  ;;  %v4040_v59 = vmul.f32 0.03125, %v4004_v61  ;;  %v4101_v34 = vsel %vm883_vm1, %v4073_v57, 0.0  ;;  %v4074_v47 = vmul.f32 %v7993_v26, %v7993_v26 }
0x11b7   : > { %v4019_v46 = vpop.xlane.xlu0 %4018  ;;  %4102 = vadd.xlane.f32.xlu0 %v4101_v34 }
0x11b8   : > { %v8005_v39 = vsub.f32 %v7910_v27, %v4040_v59  ;;  %v4045_v49 = vmul.f32 0.03125, %v4019_v46  ;;  %v4104_v53 = vsel %vm883_vm1, %v4074_v47, 0.0  ;;  %v4071_v3 = vmul.f32 %v7999_v1, %v7999_v1 }
0x11b9   : > { %4105 = vadd.xlane.f32.xlu1 %v4104_v53  ;;  %v4022_v63 = vpop.xlane.xlu1 %4021 }
0x11ba   : > { %v8011_v16 = vsub.f32 %v7919_v56, %v4045_v49  ;;  %v4046_v23 = vmul.f32 0.03125, %v4022_v63  ;;  %v4095_v25 = vsel %vm883_vm1, %v4071_v3, 0.0  ;;  %v4072_v19 = vmul.f32 %v8005_v39, %v8005_v39 }
0x11bb   : > { %v4013_v45 = vpop.xlane.xlu0 %4012  ;;  %4096 = vadd.xlane.f32.xlu0 %v4095_v25 }
0x11bc   : > { %v8017_v27 = vsub.f32 %v7929_v50, %v4046_v23  ;;  %v4043_v12 = vmul.f32 0.03125, %v4013_v45  ;;  %v4098_v38 = vsel %vm883_vm1, %v4072_v19, 0.0  ;;  %v4077_v17 = vmul.f32 %v8011_v16, %v8011_v16 }
0x11bd   : > { %4099 = vadd.xlane.f32.xlu1 %v4098_v38  ;;  %v4016_v56 = vpop.xlane.xlu1 %4015 }
0x11be   : > { %v8023_v54 = vsub.f32 %v7926_v28, %v4043_v12  ;;  %v4044_v22 = vmul.f32 0.03125, %v4016_v56  ;;  %v4113_v9 = vsel %vm883_vm1, %v4077_v17, 0.0  ;;  %v4078_v62 = vmul.f32 %v8017_v27, %v8017_v27  ;;  %v8067_v17 = vld [vmem:[%s789_s0] ss:$0 sm:$0xff]  ;;  %s8395_s0 = sld [smem:[#allocation41_spill]] (!%p4819_p2) }
0x11bf   : > { %4114 = vadd.xlane.f32.xlu0 %v4113_v9 }
0x11c0   : > { %v8029_v50 = vsub.f32 %v7934_v13, %v4044_v22  ;;  %v4116_v2 = vsel %vm883_vm1, %v4078_v62, 0.0  ;;  %v4075_v30 = vmul.f32 %v8023_v54, %v8023_v54 }
0x11c1   : > { %4117 = vadd.xlane.f32.xlu1 %v4116_v2 }
0x11c2   : > { %v4107_v10 = vsel %vm883_vm1, %v4075_v30, 0.0  ;;  %v4076_v28 = vmul.f32 %v8029_v50, %v8029_v50  ;;  %v8075_v30 = vld [vmem:[%s792_s29] ss:$0 sm:$0xff] }
0x11c3   : > { %4108 = vadd.xlane.f32.xlu0 %v4107_v10 }
0x11c4   : > { %v4110_v7 = vsel %vm883_vm1, %v4076_v28, 0.0  ;;  %s8396_s25 = smov (!%p4819_p2), %s8395_s0 }
0x11c5   : > { %4111 = vadd.xlane.f32.xlu1 %v4110_v7 }
0x11e3   : > { %v4025_v60 = vpop.xlane.xlu0 %4024 }
0x11e4   : > { %v4047_v41 = vmul.f32 0.03125, %v4025_v60 }
0x11e5   : > { %v4028_v14 = vpop.xlane.xlu1 %4027 }
0x11e6   : > { %v8039_v13 = vsub.f32 %v7946_v36, %v4047_v41  ;;  %v4048_v24 = vmul.f32 0.03125, %v4028_v14 }
0x11e7   : > { %v4031_v35 = vpop.xlane.xlu0 %4030 }
0x11e8   : > { %v8042_v42 = vsub.f32 %v7953_v55, %v4048_v24  ;;  %v4049_v44 = vmul.f32 0.03125, %v4031_v35  ;;  %v4079_v40 = vmul.f32 %v8039_v13, %v8039_v13 }
0x11e9   : > { %v4034_v48 = vpop.xlane.xlu1 %4033 }
0x11ea   : > { %v8047_v5 = vsub.f32 %v7950_v31, %v4049_v44  ;;  %v4050_v37 = vmul.f32 0.03125, %v4034_v48  ;;  %v4119_v11 = vsel %vm883_vm1, %v4079_v40, 0.0  ;;  %v4080_v36 = vmul.f32 %v8042_v42, %v8042_v42 }
0x11eb   : > { %4120 = vadd.xlane.f32.xlu0 %v4119_v11 }
0x11ec   : > { %v8053_v20 = vsub.f32 %v7958_v8, %v4050_v37  ;;  %v4122_v55 = vsel %vm883_vm1, %v4080_v36, 0.0  ;;  %v4081_v29 = vmul.f32 %v8047_v5, %v8047_v5 }
0x11ed   : > { %4123 = vadd.xlane.f32.xlu1 %v4122_v55 }
0x11ee   : > { %v4125_v18 = vsel %vm883_vm1, %v4081_v29, 0.0  ;;  %v4082_v31 = vmul.f32 %v8053_v20, %v8053_v20 }
0x11ef   : > { %4126 = vadd.xlane.f32.xlu0 %v4125_v18 }
0x11f0   : > { %v4128_v52 = vsel %vm883_vm1, %v4082_v31, 0.0 }
0x11f1   : > { %4129 = vadd.xlane.f32.xlu1 %v4128_v52 }
0x123c   : > { %v4091_v15 = vpop.xlane.xlu0 %4090 }
0x123d   : > { %v4133_v43 = vmul.f32 0.03125, %v4091_v15 }
0x123e   : > { %v4094_v33 = vpop.xlane.xlu1 %4093 }
0x123f   : > { %v4149_v8 = vadd.f32 1e-05, %v4133_v43  ;;  %v4134_v4 = vmul.f32 0.03125, %v4094_v33 }
0x1240   : > { %v4085_v32 = vpop.xlane.xlu0 %4084 }
0x1241   : > { %5914 = vrsqrt.f32 %v4149_v8  ;;  %v4150_v57 = vadd.f32 1e-05, %v4134_v4  ;;  %v4131_v61 = vmul.f32 0.03125, %v4085_v32 }
0x1242   : > { %v4088_v59 = vpop.xlane.xlu1 %4087 }
0x1243   : > { %5916 = vrsqrt.f32 %v4150_v57  ;;  %v4147_v34 = vadd.f32 1e-05, %v4131_v61  ;;  %v4132_v47 = vmul.f32 0.03125, %v4088_v59 }
0x1244   : > { %v4103_v46 = vpop.xlane.xlu0 %4102 }
0x1245   : > { %5918 = vrsqrt.f32 %v4147_v34  ;;  %v4148_v49 = vadd.f32 1e-05, %v4132_v47  ;;  %v4137_v53 = vmul.f32 0.03125, %v4103_v46 }
0x1246   : > { %v4106_v3 = vpop.xlane.xlu1 %4105 }
0x1247   : > { %5920 = vrsqrt.f32 %v4148_v49  ;;  %v4153_v63 = vadd.f32 1e-05, %v4137_v53  ;;  %v4138_v23 = vmul.f32 0.03125, %v4106_v3 }
0x1248   : > { %v4097_v25 = vpop.xlane.xlu0 %4096 }
0x1249   : > { %5922 = vrsqrt.f32 %v4153_v63  ;;  %v4154_v19 = vadd.f32 1e-05, %v4138_v23  ;;  %v4135_v45 = vmul.f32 0.03125, %v4097_v25 }
0x124a   : > { %v4100_v12 = vpop.xlane.xlu1 %4099 }
0x124b   : > { %v5915_v38 = vpop.eup %5914  ;;  %5924 = vrsqrt.f32 %v4154_v19  ;;  %v4151_v56 = vadd.f32 1e-05, %v4135_v45  ;;  %v4136_v22 = vmul.f32 0.03125, %v4100_v12 }
0x124c   : > { %v4181_v9 = vmul.f32 %v5915_v38, %v7967_v51  ;;  %v4115_v62 = vpop.xlane.xlu0 %4114 }
0x124d   : > { %v5917_v2 = vpop.eup %5916  ;;  %5926 = vrsqrt.f32 %v4151_v56  ;;  %v4152_v10 = vadd.f32 1e-05, %v4136_v22  ;;  %v4141_v28 = vmul.f32 0.03125, %v4115_v62 }
0x124e   : > { %v4204_v7 = vmul.f32 %v8067_v17, %v4181_v9  ;;  %v4182_v60 = vmul.f32 %v5917_v2, %v7970_v21  ;;  %v4118_v41 = vpop.xlane.xlu1 %4117 }
0x124f   : > { %v5919_v14 = vpop.eup %5918  ;;  %5928 = vrsqrt.f32 %v4152_v10  ;;  %v4157_v24 = vadd.f32 1e-05, %v4141_v28  ;;  %v4142_v51 = vmul.f32 0.03125, %v4118_v41 }
0x1250   : > { %v8080_v35 = vadd.f32 %v8075_v30, %v4204_v7  ;;  %v4205_v44 = vmul.f32 %v8067_v17, %v4182_v60  ;;  %v4179_v40 = vmul.f32 %v5919_v14, %v7975_v0  ;;  %v4109_v48 = vpop.xlane.xlu0 %4108 }
0x1251   : > { %v5921_v37 = vpop.eup %5920  ;;  %5930 = vrsqrt.f32 %v4157_v24  ;;  %v4158_v11 = vadd.f32 1e-05, %v4142_v51  ;;  %v4139_v36 = vmul.f32 0.03125, %v4109_v48 }
0x1252   : > { %4243 = vst.msk [vmem:[#allocation2 + $0x10] sm:$0xff] %vm883_vm1, %v8080_v35  ;;  %v8087_v21 = vadd.f32 %v8075_v30, %v4205_v44  ;;  %v4202_v55 = vmul.f32 %v8067_v17, %v4179_v40  ;;  %v4180_v29 = vmul.f32 %v5921_v37, %v7981_v6  ;;  %v4112_v18 = vpop.xlane.xlu1 %4111 }
0x1253   : > { %v5923_v31 = vpop.eup %5922  ;;  %5932 = vrsqrt.f32 %v4158_v11  ;;  %v4155_v52 = vadd.f32 1e-05, %v4139_v36  ;;  %v4140_v0 = vmul.f32 0.03125, %v4112_v18 }
0x1254   : > { %4244 = vst.msk [vmem:[#allocation2 + $0x18] sm:$0xff] %vm883_vm1, %v8087_v21  ;;  %v8094_v15 = vadd.f32 %v8075_v30, %v4202_v55  ;;  %v4203_v43 = vmul.f32 %v8067_v17, %v4180_v29  ;;  %v4185_v33 = vmul.f32 %v5923_v31, %v7987_v58 }
0x1255   : > { %v5925_v8 = vpop.eup %5924  ;;  %5934 = vrsqrt.f32 %v4155_v52  ;;  %v4156_v4 = vadd.f32 1e-05, %v4140_v0 }
0x1256   : > { %4241 = vst.msk [vmem:[#allocation2] sm:$0xff] %vm883_vm1, %v8094_v15  ;;  %v8101_v6 = vadd.f32 %v8075_v30, %v4203_v43  ;;  %v4208_v32 = vmul.f32 %v8067_v17, %v4185_v33  ;;  %v4186_v57 = vmul.f32 %v5925_v8, %v7993_v26 }
0x1257   : > { %v5927_v61 = vpop.eup %5926  ;;  %5936 = vrsqrt.f32 %v4156_v4 }
0x1258   : > { %4242 = vst.msk [vmem:[#allocation2 + $0x8] sm:$0xff] %vm883_vm1, %v8101_v6  ;;  %v8108_v58 = vadd.f32 %v8075_v30, %v4208_v32  ;;  %v4209_v59 = vmul.f32 %v8067_v17, %v4186_v57  ;;  %v4183_v34 = vmul.f32 %v5927_v61, %v7999_v1  ;;  %v4343_v57 = vmul.f32 (!%p4819_p2), 0.0, %v8101_v6 }
0x1259   : > { %v5929_v47 = vpop.eup %5928  ;;  %v4344_v61 = vmul.f32 (!%p4819_p2), 0.0, %v8080_v35 }
0x125a   : > { %4247 = vst.msk [vmem:[#allocation2 + $0x30] sm:$0xff] %vm883_vm1, %v8108_v58  ;;  %v8115_v46 = vadd.f32 %v8075_v30, %v4209_v59  ;;  %v4206_v26 = vmul.f32 %v8067_v17, %v4183_v34  ;;  %v4184_v49 = vmul.f32 %v5929_v47, %v8005_v39  ;;  %v4345_v59 = vmul.f32 (!%p4819_p2), 0.0, %v8087_v21 }
0x125b   : > { %v5931_v53 = vpop.eup %5930  ;;  %v4348_v35 = vmul.f32 (!%p4819_p2), 0.0, %v8108_v58 }
0x125c   : > { %4248 = vst.msk [vmem:[#allocation2 + $0x38] sm:$0xff] %vm883_vm1, %v8115_v46  ;;  %v8122_v3 = vadd.f32 %v8075_v30, %v4206_v26  ;;  %v4207_v1 = vmul.f32 %v8067_v17, %v4184_v49  ;;  %v4189_v63 = vmul.f32 %v5931_v53, %v8011_v16  ;;  %v4359_v26 = vsel (!%p4819_p2), %vm883_vm1, %v4343_v57, 0.0 }
0x125d   : > { %v5933_v23 = vpop.eup %5932  ;;  %v4361_v49 = vsel (!%p4819_p2), %vm883_vm1, %v4344_v61, 0.0  ;;  %v4363_v6 = vsel (!%p4819_p2), %vm883_vm1, %v4345_v59, 0.0 }
0x125e   : > { %4245 = vst.msk [vmem:[#allocation2 + $0x20] sm:$0xff] %vm883_vm1, %v8122_v3  ;;  %v8129_v25 = vadd.f32 %v8075_v30, %v4207_v1  ;;  %v4212_v39 = vmul.f32 %v8067_v17, %v4189_v63  ;;  %v4190_v19 = vmul.f32 %v5933_v23, %v8017_v27  ;;  %v4346_v34 = vmul.f32 (!%p4819_p2), 0.0, %v8122_v3 }
0x125f   : > { %v5935_v45 = vpop.eup %5934  ;;  %v4349_v23 = vmul.f32 (!%p4819_p2), 0.0, %v8115_v46 }
0x1260   : > { %4246 = vst.msk [vmem:[#allocation2 + $0x28] sm:$0xff] %vm883_vm1, %v8129_v25  ;;  %v8136_v12 = vadd.f32 %v8075_v30, %v4212_v39  ;;  %v4213_v16 = vmul.f32 %v8067_v17, %v4190_v19  ;;  %v4187_v38 = vmul.f32 %v5935_v45, %v8023_v54  ;;  %v4365_v63 = vsel (!%p4819_p2), %vm883_vm1, %v4346_v34, 0.0 }
0x1261   : > { %v5937_v56 = vpop.eup %5936  ;;  %v4369_v45 = vsel (!%p4819_p2), %vm883_vm1, %v4348_v35, 0.0 }
0x1262   : > { %4251 = vst.msk [vmem:[#allocation2 + $0x50] sm:$0xff] %vm883_vm1, %v8136_v12  ;;  %v8143_v22 = vadd.f32 %v8075_v30, %v4213_v16  ;;  %v4210_v27 = vmul.f32 %v8067_v17, %v4187_v38  ;;  %v4188_v9 = vmul.f32 %v5937_v56, %v8029_v50  ;;  %v4371_v38 = vsel (!%p4819_p2), %vm883_vm1, %v4349_v23, 0.0 }
0x1263   : > { %v4352_v58 = vmul.f32 (!%p4819_p2), 0.0, %v8136_v12 }
0x1264   : > { %4252 = vst.msk [vmem:[#allocation2 + $0x58] sm:$0xff] %vm883_vm1, %v8143_v22  ;;  %v8150_v62 = vadd.f32 %v8075_v30, %v4210_v27  ;;  %v4211_v2 = vmul.f32 %v8067_v17, %v4188_v9  ;;  %v4353_v46 = vmul.f32 (!%p4819_p2), 0.0, %v8143_v22 }
0x1266   : > { %4249 = vst.msk [vmem:[#allocation2 + $0x40] sm:$0xff] %vm883_vm1, %v8150_v62  ;;  %v8156_v54 = vadd.f32 %v8075_v30, %v4211_v2  ;;  %v4350_v19 = vmul.f32 (!%p4819_p2), 0.0, %v8150_v62  ;;  %v4377_v62 = vsel (!%p4819_p2), %vm883_vm1, %v4352_v58, 0.0 }
0x1268   : > { %4250 = vst.msk [vmem:[#allocation2 + $0x48] sm:$0xff] %vm883_vm1, %v8156_v54  ;;  %v4373_v27 = vsel (!%p4819_p2), %vm883_vm1, %v4350_v19, 0.0 }
0x1278   : > { %v4121_v10 = vpop.xlane.xlu0 %4120 }
0x1279   : > { %v4143_v28 = vmul.f32 0.03125, %v4121_v10 }
0x127a   : > { %v4124_v50 = vpop.xlane.xlu1 %4123 }
0x127b   : > { %v4159_v7 = vadd.f32 1e-05, %v4143_v28  ;;  %v4144_v60 = vmul.f32 0.03125, %v4124_v50 }
0x127c   : > { %v4127_v41 = vpop.xlane.xlu0 %4126 }
0x127d   : > { %5938 = vrsqrt.f32 %v4159_v7  ;;  %v4160_v14 = vadd.f32 1e-05, %v4144_v60  ;;  %v4145_v24 = vmul.f32 0.03125, %v4127_v41 }
0x127e   : > { %v4130_v51 = vpop.xlane.xlu1 %4129 }
0x127f   : > { %5940 = vrsqrt.f32 %v4160_v14  ;;  %v4161_v44 = vadd.f32 1e-05, %v4145_v24  ;;  %v4146_v40 = vmul.f32 0.03125, %v4130_v51 }
0x1281   : > { %5942 = vrsqrt.f32 %v4161_v44  ;;  %v4162_v48 = vadd.f32 1e-05, %v4146_v40 }
0x1283   : > { %5944 = vrsqrt.f32 %v4162_v48 }
0x1287   : > { %v5939_v37 = vpop.eup %5938 }
0x1288   : > { %v4191_v11 = vmul.f32 %v5939_v37, %v8039_v13 }
0x1289   : > { %v5941_v36 = vpop.eup %5940 }
0x128a   : > { %v4214_v55 = vmul.f32 %v8067_v17, %v4191_v11  ;;  %v4192_v29 = vmul.f32 %v5941_v36, %v8042_v42 }
0x128b   : > { %v5943_v18 = vpop.eup %5942 }
0x128c   : > { %v4237_v31 = vadd.f32 %v8075_v30, %v4214_v55  ;;  %v4215_v52 = vmul.f32 %v8067_v17, %v4192_v29  ;;  %v4193_v0 = vmul.f32 %v5943_v18, %v8047_v5  ;;  %v5977_v5 = vld [vmem:[%s8395_s0] sm:$0xff] (!%p4819_p2)  }
0x128d   : > { %v5945_v43 = vpop.eup %5944 }
0x128e   : > { %4253 = vst.msk [vmem:[#allocation2 + $0x60] sm:$0xff] %vm883_vm1, %v4237_v31  ;;  %v4238_v33 = vadd.f32 %v8075_v30, %v4215_v52  ;;  %v4216_v8 = vmul.f32 %v8067_v17, %v4193_v0  ;;  %v4194_v13 = vmul.f32 %v5945_v43, %v8053_v20  ;;  %4260 = sbr.rel (%p4819_p2) target bundleno = 5234 (0x1472), region = 100  ;;  %v6090_v20 = vmov (!%p4819_p2), 0.0   ;;  %v5979_v43 = vld [vmem:[%s8397_s15] sm:$0xff] (!%p4819_p2)  }
0x128f   : > { %5347 = vmatprep.subr.bf16.mxu0 (!%p4819_p2), %v6090_v20  ;;  %5355 = vmatprep.subr.bf16.mxu1 (!%p4819_p2), %v6090_v20  ;;  %v4354_v28 = vmul.f32 (!%p4819_p2), 0.0, %v4237_v31 }
0x1290   : > { %4254 = vst.msk [vmem:[#allocation2 + $0x68] sm:$0xff] %vm883_vm1, %v4238_v33  ;;  %v4239_v42 = vadd.f32 %v8075_v30, %v4216_v8  ;;  %v4217_v4 = vmul.f32 %v8067_v17, %v4194_v13  ;;  %5348 = vmatpush3.bf16.msra.mxu0 (!%p4819_p2), %v5977_v5  ;;  %v5978_v17 = vld [vmem:[%s8396_s25 + $0x8] sm:$0xff] (!%p4819_p2)   ;;  %5351 = vmatprep.mubr.msk.bf16.mxu0 (!%p4819_p2), %vm6091_vm7, %v6090_v20  ;;  %v4355_v7 = vmul.f32 (!%p4819_p2), 0.0, %v4238_v33  ;;  %v4400_v33 = vld [vmem:[%s8398_s24] sm:$0x1] (!%p4819_p2) }
0x1291   : > { %5349 = vmatprep.subr.bf16.mxu0 (!%p4819_p2), %v6090_v20  ;;  %5357 = vmatprep.mubr.msk.bf16.mxu1 (!%p4819_p2), %vm6091_vm7, %v6090_v20  ;;  %v4381_v14 = vsel (!%p4819_p2), %vm883_vm1, %v4354_v28, 0.0 }
0x1292   : > { %4255 = vst.msk [vmem:[#allocation2 + $0x70] sm:$0xff] %vm883_vm1, %v4239_v42  ;;  %v4240_v32 = vadd.f32 %v8075_v30, %v4217_v4  ;;  %v4342_v30 = vmul.f32 (!%p4819_p2), 0.125, %v8094_v15  ;;  %v4347_v15 = vmul.f32 (!%p4819_p2), 0.0, %v8129_v25  ;;  %v4351_v25 = vmul.f32 (!%p4819_p2), 0.0, %v8156_v54  ;;  %5356 = vmatpush3.bf16.msra.mxu1 (!%p4819_p2), %v5979_v43 }
0x1293   : > { %v4379_v54 = vsel (!%p4819_p2), %vm883_vm1, %v4353_v46, 0.0  ;;  %v4356_v41 = vmul.f32 (!%p4819_p2), 0.0, %v4239_v42  ;;  %v4383_v51 = vsel (!%p4819_p2), %vm883_vm1, %v4355_v7, 0.0 }
0x1294   : > { %4256 = vst.msk [vmem:[#allocation2 + $0x78] sm:$0xff] %vm883_vm1, %v4240_v32  ;;  %5350 = vmatpush3.bf16.msra.mxu0 (!%p4819_p2), %v5978_v17  ;;  %v4358_v47 = vsel (!%p4819_p2), %vm883_vm1, %v4342_v30, 0.0  ;;  %v4367_v3 = vsel (!%p4819_p2), %vm883_vm1, %v4347_v15, 0.0  ;;  %v4375_v2 = vsel (!%p4819_p2), %vm883_vm1, %v4351_v25, 0.0  ;;  %v4357_v24 = vmul.f32 (!%p4819_p2), 0.0, %v4240_v32 }
0x1295   : > { %v4360_v53 = vadd.f32 %v4359_v26, %v4358_v47  ;;  %v4385_v22 = vsel %vm883_vm1, %v4356_v41, 0.0  ;;  %v4460_v17 = vld [vmem:[%s8399_s16] sm:$0x1] }
0x1296   : > { %v4387_v48 = vsel %vm883_vm1, %v4357_v24, 0.0 }
0x1297   : > { %v4362_v1 = vadd.f32 %v4361_v49, %v4360_v53 }
0x1299   : > { %v4364_v21 = vadd.f32 %v4363_v6, %v4362_v1 }
0x129b   : > { %v4366_v39 = vadd.f32 %v4365_v63, %v4364_v21 }
0x129d   : > { %v4368_v16 = vadd.f32 %v4367_v3, %v4366_v39 }
0x129f   : > { %v4370_v56 = vadd.f32 %v4369_v45, %v4368_v16 }
0x12a1   : > { %v4372_v9 = vadd.f32 %v4371_v38, %v4370_v56 }
0x12a3   : > { %v4374_v10 = vadd.f32 %v4373_v27, %v4372_v9 }
0x12a5   : > { %v4376_v50 = vadd.f32 %v4375_v2, %v4374_v10 }
0x12a7   : > { %v4378_v60 = vadd.f32 %v4377_v62, %v4376_v50 }
0x12a9   : > { %v4380_v12 = vadd.f32 %v4379_v54, %v4378_v60 }
0x12ab   : > { %v4382_v44 = vadd.f32 %v4381_v14, %v4380_v12 }
0x12ad   : > { %v4384_v40 = vadd.f32 %v4383_v51, %v4382_v44 }
0x12af   : > { %v4386_v37 = vadd.f32 %v4385_v22, %v4384_v40 }
0x12b1   : > { %v4388_v11 = vadd.f32 %v4387_v48, %v4386_v37 }
0x12b3   : > { %v4389_v36 = vrot.slane %v4388_v11, 4 }
0x12b5   : > { %v4390_v55 = vadd.f32 %v4389_v36, %v4388_v11 }
0x12b7   : > { %v4391_v29 = vrot.slane %v4390_v55, 2 }
0x12b9   : > { %v4392_v18 = vadd.f32 %v4391_v29, %v4390_v55 }
0x12bb   : > { %v4393_v31 = vrot.slane %v4392_v18, 1 }
0x12bd   : > { %v4394_v52 = vadd.f32 %v4393_v31, %v4392_v18 }
0x12bf   : > { %v4395_v0 = vpack.c.bf16 %v4394_v52, %v4394_v52 }
0x12c1   : > { %5352 = vmatmul.mubr.msk.bf16.vlgmr.msra.gmra.mrb[0].mxu0 %vm883_vm1, %v4395_v0 }
0x1394   : > { %v4450_v8 = vpop.f32.mrb[0].mxu0 }
0x1395   : > { %v4451_v13 = vadd.f32 %v4450_v8, %v4400_v33  ;;  %v5353_v42 = vpop.f32.mrb[1].mxu0 }
0x1396   : > { %v4453_v4 = vpop.f32.mrb[2].mxu0 }
0x1397   : > { %v4456_v32 = vmax.f32 %v4451_v13, 0.0  ;;  %v5354_v5 = vpop.f32.mrb[3].mxu0 }
0x1399   : > { %v4457_v20 = vpack.c.bf16 %v4456_v32, %v4456_v32 }
0x139b   : > { %5358 = vmatmul.mubr.msk.bf16.vlgmr.msra.gmra.mrb[0].mxu1 %vm3166_vm4, %v4457_v20 }
0x146e   : > { %v4504_v30 = vpop.f32.mrb[0].mxu1 }
0x146f   : > { %v4505_v57 = vadd.f32 %v4504_v30, %v4460_v17  ;;  %v5359_v61 = vpop.f32.mrb[1].mxu1 }
0x1470   : > { %v4507_v59 = vpop.f32.mrb[2].mxu1 }
0x1471   : > { %4511 = vst.msk [vmem:[%s6335_s21] sm:$0x1] %vm4510_vm8, %v4505_v57  ;;  %v5360_v34 = vpop.f32.mrb[3].mxu1 }
0x1472 PF: > { %s8400_s2 = sld [smem:[#allocation18_spill]]  ;;  %s8401_s18 = sld [smem:[#allocation45_spill]] }
0x1473   : > { %s4525_s0 = sshll.u32 %s6335_s21, 4  ;;  %s8403_s19 = sand.u32 1, %s6050_s28   ;;  %s4526_s0 = int_to_ptr.vmem [resolvable:$true] %s4525_s0 }
0x1474   : > { %s4513_s27 = scalar_lea.sflag [#allocation6], %s8403_s19  ;;  %s5980_s30 = scalar_lea.vmem %s4526_s0, 16 }
0x1475   : > { %p5981_p4 = scmp.ne.s32.totalorder %s4526_s0, %s5980_s30  ;;  %s6092_s26 = smov [#allocation5]  }
0x1476   : > { %s5984_s15 = sshll.u32 %s6092_s26, 4  ;;  %s5985_s15 = int_to_ptr.vmem [resolvable:$false] %s5984_s15 }
0x1477   : > { %p5982_p5 = pnand %p5981_p4, %p6237_p3  ;;  %s5986_s17 = scalar_lea.vmem %s5985_s15, 32 }
0x1478   : > { %s8227_s22 = scalar_lea.hbm %s8401_s18, %s8400_s2  ;;  %p5987_p7 = scmp.lt.s32.totalorder %s4526_s0, %s5985_s15 }
0x1479   : > { %p5983_p6 = pneg %p5982_p5  ;;  %p5988_p8 = scmp.lt.s32.totalorder %s5986_s17, %s5980_s30 }
0x147b   : > { %p5989_p10 = por %p5988_p8, %p5987_p7 }
0x147d   : > { %p5990_p11 = pnand %p5989_p10, %p5983_p6 }
0x147f   : > { %5993 = shalt.err (!%p5990_p11)
}
0x1480   : > { %s5994_s21 = scalar_lea.hbm %s8227_s22, 16  ;;  %s5998_s23 = scalar_lea.hbm %s8401_s18, 32 }
0x1481   : > { %p5995_p12 = scmp.ne.s32.totalorder %s8227_s22, %s5994_s21  ;;  %p5999_p1 = scmp.lt.u32.totalorder %s8227_s22, %s8401_s18 }
0x1482   : > { %p6000_p2 = scmp.lt.u32.totalorder %s5998_s23, %s5994_s21  ;;  %p6002_p5 = scmp.lt.u32.totalorder %s5994_s21, %s8227_s22 }
0x1483   : > { %p5996_p13 = pnand %p5995_p12, %p6237_p3 }
0x1484   : > { %p6001_p4 = por %p6000_p2, %p5999_p1 }
0x1485   : > { %p5997_p0 = pneg %p5996_p13 }
0x1486   : > { %p6003_p6 = por %p6002_p5, %p6001_p4 }
0x1488   : > { %p6004_p7 = pnand %p6003_p6, %p5997_p0 }
0x148a   : > { %6007 = shalt.err (!%p6004_p7)
}
0x148b   : > { %5409 = dma.vmem_to_hbm [thread:$0]  (%p6237_p3), %s4526_s0, 16, %s8227_s22, %s4513_s27  }
0x148c PF: > { %s8404_s2 = sld [smem:[#allocation12_spill]]  ;;  %s8405_s1 = sld [smem:[#allocation8_spill]] }
0x1492   : > { %p5415_p8 = scmp.ge.s32.totalorder %s8404_s2, 2  ;;  %s4537_s19 = sand.u32 1, %s8405_s1  }
0x1493   : > { %s4538_s30 = scalar_lea.sflag [#allocation6], %s4537_s19 }
0x1494   : > { %p5412_p10 = pnand %p5415_p8, %p6247_p9 }
0x1496   : > { %6041 = dma.done.wait (!%p5412_p10), %s4538_s30, 16  }
0x1497   : > { %6043 = vsyncadd (!%p5412_p10), %s4538_s30, 4294967280  ;;  %s31_s20 = sadd.s32 1, %s8404_s2   ;;  %s8407_s26 = sld [smem:[#allocation9_spill]] }
0x1498   : > { %p28_p11 = scmp.ge.s32.totalorder %s31_s20, 6   ;;  %s8408_s29 = sld [smem:[#allocation17_spill]] }
0x1499   : > { %s8409_s30 = sld [smem:[#allocation10_spill]]  ;;  %s8410_s0 = sld [smem:[#allocation11_spill]] }
0x149a   : > { %s8411_s19 = sld [smem:[#allocation13_spill]]  ;;  %s8412_s1 = sld [smem:[#allocation15_spill]] }
0x149b   : > { %s8413_s27 = smov %s6050_s28  ;;  %30 = sbr.rel (!%p28_p11) target bundleno = 15 (0xf), region = 174 }
0x149d   : > { %s8414_s28 = smov %s8407_s26 }
0x14a2   :  { %4542 = vsyncpa [#allocation6], 1 }
0x14a3   :  { %4544 = vsyncpa [#allocation6 + $0x1], 1 }

</bundles_post_ra>
